<compile_context>
chip_gen: v7x
topology: tpu7x:2x2x1
jax: 0.10.0
libtpu: 0.0.40
codegen_flags: <defaults>
</compile_context>

<pallas_src>
import functools

import jax
import jax.numpy as jnp
from jax.experimental import pallas as pl
from jax.experimental.pallas import tpu as pltpu

LANE = 128
SUBLANE = 8  # f32 sublane quantum


def _round_up(n, m):
    return ((n + m - 1) // m) * m


# ----------------------------------------------------------------------------
# Fused kernel: [LSTM layer 0, LSTM layer 1, ..., FC] in one pallas_call.
# ----------------------------------------------------------------------------
def _make_fused_lstm_kernel(nlayers, seq_len, batch_pad):
    S, Bp = seq_len, batch_pad

    def kernel(*refs):
        # refs = (x2d, (wih, whh, bias) * nlayers, fc_w, fc_b, out, hbuf, gbuf)
        x_ref = refs[0]
        layer_refs = refs[1:1 + 3 * nlayers]
        fcw_ref, fcb_ref, out_ref, hbuf, gbuf = refs[1 + 3 * nlayers:]

        Hp = hbuf.shape[-1]          # padded hidden size (multiple of 128)

        def project(src_ref, wih_ref, b_ref):
            # Hoisted input projection: one MXU call with M = S*Bp rows; the
            # bias add is folded in here instead of the serial loop.
            gbuf[...] = (
                jnp.dot(src_ref[...], wih_ref[...],
                        preferred_element_type=jnp.float32)
                + b_ref[...]
            )

        def recur(whh_ref):
            # Serial recurrence: per step only h_prev @ Whh^T + full-vreg gate
            # math, on (8, 128)-aligned full tiles.
            def step(t, carry):
                h, c = carry
                row = pl.ds(pl.multiple_of(t * Bp, Bp), Bp)
                g = gbuf[row, :] + jnp.dot(
                    h, whh_ref[...], preferred_element_type=jnp.float32)
                i_g = jax.nn.sigmoid(g[:, 0 * Hp:1 * Hp])
                f_g = jax.nn.sigmoid(g[:, 1 * Hp:2 * Hp])
                g_g = jnp.tanh(g[:, 2 * Hp:3 * Hp])
                o_g = jax.nn.sigmoid(g[:, 3 * Hp:4 * Hp])
                c_new = f_g * c + i_g * g_g
                h_new = o_g * jnp.tanh(c_new)
                hbuf[row, :] = h_new
                return (h_new, c_new)

            zero = jnp.zeros((Bp, Hp), jnp.float32)   # init_hidden: zeros
            jax.lax.fori_loop(0, S, step, (zero, zero), unroll=True)

        src = x_ref
        for l in range(nlayers):
            wih_ref, whh_ref, b_ref = layer_refs[3 * l:3 * l + 3]
            project(src, wih_ref, b_ref)
            recur(whh_ref)
            src = hbuf               # next layer consumes this layer's hiddens

        # FC head fused as epilogue: single lane-dense (S*Bp, Tp) writeback.
        out_ref[...] = (
            jnp.dot(hbuf[...], fcw_ref[...], preferred_element_type=jnp.float32)
            + fcb_ref[...]
        )

    return kernel


# ----------------------------------------------------------------------------
# Forward matching LSTM.forward(images): (B, S, D) -> (S, B, ntoken)
# ----------------------------------------------------------------------------
@functools.partial(jax.jit, static_argnames=("ntoken",))
def lstm_forward(packed, images, *, ntoken):
    B, S, D = images.shape
    Bp = _round_up(max(B, SUBLANE), SUBLANE)          # batch padded to sublane
    nlayers = len(packed["layers"])
    Hp = packed["layers"][0]["whh"].shape[0]          # padded hidden size
    G = 4 * Hp
    Tp = packed["fc_w"].shape[1]                      # padded ntoken

    # images.permute(1, 0, 2) -> time-major; pad batch rows to Bp (row-
    # independent, sliced off after the call); flatten to (S*Bp, D).
    x = jnp.transpose(images, (1, 0, 2)).astype(jnp.float32)      # (S, B, D)
    x = jnp.pad(x, ((0, 0), (0, Bp - B), (0, 0)))                 # (S, Bp, D)
    x2d = x.reshape(S * Bp, D)

    args = [x2d]
    for lp in packed["layers"]:
        args += [lp["wih"], lp["whh"], lp["bias"]]
    args += [packed["fc_w"], packed["fc_b"]]

    out2d = pl.pallas_call(
        _make_fused_lstm_kernel(nlayers, S, Bp),
        out_shape=jax.ShapeDtypeStruct((S * Bp, Tp), jnp.float32),
        scratch_shapes=[
            pltpu.VMEM((S * Bp, Hp), jnp.float32),   # per-step hidden states
            pltpu.VMEM((S * Bp, G), jnp.float32),    # hoisted gate pre-acts
        ],
    )(*args)

    # Drop padded batch rows and padded token lanes: (seq, batch, ntoken).
    return out2d.reshape(S, Bp, Tp)[:, :B, :ntoken]


# ----------------------------------------------------------------------------
# Parameters: raw PyTorch-layout init + lane-aligned packing for the kernel.
# ----------------------------------------------------------------------------
def init_params(key, input_dim, nhid, ntoken, nlayers):
    """Raw parameters in PyTorch nn.LSTM / nn.Linear layout."""
    bound = 1.0 / float(nhid) ** 0.5
    layers = []
    for l in range(nlayers):
        d_in = input_dim if l == 0 else nhid
        key, k1, k2, k3, k4 = jax.random.split(key, 5)
        layers.append(dict(
            wih=jax.random.uniform(k1, (4 * nhid, d_in), jnp.float32, -bound, bound),
            whh=jax.random.uniform(k2, (4 * nhid, nhid), jnp.float32, -bound, bound),
            bih=jax.random.uniform(k3, (4 * nhid,), jnp.float32, -bound, bound),
            bhh=jax.random.uniform(k4, (4 * nhid,), jnp.float32, -bound, bound),
        ))
    key, k5, k6 = jax.random.split(key, 3)
    fc_w = jax.random.uniform(k5, (ntoken, nhid), jnp.float32, -bound, bound)
    fc_b = jax.random.uniform(k6, (ntoken,), jnp.float32, -bound, bound)
    return dict(layers=layers, fc_w=fc_w, fc_b=fc_b)


def pack_params(raw, input_dim, nhid, ntoken):
    """Transpose + zero-pad raw params into the kernel's lane-aligned layout."""
    Hp = _round_up(nhid, LANE)
    Tp = _round_up(ntoken, LANE)

    def pad_gate_cols(m):
        # m: (rows, 4*nhid) -> (rows, 4*Hp); each i/f/g/o chunk padded to Hp lanes.
        chunks = [m[:, k * nhid:(k + 1) * nhid] for k in range(4)]
        chunks = [jnp.pad(c, ((0, 0), (0, Hp - nhid))) for c in chunks]
        return jnp.concatenate(chunks, axis=1)

    layers = []
    for l, lp in enumerate(raw["layers"]):
        in_rows = input_dim if l == 0 else Hp
        d_in = lp["wih"].shape[1]
        wih_t = pad_gate_cols(lp["wih"].T)                       # (d_in, 4Hp)
        wih_t = jnp.pad(wih_t, ((0, in_rows - d_in), (0, 0)))    # rows for l > 0
        whh_t = pad_gate_cols(lp["whh"].T)                       # (nhid, 4Hp)
        whh_t = jnp.pad(whh_t, ((0, Hp - nhid), (0, 0)))         # (Hp, 4Hp)
        bias = pad_gate_cols((lp["bih"] + lp["bhh"])[None, :])   # (1, 4Hp)
        layers.append(dict(wih=wih_t, whh=whh_t, bias=bias))

    fc_w = jnp.pad(raw["fc_w"].T, ((0, Hp - nhid), (0, Tp - ntoken)))  # (Hp, Tp)
    fc_b = jnp.pad(raw["fc_b"][None, :], ((0, 0), (0, Tp - ntoken)))   # (1, Tp)
    return dict(layers=layers, fc_w=fc_w, fc_b=fc_b)


# ----------------------------------------------------------------------------
# Pure-JAX reference (unpadded params) for verification.
# ----------------------------------------------------------------------------
def lstm_forward_ref(raw, images):
    x = jnp.transpose(images, (1, 0, 2)).astype(jnp.float32)
    for lp in raw["layers"]:
        H = lp["whh"].shape[1]
        wih_t, whh_t = lp["wih"].T, lp["whh"].T
        b = lp["bih"] + lp["bhh"]
        Bsz = x.shape[1]

        def step(carry, x_t, wih_t=wih_t, whh_t=whh_t, b=b, H=H):
            h, c = carry
            g = x_t @ wih_t + h @ whh_t + b
            i = jax.nn.sigmoid(g[:, 0 * H:1 * H])
            f = jax.nn.sigmoid(g[:, 1 * H:2 * H])
            gg = jnp.tanh(g[:, 2 * H:3 * H])
            o = jax.nn.sigmoid(g[:, 3 * H:4 * H])
            c = f * c + i * gg
            h = o * jnp.tanh(c)
            return (h, c), h

        init = (jnp.zeros((Bsz, H), jnp.float32), jnp.zeros((Bsz, H), jnp.float32))
        _, x = jax.lax.scan(step, init, x)
    return x @ raw["fc_w"].T + raw["fc_b"]


if __name__ == "__main__":
    batch, seq, input_dim = 2, 8, 16
    nhid, nlayers, ntoken = 32, 2, 16

    key = jax.random.PRNGKey(0)
    kp, kx = jax.random.split(key)
    raw = init_params(kp, input_dim, nhid, ntoken, nlayers)
    packed = pack_params(raw, input_dim, nhid, ntoken)
    images = jax.random.normal(kx, (batch, seq, input_dim), jnp.float32)

    out = lstm_forward(packed, images, ntoken=ntoken)
    out = jax.block_until_ready(out)

    ref = lstm_forward_ref(raw, images)
    assert out.shape == (seq, batch, ntoken)
    assert jnp.allclose(out, ref, atol=1e-4, rtol=1e-4), "mismatch vs reference"

    print("KERNEL_OK")
</pallas_src>

<mosaic_0001>
module attributes {stable_mosaic.version = 11 : i64} {
  func.func @kernel(%arg0: memref<64x16xf32, #tpu.memory_space<vmem>>, %arg1: memref<16x512xf32, #tpu.memory_space<vmem>>, %arg2: memref<128x512xf32, #tpu.memory_space<vmem>>, %arg3: memref<1x512xf32, #tpu.memory_space<vmem>>, %arg4: memref<128x512xf32, #tpu.memory_space<vmem>>, %arg5: memref<128x512xf32, #tpu.memory_space<vmem>>, %arg6: memref<1x512xf32, #tpu.memory_space<vmem>>, %arg7: memref<128x128xf32, #tpu.memory_space<vmem>>, %arg8: memref<1x128xf32, #tpu.memory_space<vmem>>, %arg9: memref<64x128xf32, #tpu.memory_space<vmem>>, %arg10: memref<64x128xf32, #tpu.memory_space<vmem>>, %arg11: memref<64x512xf32, #tpu.memory_space<vmem>>) attributes {dimension_semantics = [], scalar_prefetch = 0 : i64, scratch_operands = 2 : i64, tpu.core_type = #tpu.core_type<tc>} {
    %c0 = arith.constant 0 : index
    %c0_0 = arith.constant 0 : index
    %0 = vector.load %arg0[%c0, %c0_0] : memref<64x16xf32, #tpu.memory_space<vmem>>, vector<64x16xf32>
    %c0_1 = arith.constant 0 : index
    %c0_2 = arith.constant 0 : index
    %1 = vector.load %arg1[%c0_1, %c0_2] : memref<16x512xf32, #tpu.memory_space<vmem>>, vector<16x512xf32>
    %cst = arith.constant dense<0.000000e+00> : vector<64x512xf32>
    %2 = tpu.matmul %0, %1, %cst {dimension_numbers = #tpu.dot_dimension_numbers<[1], [0], [0], [1], [0, 0, 1, 1], [], []>} : vector<64x16xf32>, vector<16x512xf32>, vector<64x512xf32> -> vector<64x512xf32>
    %c0_3 = arith.constant 0 : index
    %c0_4 = arith.constant 0 : index
    %3 = vector.load %arg3[%c0_3, %c0_4] : memref<1x512xf32, #tpu.memory_space<vmem>>, vector<1x512xf32>
    %4 = vector.broadcast %3 : vector<1x512xf32> to vector<64x512xf32>
    %5 = arith.addf %2, %4 : vector<64x512xf32>
    %c0_5 = arith.constant 0 : index
    %c0_6 = arith.constant 0 : index
    %6 = vector.load %arg11[%c0_5, %c0_6] : memref<64x512xf32, #tpu.memory_space<vmem>>, vector<64x512xf32>
    tpu.vector_store %arg11[%c0_5, %c0_6], %5 {strides = array<i32>} : memref<64x512xf32, #tpu.memory_space<vmem>>, vector<64x512xf32>,
    %cst_7 = arith.constant 0.000000e+00 : f32
    %7 = vector.broadcast %cst_7 : f32 to vector<8x128xf32>
    %c0_i32 = arith.constant 0 : i32
    %c8_i32 = arith.constant 8 : i32
    %8 = arith.muli %c0_i32, %c8_i32 : i32
    %9 = tpu.assume_multiple %8, 8 : i32
    %10 = arith.index_cast %9 : i32 to index
    %c0_8 = arith.constant 0 : index
    %11 = vector.load %arg11[%10, %c0_8] : memref<64x512xf32, #tpu.memory_space<vmem>>, vector<8x512xf32>
    %c0_9 = arith.constant 0 : index
    %c0_10 = arith.constant 0 : index
    %12 = vector.load %arg2[%c0_9, %c0_10] : memref<128x512xf32, #tpu.memory_space<vmem>>, vector<128x512xf32>
    %cst_11 = arith.constant dense<0.000000e+00> : vector<8x512xf32>
    %13 = tpu.matmul %7, %12, %cst_11 {dimension_numbers = #tpu.dot_dimension_numbers<[1], [0], [0], [1], [0, 0, 1, 1], [], []>} : vector<8x128xf32>, vector<128x512xf32>, vector<8x512xf32> -> vector<8x512xf32>
    %14 = arith.addf %11, %13 : vector<8x512xf32>
    %15 = vector.extract_strided_slice %14 {offsets = [0, 0], sizes = [8, 128], strides = [1, 1]} : vector<8x512xf32> to vector<8x128xf32>
    %16 = arith.negf %15 : vector<8x128xf32>
    %17 = math.exp %16 : vector<8x128xf32>
    %cst_12 = arith.constant 1.000000e+00 : f32
    %18 = vector.broadcast %cst_12 : f32 to vector<8x128xf32>
    %19 = arith.addf %18, %17 : vector<8x128xf32>
    %20 = arith.divf %18, %19 : vector<8x128xf32>
    %21 = vector.extract_strided_slice %14 {offsets = [0, 128], sizes = [8, 128], strides = [1, 1]} : vector<8x512xf32> to vector<8x128xf32>
    %22 = arith.negf %21 : vector<8x128xf32>
    %23 = math.exp %22 : vector<8x128xf32>
    %cst_13 = arith.constant 1.000000e+00 : f32
    %24 = vector.broadcast %cst_13 : f32 to vector<8x128xf32>
    %25 = arith.addf %24, %23 : vector<8x128xf32>
    %26 = arith.divf %24, %25 : vector<8x128xf32>
    %27 = vector.extract_strided_slice %14 {offsets = [0, 256], sizes = [8, 128], strides = [1, 1]} : vector<8x512xf32> to vector<8x128xf32>
    %28 = math.tanh %27 : vector<8x128xf32>
    %29 = vector.extract_strided_slice %14 {offsets = [0, 384], sizes = [8, 128], strides = [1, 1]} : vector<8x512xf32> to vector<8x128xf32>
    %30 = arith.negf %29 : vector<8x128xf32>
    %31 = math.exp %30 : vector<8x128xf32>
    %cst_14 = arith.constant 1.000000e+00 : f32
    %32 = vector.broadcast %cst_14 : f32 to vector<8x128xf32>
    %33 = arith.addf %32, %31 : vector<8x128xf32>
    %34 = arith.divf %32, %33 : vector<8x128xf32>
    %35 = arith.mulf %26, %7 : vector<8x128xf32>
    %36 = arith.mulf %20, %28 : vector<8x128xf32>
    %37 = arith.addf %35, %36 : vector<8x128xf32>
    %38 = math.tanh %37 : vector<8x128xf32>
    %39 = arith.mulf %34, %38 : vector<8x128xf32>
    %40 = arith.index_cast %9 : i32 to index
    %c0_15 = arith.constant 0 : index
    %41 = vector.load %arg10[%40, %c0_15] : memref<64x128xf32, #tpu.memory_space<vmem>>, vector<8x128xf32>
    tpu.vector_store %arg10[%40, %c0_15], %39 {strides = array<i32>} : memref<64x128xf32, #tpu.memory_space<vmem>>, vector<8x128xf32>,
    %c1_i32 = arith.constant 1 : i32
    %c8_i32_16 = arith.constant 8 : i32
    %42 = arith.muli %c1_i32, %c8_i32_16 : i32
    %43 = tpu.assume_multiple %42, 8 : i32
    %44 = arith.index_cast %43 : i32 to index
    %c0_17 = arith.constant 0 : index
    %45 = vector.load %arg11[%44, %c0_17] : memref<64x512xf32, #tpu.memory_space<vmem>>, vector<8x512xf32>
    %c0_18 = arith.constant 0 : index
    %c0_19 = arith.constant 0 : index
    %46 = vector.load %arg2[%c0_18, %c0_19] : memref<128x512xf32, #tpu.memory_space<vmem>>, vector<128x512xf32>
    %cst_20 = arith.constant dense<0.000000e+00> : vector<8x512xf32>
    %47 = tpu.matmul %39, %46, %cst_20 {dimension_numbers = #tpu.dot_dimension_numbers<[1], [0], [0], [1], [0, 0, 1, 1], [], []>} : vector<8x128xf32>, vector<128x512xf32>, vector<8x512xf32> -> vector<8x512xf32>
    %48 = arith.addf %45, %47 : vector<8x512xf32>
    %49 = vector.extract_strided_slice %48 {offsets = [0, 0], sizes = [8, 128], strides = [1, 1]} : vector<8x512xf32> to vector<8x128xf32>
    %50 = arith.negf %49 : vector<8x128xf32>
    %51 = math.exp %50 : vector<8x128xf32>
    %cst_21 = arith.constant 1.000000e+00 : f32
    %52 = vector.broadcast %cst_21 : f32 to vector<8x128xf32>
    %53 = arith.addf %52, %51 : vector<8x128xf32>
    %54 = arith.divf %52, %53 : vector<8x128xf32>
    %55 = vector.extract_strided_slice %48 {offsets = [0, 128], sizes = [8, 128], strides = [1, 1]} : vector<8x512xf32> to vector<8x128xf32>
    %56 = arith.negf %55 : vector<8x128xf32>
    %57 = math.exp %56 : vector<8x128xf32>
    %cst_22 = arith.constant 1.000000e+00 : f32
    %58 = vector.broadcast %cst_22 : f32 to vector<8x128xf32>
    %59 = arith.addf %58, %57 : vector<8x128xf32>
    %60 = arith.divf %58, %59 : vector<8x128xf32>
    %61 = vector.extract_strided_slice %48 {offsets = [0, 256], sizes = [8, 128], strides = [1, 1]} : vector<8x512xf32> to vector<8x128xf32>
    %62 = math.tanh %61 : vector<8x128xf32>
    %63 = vector.extract_strided_slice %48 {offsets = [0, 384], sizes = [8, 128], strides = [1, 1]} : vector<8x512xf32> to vector<8x128xf32>
    %64 = arith.negf %63 : vector<8x128xf32>
    %65 = math.exp %64 : vector<8x128xf32>
    %cst_23 = arith.constant 1.000000e+00 : f32
    %66 = vector.broadcast %cst_23 : f32 to vector<8x128xf32>
    %67 = arith.addf %66, %65 : vector<8x128xf32>
    %68 = arith.divf %66, %67 : vector<8x128xf32>
    %69 = arith.mulf %60, %37 : vector<8x128xf32>
    %70 = arith.mulf %54, %62 : vector<8x128xf32>
    %71 = arith.addf %69, %70 : vector<8x128xf32>
    %72 = math.tanh %71 : vector<8x128xf32>
    %73 = arith.mulf %68, %72 : vector<8x128xf32>
    %74 = arith.index_cast %43 : i32 to index
    %c0_24 = arith.constant 0 : index
    %75 = vector.load %arg10[%74, %c0_24] : memref<64x128xf32, #tpu.memory_space<vmem>>, vector<8x128xf32>
    tpu.vector_store %arg10[%74, %c0_24], %73 {strides = array<i32>} : memref<64x128xf32, #tpu.memory_space<vmem>>, vector<8x128xf32>,
    %c2_i32 = arith.constant 2 : i32
    %c8_i32_25 = arith.constant 8 : i32
    %76 = arith.muli %c2_i32, %c8_i32_25 : i32
    %77 = tpu.assume_multiple %76, 8 : i32
    %78 = arith.index_cast %77 : i32 to index
    %c0_26 = arith.constant 0 : index
    %79 = vector.load %arg11[%78, %c0_26] : memref<64x512xf32, #tpu.memory_space<vmem>>, vector<8x512xf32>
    %c0_27 = arith.constant 0 : index
    %c0_28 = arith.constant 0 : index
    %80 = vector.load %arg2[%c0_27, %c0_28] : memref<128x512xf32, #tpu.memory_space<vmem>>, vector<128x512xf32>
    %cst_29 = arith.constant dense<0.000000e+00> : vector<8x512xf32>
    %81 = tpu.matmul %73, %80, %cst_29 {dimension_numbers = #tpu.dot_dimension_numbers<[1], [0], [0], [1], [0, 0, 1, 1], [], []>} : vector<8x128xf32>, vector<128x512xf32>, vector<8x512xf32> -> vector<8x512xf32>
    %82 = arith.addf %79, %81 : vector<8x512xf32>
    %83 = vector.extract_strided_slice %82 {offsets = [0, 0], sizes = [8, 128], strides = [1, 1]} : vector<8x512xf32> to vector<8x128xf32>
    %84 = arith.negf %83 : vector<8x128xf32>
    %85 = math.exp %84 : vector<8x128xf32>
    %cst_30 = arith.constant 1.000000e+00 : f32
    %86 = vector.broadcast %cst_30 : f32 to vector<8x128xf32>
    %87 = arith.addf %86, %85 : vector<8x128xf32>
    %88 = arith.divf %86, %87 : vector<8x128xf32>
    %89 = vector.extract_strided_slice %82 {offsets = [0, 128], sizes = [8, 128], strides = [1, 1]} : vector<8x512xf32> to vector<8x128xf32>
    %90 = arith.negf %89 : vector<8x128xf32>
    %91 = math.exp %90 : vector<8x128xf32>
    %cst_31 = arith.constant 1.000000e+00 : f32
    %92 = vector.broadcast %cst_31 : f32 to vector<8x128xf32>
    %93 = arith.addf %92, %91 : vector<8x128xf32>
    %94 = arith.divf %92, %93 : vector<8x128xf32>
    %95 = vector.extract_strided_slice %82 {offsets = [0, 256], sizes = [8, 128], strides = [1, 1]} : vector<8x512xf32> to vector<8x128xf32>
    %96 = math.tanh %95 : vector<8x128xf32>
    %97 = vector.extract_strided_slice %82 {offsets = [0, 384], sizes = [8, 128], strides = [1, 1]} : vector<8x512xf32> to vector<8x128xf32>
    %98 = arith.negf %97 : vector<8x128xf32>
    %99 = math.exp %98 : vector<8x128xf32>
    %cst_32 = arith.constant 1.000000e+00 : f32
    %100 = vector.broadcast %cst_32 : f32 to vector<8x128xf32>
    %101 = arith.addf %100, %99 : vector<8x128xf32>
    %102 = arith.divf %100, %101 : vector<8x128xf32>
    %103 = arith.mulf %94, %71 : vector<8x128xf32>
    %104 = arith.mulf %88, %96 : vector<8x128xf32>
    %105 = arith.addf %103, %104 : vector<8x128xf32>
    %106 = math.tanh %105 : vector<8x128xf32>
    %107 = arith.mulf %102, %106 : vector<8x128xf32>
    %108 = arith.index_cast %77 : i32 to index
    %c0_33 = arith.constant 0 : index
    %109 = vector.load %arg10[%108, %c0_33] : memref<64x128xf32, #tpu.memory_space<vmem>>, vector<8x128xf32>
    tpu.vector_store %arg10[%108, %c0_33], %107 {strides = array<i32>} : memref<64x128xf32, #tpu.memory_space<vmem>>, vector<8x128xf32>,
    %c3_i32 = arith.constant 3 : i32
    %c8_i32_34 = arith.constant 8 : i32
    %110 = arith.muli %c3_i32, %c8_i32_34 : i32
    %111 = tpu.assume_multiple %110, 8 : i32
    %112 = arith.index_cast %111 : i32 to index
    %c0_35 = arith.constant 0 : index
    %113 = vector.load %arg11[%112, %c0_35] : memref<64x512xf32, #tpu.memory_space<vmem>>, vector<8x512xf32>
    %c0_36 = arith.constant 0 : index
    %c0_37 = arith.constant 0 : index
    %114 = vector.load %arg2[%c0_36, %c0_37] : memref<128x512xf32, #tpu.memory_space<vmem>>, vector<128x512xf32>
    %cst_38 = arith.constant dense<0.000000e+00> : vector<8x512xf32>
    %115 = tpu.matmul %107, %114, %cst_38 {dimension_numbers = #tpu.dot_dimension_numbers<[1], [0], [0], [1], [0, 0, 1, 1], [], []>} : vector<8x128xf32>, vector<128x512xf32>, vector<8x512xf32> -> vector<8x512xf32>
    %116 = arith.addf %113, %115 : vector<8x512xf32>
    %117 = vector.extract_strided_slice %116 {offsets = [0, 0], sizes = [8, 128], strides = [1, 1]} : vector<8x512xf32> to vector<8x128xf32>
    %118 = arith.negf %117 : vector<8x128xf32>
    %119 = math.exp %118 : vector<8x128xf32>
    %cst_39 = arith.constant 1.000000e+00 : f32
    %120 = vector.broadcast %cst_39 : f32 to vector<8x128xf32>
    %121 = arith.addf %120, %119 : vector<8x128xf32>
    %122 = arith.divf %120, %121 : vector<8x128xf32>
    %123 = vector.extract_strided_slice %116 {offsets = [0, 128], sizes = [8, 128], strides = [1, 1]} : vector<8x512xf32> to vector<8x128xf32>
    %124 = arith.negf %123 : vector<8x128xf32>
    %125 = math.exp %124 : vector<8x128xf32>
    %cst_40 = arith.constant 1.000000e+00 : f32
    %126 = vector.broadcast %cst_40 : f32 to vector<8x128xf32>
    %127 = arith.addf %126, %125 : vector<8x128xf32>
    %128 = arith.divf %126, %127 : vector<8x128xf32>
    %129 = vector.extract_strided_slice %116 {offsets = [0, 256], sizes = [8, 128], strides = [1, 1]} : vector<8x512xf32> to vector<8x128xf32>
    %130 = math.tanh %129 : vector<8x128xf32>
    %131 = vector.extract_strided_slice %116 {offsets = [0, 384], sizes = [8, 128], strides = [1, 1]} : vector<8x512xf32> to vector<8x128xf32>
    %132 = arith.negf %131 : vector<8x128xf32>
    %133 = math.exp %132 : vector<8x128xf32>
    %cst_41 = arith.constant 1.000000e+00 : f32
    %134 = vector.broadcast %cst_41 : f32 to vector<8x128xf32>
    %135 = arith.addf %134, %133 : vector<8x128xf32>
    %136 = arith.divf %134, %135 : vector<8x128xf32>
    %137 = arith.mulf %128, %105 : vector<8x128xf32>
    %138 = arith.mulf %122, %130 : vector<8x128xf32>
    %139 = arith.addf %137, %138 : vector<8x128xf32>
    %140 = math.tanh %139 : vector<8x128xf32>
    %141 = arith.mulf %136, %140 : vector<8x128xf32>
    %142 = arith.index_cast %111 : i32 to index
    %c0_42 = arith.constant 0 : index
    %143 = vector.load %arg10[%142, %c0_42] : memref<64x128xf32, #tpu.memory_space<vmem>>, vector<8x128xf32>
    tpu.vector_store %arg10[%142, %c0_42], %141 {strides = array<i32>} : memref<64x128xf32, #tpu.memory_space<vmem>>, vector<8x128xf32>,
    %c4_i32 = arith.constant 4 : i32
    %c8_i32_43 = arith.constant 8 : i32
    %144 = arith.muli %c4_i32, %c8_i32_43 : i32
    %145 = tpu.assume_multiple %144, 8 : i32
    %146 = arith.index_cast %145 : i32 to index
    %c0_44 = arith.constant 0 : index
    %147 = vector.load %arg11[%146, %c0_44] : memref<64x512xf32, #tpu.memory_space<vmem>>, vector<8x512xf32>
    %c0_45 = arith.constant 0 : index
    %c0_46 = arith.constant 0 : index
    %148 = vector.load %arg2[%c0_45, %c0_46] : memref<128x512xf32, #tpu.memory_space<vmem>>, vector<128x512xf32>
    %cst_47 = arith.constant dense<0.000000e+00> : vector<8x512xf32>
    %149 = tpu.matmul %141, %148, %cst_47 {dimension_numbers = #tpu.dot_dimension_numbers<[1], [0], [0], [1], [0, 0, 1, 1], [], []>} : vector<8x128xf32>, vector<128x512xf32>, vector<8x512xf32> -> vector<8x512xf32>
    %150 = arith.addf %147, %149 : vector<8x512xf32>
    %151 = vector.extract_strided_slice %150 {offsets = [0, 0], sizes = [8, 128], strides = [1, 1]} : vector<8x512xf32> to vector<8x128xf32>
    %152 = arith.negf %151 : vector<8x128xf32>
    %153 = math.exp %152 : vector<8x128xf32>
    %cst_48 = arith.constant 1.000000e+00 : f32
    %154 = vector.broadcast %cst_48 : f32 to vector<8x128xf32>
    %155 = arith.addf %154, %153 : vector<8x128xf32>
    %156 = arith.divf %154, %155 : vector<8x128xf32>
    %157 = vector.extract_strided_slice %150 {offsets = [0, 128], sizes = [8, 128], strides = [1, 1]} : vector<8x512xf32> to vector<8x128xf32>
    %158 = arith.negf %157 : vector<8x128xf32>
    %159 = math.exp %158 : vector<8x128xf32>
    %cst_49 = arith.constant 1.000000e+00 : f32
    %160 = vector.broadcast %cst_49 : f32 to vector<8x128xf32>
    %161 = arith.addf %160, %159 : vector<8x128xf32>
    %162 = arith.divf %160, %161 : vector<8x128xf32>
    %163 = vector.extract_strided_slice %150 {offsets = [0, 256], sizes = [8, 128], strides = [1, 1]} : vector<8x512xf32> to vector<8x128xf32>
    %164 = math.tanh %163 : vector<8x128xf32>
    %165 = vector.extract_strided_slice %150 {offsets = [0, 384], sizes = [8, 128], strides = [1, 1]} : vector<8x512xf32> to vector<8x128xf32>
    %166 = arith.negf %165 : vector<8x128xf32>
    %167 = math.exp %166 : vector<8x128xf32>
    %cst_50 = arith.constant 1.000000e+00 : f32
    %168 = vector.broadcast %cst_50 : f32 to vector<8x128xf32>
    %169 = arith.addf %168, %167 : vector<8x128xf32>
    %170 = arith.divf %168, %169 : vector<8x128xf32>
    %171 = arith.mulf %162, %139 : vector<8x128xf32>
    %172 = arith.mulf %156, %164 : vector<8x128xf32>
    %173 = arith.addf %171, %172 : vector<8x128xf32>
    %174 = math.tanh %173 : vector<8x128xf32>
    %175 = arith.mulf %170, %174 : vector<8x128xf32>
    %176 = arith.index_cast %145 : i32 to index
    %c0_51 = arith.constant 0 : index
    %177 = vector.load %arg10[%176, %c0_51] : memref<64x128xf32, #tpu.memory_space<vmem>>, vector<8x128xf32>
    tpu.vector_store %arg10[%176, %c0_51], %175 {strides = array<i32>} : memref<64x128xf32, #tpu.memory_space<vmem>>, vector<8x128xf32>,
    %c5_i32 = arith.constant 5 : i32
    %c8_i32_52 = arith.constant 8 : i32
    %178 = arith.muli %c5_i32, %c8_i32_52 : i32
    %179 = tpu.assume_multiple %178, 8 : i32
    %180 = arith.index_cast %179 : i32 to index
    %c0_53 = arith.constant 0 : index
    %181 = vector.load %arg11[%180, %c0_53] : memref<64x512xf32, #tpu.memory_space<vmem>>, vector<8x512xf32>
    %c0_54 = arith.constant 0 : index
    %c0_55 = arith.constant 0 : index
    %182 = vector.load %arg2[%c0_54, %c0_55] : memref<128x512xf32, #tpu.memory_space<vmem>>, vector<128x512xf32>
    %cst_56 = arith.constant dense<0.000000e+00> : vector<8x512xf32>
    %183 = tpu.matmul %175, %182, %cst_56 {dimension_numbers = #tpu.dot_dimension_numbers<[1], [0], [0], [1], [0, 0, 1, 1], [], []>} : vector<8x128xf32>, vector<128x512xf32>, vector<8x512xf32> -> vector<8x512xf32>
    %184 = arith.addf %181, %183 : vector<8x512xf32>
    %185 = vector.extract_strided_slice %184 {offsets = [0, 0], sizes = [8, 128], strides = [1, 1]} : vector<8x512xf32> to vector<8x128xf32>
    %186 = arith.negf %185 : vector<8x128xf32>
    %187 = math.exp %186 : vector<8x128xf32>
    %cst_57 = arith.constant 1.000000e+00 : f32
    %188 = vector.broadcast %cst_57 : f32 to vector<8x128xf32>
    %189 = arith.addf %188, %187 : vector<8x128xf32>
    %190 = arith.divf %188, %189 : vector<8x128xf32>
    %191 = vector.extract_strided_slice %184 {offsets = [0, 128], sizes = [8, 128], strides = [1, 1]} : vector<8x512xf32> to vector<8x128xf32>
    %192 = arith.negf %191 : vector<8x128xf32>
    %193 = math.exp %192 : vector<8x128xf32>
    %cst_58 = arith.constant 1.000000e+00 : f32
    %194 = vector.broadcast %cst_58 : f32 to vector<8x128xf32>
    %195 = arith.addf %194, %193 : vector<8x128xf32>
    %196 = arith.divf %194, %195 : vector<8x128xf32>
    %197 = vector.extract_strided_slice %184 {offsets = [0, 256], sizes = [8, 128], strides = [1, 1]} : vector<8x512xf32> to vector<8x128xf32>
    %198 = math.tanh %197 : vector<8x128xf32>
    %199 = vector.extract_strided_slice %184 {offsets = [0, 384], sizes = [8, 128], strides = [1, 1]} : vector<8x512xf32> to vector<8x128xf32>
    %200 = arith.negf %199 : vector<8x128xf32>
    %201 = math.exp %200 : vector<8x128xf32>
    %cst_59 = arith.constant 1.000000e+00 : f32
    %202 = vector.broadcast %cst_59 : f32 to vector<8x128xf32>
    %203 = arith.addf %202, %201 : vector<8x128xf32>
    %204 = arith.divf %202, %203 : vector<8x128xf32>
    %205 = arith.mulf %196, %173 : vector<8x128xf32>
    %206 = arith.mulf %190, %198 : vector<8x128xf32>
    %207 = arith.addf %205, %206 : vector<8x128xf32>
    %208 = math.tanh %207 : vector<8x128xf32>
    %209 = arith.mulf %204, %208 : vector<8x128xf32>
    %210 = arith.index_cast %179 : i32 to index
    %c0_60 = arith.constant 0 : index
    %211 = vector.load %arg10[%210, %c0_60] : memref<64x128xf32, #tpu.memory_space<vmem>>, vector<8x128xf32>
    tpu.vector_store %arg10[%210, %c0_60], %209 {strides = array<i32>} : memref<64x128xf32, #tpu.memory_space<vmem>>, vector<8x128xf32>,
    %c6_i32 = arith.constant 6 : i32
    %c8_i32_61 = arith.constant 8 : i32
    %212 = arith.muli %c6_i32, %c8_i32_61 : i32
    %213 = tpu.assume_multiple %212, 8 : i32
    %214 = arith.index_cast %213 : i32 to index
    %c0_62 = arith.constant 0 : index
    %215 = vector.load %arg11[%214, %c0_62] : memref<64x512xf32, #tpu.memory_space<vmem>>, vector<8x512xf32>
    %c0_63 = arith.constant 0 : index
    %c0_64 = arith.constant 0 : index
    %216 = vector.load %arg2[%c0_63, %c0_64] : memref<128x512xf32, #tpu.memory_space<vmem>>, vector<128x512xf32>
    %cst_65 = arith.constant dense<0.000000e+00> : vector<8x512xf32>
    %217 = tpu.matmul %209, %216, %cst_65 {dimension_numbers = #tpu.dot_dimension_numbers<[1], [0], [0], [1], [0, 0, 1, 1], [], []>} : vector<8x128xf32>, vector<128x512xf32>, vector<8x512xf32> -> vector<8x512xf32>
    %218 = arith.addf %215, %217 : vector<8x512xf32>
    %219 = vector.extract_strided_slice %218 {offsets = [0, 0], sizes = [8, 128], strides = [1, 1]} : vector<8x512xf32> to vector<8x128xf32>
    %220 = arith.negf %219 : vector<8x128xf32>
    %221 = math.exp %220 : vector<8x128xf32>
    %cst_66 = arith.constant 1.000000e+00 : f32
    %222 = vector.broadcast %cst_66 : f32 to vector<8x128xf32>
    %223 = arith.addf %222, %221 : vector<8x128xf32>
    %224 = arith.divf %222, %223 : vector<8x128xf32>
    %225 = vector.extract_strided_slice %218 {offsets = [0, 128], sizes = [8, 128], strides = [1, 1]} : vector<8x512xf32> to vector<8x128xf32>
    %226 = arith.negf %225 : vector<8x128xf32>
    %227 = math.exp %226 : vector<8x128xf32>
    %cst_67 = arith.constant 1.000000e+00 : f32
    %228 = vector.broadcast %cst_67 : f32 to vector<8x128xf32>
    %229 = arith.addf %228, %227 : vector<8x128xf32>
    %230 = arith.divf %228, %229 : vector<8x128xf32>
    %231 = vector.extract_strided_slice %218 {offsets = [0, 256], sizes = [8, 128], strides = [1, 1]} : vector<8x512xf32> to vector<8x128xf32>
    %232 = math.tanh %231 : vector<8x128xf32>
    %233 = vector.extract_strided_slice %218 {offsets = [0, 384], sizes = [8, 128], strides = [1, 1]} : vector<8x512xf32> to vector<8x128xf32>
    %234 = arith.negf %233 : vector<8x128xf32>
    %235 = math.exp %234 : vector<8x128xf32>
    %cst_68 = arith.constant 1.000000e+00 : f32
    %236 = vector.broadcast %cst_68 : f32 to vector<8x128xf32>
    %237 = arith.addf %236, %235 : vector<8x128xf32>
    %238 = arith.divf %236, %237 : vector<8x128xf32>
    %239 = arith.mulf %230, %207 : vector<8x128xf32>
    %240 = arith.mulf %224, %232 : vector<8x128xf32>
    %241 = arith.addf %239, %240 : vector<8x128xf32>
    %242 = math.tanh %241 : vector<8x128xf32>
    %243 = arith.mulf %238, %242 : vector<8x128xf32>
    %244 = arith.index_cast %213 : i32 to index
    %c0_69 = arith.constant 0 : index
    %245 = vector.load %arg10[%244, %c0_69] : memref<64x128xf32, #tpu.memory_space<vmem>>, vector<8x128xf32>
    tpu.vector_store %arg10[%244, %c0_69], %243 {strides = array<i32>} : memref<64x128xf32, #tpu.memory_space<vmem>>, vector<8x128xf32>,
    %c7_i32 = arith.constant 7 : i32
    %c8_i32_70 = arith.constant 8 : i32
    %246 = arith.muli %c7_i32, %c8_i32_70 : i32
    %247 = tpu.assume_multiple %246, 8 : i32
    %248 = arith.index_cast %247 : i32 to index
    %c0_71 = arith.constant 0 : index
    %249 = vector.load %arg11[%248, %c0_71] : memref<64x512xf32, #tpu.memory_space<vmem>>, vector<8x512xf32>
    %c0_72 = arith.constant 0 : index
    %c0_73 = arith.constant 0 : index
    %250 = vector.load %arg2[%c0_72, %c0_73] : memref<128x512xf32, #tpu.memory_space<vmem>>, vector<128x512xf32>
    %cst_74 = arith.constant dense<0.000000e+00> : vector<8x512xf32>
    %251 = tpu.matmul %243, %250, %cst_74 {dimension_numbers = #tpu.dot_dimension_numbers<[1], [0], [0], [1], [0, 0, 1, 1], [], []>} : vector<8x128xf32>, vector<128x512xf32>, vector<8x512xf32> -> vector<8x512xf32>
    %252 = arith.addf %249, %251 : vector<8x512xf32>
    %253 = vector.extract_strided_slice %252 {offsets = [0, 0], sizes = [8, 128], strides = [1, 1]} : vector<8x512xf32> to vector<8x128xf32>
    %254 = arith.negf %253 : vector<8x128xf32>
    %255 = math.exp %254 : vector<8x128xf32>
    %cst_75 = arith.constant 1.000000e+00 : f32
    %256 = vector.broadcast %cst_75 : f32 to vector<8x128xf32>
    %257 = arith.addf %256, %255 : vector<8x128xf32>
    %258 = arith.divf %256, %257 : vector<8x128xf32>
    %259 = vector.extract_strided_slice %252 {offsets = [0, 128], sizes = [8, 128], strides = [1, 1]} : vector<8x512xf32> to vector<8x128xf32>
    %260 = arith.negf %259 : vector<8x128xf32>
    %261 = math.exp %260 : vector<8x128xf32>
    %cst_76 = arith.constant 1.000000e+00 : f32
    %262 = vector.broadcast %cst_76 : f32 to vector<8x128xf32>
    %263 = arith.addf %262, %261 : vector<8x128xf32>
    %264 = arith.divf %262, %263 : vector<8x128xf32>
    %265 = vector.extract_strided_slice %252 {offsets = [0, 256], sizes = [8, 128], strides = [1, 1]} : vector<8x512xf32> to vector<8x128xf32>
    %266 = math.tanh %265 : vector<8x128xf32>
    %267 = vector.extract_strided_slice %252 {offsets = [0, 384], sizes = [8, 128], strides = [1, 1]} : vector<8x512xf32> to vector<8x128xf32>
    %268 = arith.negf %267 : vector<8x128xf32>
    %269 = math.exp %268 : vector<8x128xf32>
    %cst_77 = arith.constant 1.000000e+00 : f32
    %270 = vector.broadcast %cst_77 : f32 to vector<8x128xf32>
    %271 = arith.addf %270, %269 : vector<8x128xf32>
    %272 = arith.divf %270, %271 : vector<8x128xf32>
    %273 = arith.mulf %264, %241 : vector<8x128xf32>
    %274 = arith.mulf %258, %266 : vector<8x128xf32>
    %275 = arith.addf %273, %274 : vector<8x128xf32>
    %276 = math.tanh %275 : vector<8x128xf32>
    %277 = arith.mulf %272, %276 : vector<8x128xf32>
    %278 = arith.index_cast %247 : i32 to index
    %c0_78 = arith.constant 0 : index
    %279 = vector.load %arg10[%278, %c0_78] : memref<64x128xf32, #tpu.memory_space<vmem>>, vector<8x128xf32>
    tpu.vector_store %arg10[%278, %c0_78], %277 {strides = array<i32>} : memref<64x128xf32, #tpu.memory_space<vmem>>, vector<8x128xf32>,
    %c8_i32_79 = arith.constant 8 : i32
    %c0_80 = arith.constant 0 : index
    %c0_81 = arith.constant 0 : index
    %280 = vector.load %arg10[%c0_80, %c0_81] : memref<64x128xf32, #tpu.memory_space<vmem>>, vector<64x128xf32>
    %c0_82 = arith.constant 0 : index
    %c0_83 = arith.constant 0 : index
    %281 = vector.load %arg4[%c0_82, %c0_83] : memref<128x512xf32, #tpu.memory_space<vmem>>, vector<128x512xf32>
    %cst_84 = arith.constant dense<0.000000e+00> : vector<64x512xf32>
    %282 = tpu.matmul %280, %281, %cst_84 {dimension_numbers = #tpu.dot_dimension_numbers<[1], [0], [0], [1], [0, 0, 1, 1], [], []>} : vector<64x128xf32>, vector<128x512xf32>, vector<64x512xf32> -> vector<64x512xf32>
    %c0_85 = arith.constant 0 : index
    %c0_86 = arith.constant 0 : index
    %283 = vector.load %arg6[%c0_85, %c0_86] : memref<1x512xf32, #tpu.memory_space<vmem>>, vector<1x512xf32>
    %284 = vector.broadcast %283 : vector<1x512xf32> to vector<64x512xf32>
    %285 = arith.addf %282, %284 : vector<64x512xf32>
    %c0_87 = arith.constant 0 : index
    %c0_88 = arith.constant 0 : index
    %286 = vector.load %arg11[%c0_87, %c0_88] : memref<64x512xf32, #tpu.memory_space<vmem>>, vector<64x512xf32>
    tpu.vector_store %arg11[%c0_87, %c0_88], %285 {strides = array<i32>} : memref<64x512xf32, #tpu.memory_space<vmem>>, vector<64x512xf32>,
    %cst_89 = arith.constant 0.000000e+00 : f32
    %287 = vector.broadcast %cst_89 : f32 to vector<8x128xf32>
    %c0_i32_90 = arith.constant 0 : i32
    %c8_i32_91 = arith.constant 8 : i32
    %288 = arith.muli %c0_i32_90, %c8_i32_91 : i32
    %289 = tpu.assume_multiple %288, 8 : i32
    %290 = arith.index_cast %289 : i32 to index
    %c0_92 = arith.constant 0 : index
    %291 = vector.load %arg11[%290, %c0_92] : memref<64x512xf32, #tpu.memory_space<vmem>>, vector<8x512xf32>
    %c0_93 = arith.constant 0 : index
    %c0_94 = arith.constant 0 : index
    %292 = vector.load %arg5[%c0_93, %c0_94] : memref<128x512xf32, #tpu.memory_space<vmem>>, vector<128x512xf32>
    %cst_95 = arith.constant dense<0.000000e+00> : vector<8x512xf32>
    %293 = tpu.matmul %287, %292, %cst_95 {dimension_numbers = #tpu.dot_dimension_numbers<[1], [0], [0], [1], [0, 0, 1, 1], [], []>} : vector<8x128xf32>, vector<128x512xf32>, vector<8x512xf32> -> vector<8x512xf32>
    %294 = arith.addf %291, %293 : vector<8x512xf32>
    %295 = vector.extract_strided_slice %294 {offsets = [0, 0], sizes = [8, 128], strides = [1, 1]} : vector<8x512xf32> to vector<8x128xf32>
    %296 = arith.negf %295 : vector<8x128xf32>
    %297 = math.exp %296 : vector<8x128xf32>
    %cst_96 = arith.constant 1.000000e+00 : f32
    %298 = vector.broadcast %cst_96 : f32 to vector<8x128xf32>
    %299 = arith.addf %298, %297 : vector<8x128xf32>
    %300 = arith.divf %298, %299 : vector<8x128xf32>
    %301 = vector.extract_strided_slice %294 {offsets = [0, 128], sizes = [8, 128], strides = [1, 1]} : vector<8x512xf32> to vector<8x128xf32>
    %302 = arith.negf %301 : vector<8x128xf32>
    %303 = math.exp %302 : vector<8x128xf32>
    %cst_97 = arith.constant 1.000000e+00 : f32
    %304 = vector.broadcast %cst_97 : f32 to vector<8x128xf32>
    %305 = arith.addf %304, %303 : vector<8x128xf32>
    %306 = arith.divf %304, %305 : vector<8x128xf32>
    %307 = vector.extract_strided_slice %294 {offsets = [0, 256], sizes = [8, 128], strides = [1, 1]} : vector<8x512xf32> to vector<8x128xf32>
    %308 = math.tanh %307 : vector<8x128xf32>
    %309 = vector.extract_strided_slice %294 {offsets = [0, 384], sizes = [8, 128], strides = [1, 1]} : vector<8x512xf32> to vector<8x128xf32>
    %310 = arith.negf %309 : vector<8x128xf32>
    %311 = math.exp %310 : vector<8x128xf32>
    %cst_98 = arith.constant 1.000000e+00 : f32
    %312 = vector.broadcast %cst_98 : f32 to vector<8x128xf32>
    %313 = arith.addf %312, %311 : vector<8x128xf32>
    %314 = arith.divf %312, %313 : vector<8x128xf32>
    %315 = arith.mulf %306, %287 : vector<8x128xf32>
    %316 = arith.mulf %300, %308 : vector<8x128xf32>
    %317 = arith.addf %315, %316 : vector<8x128xf32>
    %318 = math.tanh %317 : vector<8x128xf32>
    %319 = arith.mulf %314, %318 : vector<8x128xf32>
    %320 = arith.index_cast %289 : i32 to index
    %c0_99 = arith.constant 0 : index
    %321 = vector.load %arg10[%320, %c0_99] : memref<64x128xf32, #tpu.memory_space<vmem>>, vector<8x128xf32>
    tpu.vector_store %arg10[%320, %c0_99], %319 {strides = array<i32>} : memref<64x128xf32, #tpu.memory_space<vmem>>, vector<8x128xf32>,
    %c1_i32_100 = arith.constant 1 : i32
    %c8_i32_101 = arith.constant 8 : i32
    %322 = arith.muli %c1_i32_100, %c8_i32_101 : i32
    %323 = tpu.assume_multiple %322, 8 : i32
    %324 = arith.index_cast %323 : i32 to index
    %c0_102 = arith.constant 0 : index
    %325 = vector.load %arg11[%324, %c0_102] : memref<64x512xf32, #tpu.memory_space<vmem>>, vector<8x512xf32>
    %c0_103 = arith.constant 0 : index
    %c0_104 = arith.constant 0 : index
    %326 = vector.load %arg5[%c0_103, %c0_104] : memref<128x512xf32, #tpu.memory_space<vmem>>, vector<128x512xf32>
    %cst_105 = arith.constant dense<0.000000e+00> : vector<8x512xf32>
    %327 = tpu.matmul %319, %326, %cst_105 {dimension_numbers = #tpu.dot_dimension_numbers<[1], [0], [0], [1], [0, 0, 1, 1], [], []>} : vector<8x128xf32>, vector<128x512xf32>, vector<8x512xf32> -> vector<8x512xf32>
    %328 = arith.addf %325, %327 : vector<8x512xf32>
    %329 = vector.extract_strided_slice %328 {offsets = [0, 0], sizes = [8, 128], strides = [1, 1]} : vector<8x512xf32> to vector<8x128xf32>
    %330 = arith.negf %329 : vector<8x128xf32>
    %331 = math.exp %330 : vector<8x128xf32>
    %cst_106 = arith.constant 1.000000e+00 : f32
    %332 = vector.broadcast %cst_106 : f32 to vector<8x128xf32>
    %333 = arith.addf %332, %331 : vector<8x128xf32>
    %334 = arith.divf %332, %333 : vector<8x128xf32>
    %335 = vector.extract_strided_slice %328 {offsets = [0, 128], sizes = [8, 128], strides = [1, 1]} : vector<8x512xf32> to vector<8x128xf32>
    %336 = arith.negf %335 : vector<8x128xf32>
    %337 = math.exp %336 : vector<8x128xf32>
    %cst_107 = arith.constant 1.000000e+00 : f32
    %338 = vector.broadcast %cst_107 : f32 to vector<8x128xf32>
    %339 = arith.addf %338, %337 : vector<8x128xf32>
    %340 = arith.divf %338, %339 : vector<8x128xf32>
    %341 = vector.extract_strided_slice %328 {offsets = [0, 256], sizes = [8, 128], strides = [1, 1]} : vector<8x512xf32> to vector<8x128xf32>
    %342 = math.tanh %341 : vector<8x128xf32>
    %343 = vector.extract_strided_slice %328 {offsets = [0, 384], sizes = [8, 128], strides = [1, 1]} : vector<8x512xf32> to vector<8x128xf32>
    %344 = arith.negf %343 : vector<8x128xf32>
    %345 = math.exp %344 : vector<8x128xf32>
    %cst_108 = arith.constant 1.000000e+00 : f32
    %346 = vector.broadcast %cst_108 : f32 to vector<8x128xf32>
    %347 = arith.addf %346, %345 : vector<8x128xf32>
    %348 = arith.divf %346, %347 : vector<8x128xf32>
    %349 = arith.mulf %340, %317 : vector<8x128xf32>
    %350 = arith.mulf %334, %342 : vector<8x128xf32>
    %351 = arith.addf %349, %350 : vector<8x128xf32>
    %352 = math.tanh %351 : vector<8x128xf32>
    %353 = arith.mulf %348, %352 : vector<8x128xf32>
    %354 = arith.index_cast %323 : i32 to index
    %c0_109 = arith.constant 0 : index
    %355 = vector.load %arg10[%354, %c0_109] : memref<64x128xf32, #tpu.memory_space<vmem>>, vector<8x128xf32>
    tpu.vector_store %arg10[%354, %c0_109], %353 {strides = array<i32>} : memref<64x128xf32, #tpu.memory_space<vmem>>, vector<8x128xf32>,
    %c2_i32_110 = arith.constant 2 : i32
    %c8_i32_111 = arith.constant 8 : i32
    %356 = arith.muli %c2_i32_110, %c8_i32_111 : i32
    %357 = tpu.assume_multiple %356, 8 : i32
    %358 = arith.index_cast %357 : i32 to index
    %c0_112 = arith.constant 0 : index
    %359 = vector.load %arg11[%358, %c0_112] : memref<64x512xf32, #tpu.memory_space<vmem>>, vector<8x512xf32>
    %c0_113 = arith.constant 0 : index
    %c0_114 = arith.constant 0 : index
    %360 = vector.load %arg5[%c0_113, %c0_114] : memref<128x512xf32, #tpu.memory_space<vmem>>, vector<128x512xf32>
    %cst_115 = arith.constant dense<0.000000e+00> : vector<8x512xf32>
    %361 = tpu.matmul %353, %360, %cst_115 {dimension_numbers = #tpu.dot_dimension_numbers<[1], [0], [0], [1], [0, 0, 1, 1], [], []>} : vector<8x128xf32>, vector<128x512xf32>, vector<8x512xf32> -> vector<8x512xf32>
    %362 = arith.addf %359, %361 : vector<8x512xf32>
    %363 = vector.extract_strided_slice %362 {offsets = [0, 0], sizes = [8, 128], strides = [1, 1]} : vector<8x512xf32> to vector<8x128xf32>
    %364 = arith.negf %363 : vector<8x128xf32>
    %365 = math.exp %364 : vector<8x128xf32>
    %cst_116 = arith.constant 1.000000e+00 : f32
    %366 = vector.broadcast %cst_116 : f32 to vector<8x128xf32>
    %367 = arith.addf %366, %365 : vector<8x128xf32>
    %368 = arith.divf %366, %367 : vector<8x128xf32>
    %369 = vector.extract_strided_slice %362 {offsets = [0, 128], sizes = [8, 128], strides = [1, 1]} : vector<8x512xf32> to vector<8x128xf32>
    %370 = arith.negf %369 : vector<8x128xf32>
    %371 = math.exp %370 : vector<8x128xf32>
    %cst_117 = arith.constant 1.000000e+00 : f32
    %372 = vector.broadcast %cst_117 : f32 to vector<8x128xf32>
    %373 = arith.addf %372, %371 : vector<8x128xf32>
    %374 = arith.divf %372, %373 : vector<8x128xf32>
    %375 = vector.extract_strided_slice %362 {offsets = [0, 256], sizes = [8, 128], strides = [1, 1]} : vector<8x512xf32> to vector<8x128xf32>
    %376 = math.tanh %375 : vector<8x128xf32>
    %377 = vector.extract_strided_slice %362 {offsets = [0, 384], sizes = [8, 128], strides = [1, 1]} : vector<8x512xf32> to vector<8x128xf32>
    %378 = arith.negf %377 : vector<8x128xf32>
    %379 = math.exp %378 : vector<8x128xf32>
    %cst_118 = arith.constant 1.000000e+00 : f32
    %380 = vector.broadcast %cst_118 : f32 to vector<8x128xf32>
    %381 = arith.addf %380, %379 : vector<8x128xf32>
    %382 = arith.divf %380, %381 : vector<8x128xf32>
    %383 = arith.mulf %374, %351 : vector<8x128xf32>
    %384 = arith.mulf %368, %376 : vector<8x128xf32>
    %385 = arith.addf %383, %384 : vector<8x128xf32>
    %386 = math.tanh %385 : vector<8x128xf32>
    %387 = arith.mulf %382, %386 : vector<8x128xf32>
    %388 = arith.index_cast %357 : i32 to index
    %c0_119 = arith.constant 0 : index
    %389 = vector.load %arg10[%388, %c0_119] : memref<64x128xf32, #tpu.memory_space<vmem>>, vector<8x128xf32>
    tpu.vector_store %arg10[%388, %c0_119], %387 {strides = array<i32>} : memref<64x128xf32, #tpu.memory_space<vmem>>, vector<8x128xf32>,
    %c3_i32_120 = arith.constant 3 : i32
    %c8_i32_121 = arith.constant 8 : i32
    %390 = arith.muli %c3_i32_120, %c8_i32_121 : i32
    %391 = tpu.assume_multiple %390, 8 : i32
    %392 = arith.index_cast %391 : i32 to index
    %c0_122 = arith.constant 0 : index
    %393 = vector.load %arg11[%392, %c0_122] : memref<64x512xf32, #tpu.memory_space<vmem>>, vector<8x512xf32>
    %c0_123 = arith.constant 0 : index
    %c0_124 = arith.constant 0 : index
    %394 = vector.load %arg5[%c0_123, %c0_124] : memref<128x512xf32, #tpu.memory_space<vmem>>, vector<128x512xf32>
    %cst_125 = arith.constant dense<0.000000e+00> : vector<8x512xf32>
    %395 = tpu.matmul %387, %394, %cst_125 {dimension_numbers = #tpu.dot_dimension_numbers<[1], [0], [0], [1], [0, 0, 1, 1], [], []>} : vector<8x128xf32>, vector<128x512xf32>, vector<8x512xf32> -> vector<8x512xf32>
    %396 = arith.addf %393, %395 : vector<8x512xf32>
    %397 = vector.extract_strided_slice %396 {offsets = [0, 0], sizes = [8, 128], strides = [1, 1]} : vector<8x512xf32> to vector<8x128xf32>
    %398 = arith.negf %397 : vector<8x128xf32>
    %399 = math.exp %398 : vector<8x128xf32>
    %cst_126 = arith.constant 1.000000e+00 : f32
    %400 = vector.broadcast %cst_126 : f32 to vector<8x128xf32>
    %401 = arith.addf %400, %399 : vector<8x128xf32>
    %402 = arith.divf %400, %401 : vector<8x128xf32>
    %403 = vector.extract_strided_slice %396 {offsets = [0, 128], sizes = [8, 128], strides = [1, 1]} : vector<8x512xf32> to vector<8x128xf32>
    %404 = arith.negf %403 : vector<8x128xf32>
    %405 = math.exp %404 : vector<8x128xf32>
    %cst_127 = arith.constant 1.000000e+00 : f32
    %406 = vector.broadcast %cst_127 : f32 to vector<8x128xf32>
    %407 = arith.addf %406, %405 : vector<8x128xf32>
    %408 = arith.divf %406, %407 : vector<8x128xf32>
    %409 = vector.extract_strided_slice %396 {offsets = [0, 256], sizes = [8, 128], strides = [1, 1]} : vector<8x512xf32> to vector<8x128xf32>
    %410 = math.tanh %409 : vector<8x128xf32>
    %411 = vector.extract_strided_slice %396 {offsets = [0, 384], sizes = [8, 128], strides = [1, 1]} : vector<8x512xf32> to vector<8x128xf32>
    %412 = arith.negf %411 : vector<8x128xf32>
    %413 = math.exp %412 : vector<8x128xf32>
    %cst_128 = arith.constant 1.000000e+00 : f32
    %414 = vector.broadcast %cst_128 : f32 to vector<8x128xf32>
    %415 = arith.addf %414, %413 : vector<8x128xf32>
    %416 = arith.divf %414, %415 : vector<8x128xf32>
    %417 = arith.mulf %408, %385 : vector<8x128xf32>
    %418 = arith.mulf %402, %410 : vector<8x128xf32>
    %419 = arith.addf %417, %418 : vector<8x128xf32>
    %420 = math.tanh %419 : vector<8x128xf32>
    %421 = arith.mulf %416, %420 : vector<8x128xf32>
    %422 = arith.index_cast %391 : i32 to index
    %c0_129 = arith.constant 0 : index
    %423 = vector.load %arg10[%422, %c0_129] : memref<64x128xf32, #tpu.memory_space<vmem>>, vector<8x128xf32>
    tpu.vector_store %arg10[%422, %c0_129], %421 {strides = array<i32>} : memref<64x128xf32, #tpu.memory_space<vmem>>, vector<8x128xf32>,
    %c4_i32_130 = arith.constant 4 : i32
    %c8_i32_131 = arith.constant 8 : i32
    %424 = arith.muli %c4_i32_130, %c8_i32_131 : i32
    %425 = tpu.assume_multiple %424, 8 : i32
    %426 = arith.index_cast %425 : i32 to index
    %c0_132 = arith.constant 0 : index
    %427 = vector.load %arg11[%426, %c0_132] : memref<64x512xf32, #tpu.memory_space<vmem>>, vector<8x512xf32>
    %c0_133 = arith.constant 0 : index
    %c0_134 = arith.constant 0 : index
    %428 = vector.load %arg5[%c0_133, %c0_134] : memref<128x512xf32, #tpu.memory_space<vmem>>, vector<128x512xf32>
    %cst_135 = arith.constant dense<0.000000e+00> : vector<8x512xf32>
    %429 = tpu.matmul %421, %428, %cst_135 {dimension_numbers = #tpu.dot_dimension_numbers<[1], [0], [0], [1], [0, 0, 1, 1], [], []>} : vector<8x128xf32>, vector<128x512xf32>, vector<8x512xf32> -> vector<8x512xf32>
    %430 = arith.addf %427, %429 : vector<8x512xf32>
    %431 = vector.extract_strided_slice %430 {offsets = [0, 0], sizes = [8, 128], strides = [1, 1]} : vector<8x512xf32> to vector<8x128xf32>
    %432 = arith.negf %431 : vector<8x128xf32>
    %433 = math.exp %432 : vector<8x128xf32>
    %cst_136 = arith.constant 1.000000e+00 : f32
    %434 = vector.broadcast %cst_136 : f32 to vector<8x128xf32>
    %435 = arith.addf %434, %433 : vector<8x128xf32>
    %436 = arith.divf %434, %435 : vector<8x128xf32>
    %437 = vector.extract_strided_slice %430 {offsets = [0, 128], sizes = [8, 128], strides = [1, 1]} : vector<8x512xf32> to vector<8x128xf32>
    %438 = arith.negf %437 : vector<8x128xf32>
    %439 = math.exp %438 : vector<8x128xf32>
    %cst_137 = arith.constant 1.000000e+00 : f32
    %440 = vector.broadcast %cst_137 : f32 to vector<8x128xf32>
    %441 = arith.addf %440, %439 : vector<8x128xf32>
    %442 = arith.divf %440, %441 : vector<8x128xf32>
    %443 = vector.extract_strided_slice %430 {offsets = [0, 256], sizes = [8, 128], strides = [1, 1]} : vector<8x512xf32> to vector<8x128xf32>
    %444 = math.tanh %443 : vector<8x128xf32>
    %445 = vector.extract_strided_slice %430 {offsets = [0, 384], sizes = [8, 128], strides = [1, 1]} : vector<8x512xf32> to vector<8x128xf32>
    %446 = arith.negf %445 : vector<8x128xf32>
    %447 = math.exp %446 : vector<8x128xf32>
    %cst_138 = arith.constant 1.000000e+00 : f32
    %448 = vector.broadcast %cst_138 : f32 to vector<8x128xf32>
    %449 = arith.addf %448, %447 : vector<8x128xf32>
    %450 = arith.divf %448, %449 : vector<8x128xf32>
    %451 = arith.mulf %442, %419 : vector<8x128xf32>
    %452 = arith.mulf %436, %444 : vector<8x128xf32>
    %453 = arith.addf %451, %452 : vector<8x128xf32>
    %454 = math.tanh %453 : vector<8x128xf32>
    %455 = arith.mulf %450, %454 : vector<8x128xf32>
    %456 = arith.index_cast %425 : i32 to index
    %c0_139 = arith.constant 0 : index
    %457 = vector.load %arg10[%456, %c0_139] : memref<64x128xf32, #tpu.memory_space<vmem>>, vector<8x128xf32>
    tpu.vector_store %arg10[%456, %c0_139], %455 {strides = array<i32>} : memref<64x128xf32, #tpu.memory_space<vmem>>, vector<8x128xf32>,
    %c5_i32_140 = arith.constant 5 : i32
    %c8_i32_141 = arith.constant 8 : i32
    %458 = arith.muli %c5_i32_140, %c8_i32_141 : i32
    %459 = tpu.assume_multiple %458, 8 : i32
    %460 = arith.index_cast %459 : i32 to index
    %c0_142 = arith.constant 0 : index
    %461 = vector.load %arg11[%460, %c0_142] : memref<64x512xf32, #tpu.memory_space<vmem>>, vector<8x512xf32>
    %c0_143 = arith.constant 0 : index
    %c0_144 = arith.constant 0 : index
    %462 = vector.load %arg5[%c0_143, %c0_144] : memref<128x512xf32, #tpu.memory_space<vmem>>, vector<128x512xf32>
    %cst_145 = arith.constant dense<0.000000e+00> : vector<8x512xf32>
    %463 = tpu.matmul %455, %462, %cst_145 {dimension_numbers = #tpu.dot_dimension_numbers<[1], [0], [0], [1], [0, 0, 1, 1], [], []>} : vector<8x128xf32>, vector<128x512xf32>, vector<8x512xf32> -> vector<8x512xf32>
    %464 = arith.addf %461, %463 : vector<8x512xf32>
    %465 = vector.extract_strided_slice %464 {offsets = [0, 0], sizes = [8, 128], strides = [1, 1]} : vector<8x512xf32> to vector<8x128xf32>
    %466 = arith.negf %465 : vector<8x128xf32>
    %467 = math.exp %466 : vector<8x128xf32>
    %cst_146 = arith.constant 1.000000e+00 : f32
    %468 = vector.broadcast %cst_146 : f32 to vector<8x128xf32>
    %469 = arith.addf %468, %467 : vector<8x128xf32>
    %470 = arith.divf %468, %469 : vector<8x128xf32>
    %471 = vector.extract_strided_slice %464 {offsets = [0, 128], sizes = [8, 128], strides = [1, 1]} : vector<8x512xf32> to vector<8x128xf32>
    %472 = arith.negf %471 : vector<8x128xf32>
    %473 = math.exp %472 : vector<8x128xf32>
    %cst_147 = arith.constant 1.000000e+00 : f32
    %474 = vector.broadcast %cst_147 : f32 to vector<8x128xf32>
    %475 = arith.addf %474, %473 : vector<8x128xf32>
    %476 = arith.divf %474, %475 : vector<8x128xf32>
    %477 = vector.extract_strided_slice %464 {offsets = [0, 256], sizes = [8, 128], strides = [1, 1]} : vector<8x512xf32> to vector<8x128xf32>
    %478 = math.tanh %477 : vector<8x128xf32>
    %479 = vector.extract_strided_slice %464 {offsets = [0, 384], sizes = [8, 128], strides = [1, 1]} : vector<8x512xf32> to vector<8x128xf32>
    %480 = arith.negf %479 : vector<8x128xf32>
    %481 = math.exp %480 : vector<8x128xf32>
    %cst_148 = arith.constant 1.000000e+00 : f32
    %482 = vector.broadcast %cst_148 : f32 to vector<8x128xf32>
    %483 = arith.addf %482, %481 : vector<8x128xf32>
    %484 = arith.divf %482, %483 : vector<8x128xf32>
    %485 = arith.mulf %476, %453 : vector<8x128xf32>
    %486 = arith.mulf %470, %478 : vector<8x128xf32>
    %487 = arith.addf %485, %486 : vector<8x128xf32>
    %488 = math.tanh %487 : vector<8x128xf32>
    %489 = arith.mulf %484, %488 : vector<8x128xf32>
    %490 = arith.index_cast %459 : i32 to index
    %c0_149 = arith.constant 0 : index
    %491 = vector.load %arg10[%490, %c0_149] : memref<64x128xf32, #tpu.memory_space<vmem>>, vector<8x128xf32>
    tpu.vector_store %arg10[%490, %c0_149], %489 {strides = array<i32>} : memref<64x128xf32, #tpu.memory_space<vmem>>, vector<8x128xf32>,
    %c6_i32_150 = arith.constant 6 : i32
    %c8_i32_151 = arith.constant 8 : i32
    %492 = arith.muli %c6_i32_150, %c8_i32_151 : i32
    %493 = tpu.assume_multiple %492, 8 : i32
    %494 = arith.index_cast %493 : i32 to index
    %c0_152 = arith.constant 0 : index
    %495 = vector.load %arg11[%494, %c0_152] : memref<64x512xf32, #tpu.memory_space<vmem>>, vector<8x512xf32>
    %c0_153 = arith.constant 0 : index
    %c0_154 = arith.constant 0 : index
    %496 = vector.load %arg5[%c0_153, %c0_154] : memref<128x512xf32, #tpu.memory_space<vmem>>, vector<128x512xf32>
    %cst_155 = arith.constant dense<0.000000e+00> : vector<8x512xf32>
    %497 = tpu.matmul %489, %496, %cst_155 {dimension_numbers = #tpu.dot_dimension_numbers<[1], [0], [0], [1], [0, 0, 1, 1], [], []>} : vector<8x128xf32>, vector<128x512xf32>, vector<8x512xf32> -> vector<8x512xf32>
    %498 = arith.addf %495, %497 : vector<8x512xf32>
    %499 = vector.extract_strided_slice %498 {offsets = [0, 0], sizes = [8, 128], strides = [1, 1]} : vector<8x512xf32> to vector<8x128xf32>
    %500 = arith.negf %499 : vector<8x128xf32>
    %501 = math.exp %500 : vector<8x128xf32>
    %cst_156 = arith.constant 1.000000e+00 : f32
    %502 = vector.broadcast %cst_156 : f32 to vector<8x128xf32>
    %503 = arith.addf %502, %501 : vector<8x128xf32>
    %504 = arith.divf %502, %503 : vector<8x128xf32>
    %505 = vector.extract_strided_slice %498 {offsets = [0, 128], sizes = [8, 128], strides = [1, 1]} : vector<8x512xf32> to vector<8x128xf32>
    %506 = arith.negf %505 : vector<8x128xf32>
    %507 = math.exp %506 : vector<8x128xf32>
    %cst_157 = arith.constant 1.000000e+00 : f32
    %508 = vector.broadcast %cst_157 : f32 to vector<8x128xf32>
    %509 = arith.addf %508, %507 : vector<8x128xf32>
    %510 = arith.divf %508, %509 : vector<8x128xf32>
    %511 = vector.extract_strided_slice %498 {offsets = [0, 256], sizes = [8, 128], strides = [1, 1]} : vector<8x512xf32> to vector<8x128xf32>
    %512 = math.tanh %511 : vector<8x128xf32>
    %513 = vector.extract_strided_slice %498 {offsets = [0, 384], sizes = [8, 128], strides = [1, 1]} : vector<8x512xf32> to vector<8x128xf32>
    %514 = arith.negf %513 : vector<8x128xf32>
    %515 = math.exp %514 : vector<8x128xf32>
    %cst_158 = arith.constant 1.000000e+00 : f32
    %516 = vector.broadcast %cst_158 : f32 to vector<8x128xf32>
    %517 = arith.addf %516, %515 : vector<8x128xf32>
    %518 = arith.divf %516, %517 : vector<8x128xf32>
    %519 = arith.mulf %510, %487 : vector<8x128xf32>
    %520 = arith.mulf %504, %512 : vector<8x128xf32>
    %521 = arith.addf %519, %520 : vector<8x128xf32>
    %522 = math.tanh %521 : vector<8x128xf32>
    %523 = arith.mulf %518, %522 : vector<8x128xf32>
    %524 = arith.index_cast %493 : i32 to index
    %c0_159 = arith.constant 0 : index
    %525 = vector.load %arg10[%524, %c0_159] : memref<64x128xf32, #tpu.memory_space<vmem>>, vector<8x128xf32>
    tpu.vector_store %arg10[%524, %c0_159], %523 {strides = array<i32>} : memref<64x128xf32, #tpu.memory_space<vmem>>, vector<8x128xf32>,
    %c7_i32_160 = arith.constant 7 : i32
    %c8_i32_161 = arith.constant 8 : i32
    %526 = arith.muli %c7_i32_160, %c8_i32_161 : i32
    %527 = tpu.assume_multiple %526, 8 : i32
    %528 = arith.index_cast %527 : i32 to index
    %c0_162 = arith.constant 0 : index
    %529 = vector.load %arg11[%528, %c0_162] : memref<64x512xf32, #tpu.memory_space<vmem>>, vector<8x512xf32>
    %c0_163 = arith.constant 0 : index
    %c0_164 = arith.constant 0 : index
    %530 = vector.load %arg5[%c0_163, %c0_164] : memref<128x512xf32, #tpu.memory_space<vmem>>, vector<128x512xf32>
    %cst_165 = arith.constant dense<0.000000e+00> : vector<8x512xf32>
    %531 = tpu.matmul %523, %530, %cst_165 {dimension_numbers = #tpu.dot_dimension_numbers<[1], [0], [0], [1], [0, 0, 1, 1], [], []>} : vector<8x128xf32>, vector<128x512xf32>, vector<8x512xf32> -> vector<8x512xf32>
    %532 = arith.addf %529, %531 : vector<8x512xf32>
    %533 = vector.extract_strided_slice %532 {offsets = [0, 0], sizes = [8, 128], strides = [1, 1]} : vector<8x512xf32> to vector<8x128xf32>
    %534 = arith.negf %533 : vector<8x128xf32>
    %535 = math.exp %534 : vector<8x128xf32>
    %cst_166 = arith.constant 1.000000e+00 : f32
    %536 = vector.broadcast %cst_166 : f32 to vector<8x128xf32>
    %537 = arith.addf %536, %535 : vector<8x128xf32>
    %538 = arith.divf %536, %537 : vector<8x128xf32>
    %539 = vector.extract_strided_slice %532 {offsets = [0, 128], sizes = [8, 128], strides = [1, 1]} : vector<8x512xf32> to vector<8x128xf32>
    %540 = arith.negf %539 : vector<8x128xf32>
    %541 = math.exp %540 : vector<8x128xf32>
    %cst_167 = arith.constant 1.000000e+00 : f32
    %542 = vector.broadcast %cst_167 : f32 to vector<8x128xf32>
    %543 = arith.addf %542, %541 : vector<8x128xf32>
    %544 = arith.divf %542, %543 : vector<8x128xf32>
    %545 = vector.extract_strided_slice %532 {offsets = [0, 256], sizes = [8, 128], strides = [1, 1]} : vector<8x512xf32> to vector<8x128xf32>
    %546 = math.tanh %545 : vector<8x128xf32>
    %547 = vector.extract_strided_slice %532 {offsets = [0, 384], sizes = [8, 128], strides = [1, 1]} : vector<8x512xf32> to vector<8x128xf32>
    %548 = arith.negf %547 : vector<8x128xf32>
    %549 = math.exp %548 : vector<8x128xf32>
    %cst_168 = arith.constant 1.000000e+00 : f32
    %550 = vector.broadcast %cst_168 : f32 to vector<8x128xf32>
    %551 = arith.addf %550, %549 : vector<8x128xf32>
    %552 = arith.divf %550, %551 : vector<8x128xf32>
    %553 = arith.mulf %544, %521 : vector<8x128xf32>
    %554 = arith.mulf %538, %546 : vector<8x128xf32>
    %555 = arith.addf %553, %554 : vector<8x128xf32>
    %556 = math.tanh %555 : vector<8x128xf32>
    %557 = arith.mulf %552, %556 : vector<8x128xf32>
    %558 = arith.index_cast %527 : i32 to index
    %c0_169 = arith.constant 0 : index
    %559 = vector.load %arg10[%558, %c0_169] : memref<64x128xf32, #tpu.memory_space<vmem>>, vector<8x128xf32>
    tpu.vector_store %arg10[%558, %c0_169], %557 {strides = array<i32>} : memref<64x128xf32, #tpu.memory_space<vmem>>, vector<8x128xf32>,
    %c8_i32_170 = arith.constant 8 : i32
    %c0_171 = arith.constant 0 : index
    %c0_172 = arith.constant 0 : index
    %560 = vector.load %arg10[%c0_171, %c0_172] : memref<64x128xf32, #tpu.memory_space<vmem>>, vector<64x128xf32>
    %c0_173 = arith.constant 0 : index
    %c0_174 = arith.constant 0 : index
    %561 = vector.load %arg7[%c0_173, %c0_174] : memref<128x128xf32, #tpu.memory_space<vmem>>, vector<128x128xf32>
    %cst_175 = arith.constant dense<0.000000e+00> : vector<64x128xf32>
    %562 = tpu.matmul %560, %561, %cst_175 {dimension_numbers = #tpu.dot_dimension_numbers<[1], [0], [0], [1], [0, 0, 1, 1], [], []>} : vector<64x128xf32>, vector<128x128xf32>, vector<64x128xf32> -> vector<64x128xf32>
    %c0_176 = arith.constant 0 : index
    %c0_177 = arith.constant 0 : index
    %563 = vector.load %arg8[%c0_176, %c0_177] : memref<1x128xf32, #tpu.memory_space<vmem>>, vector<1x128xf32>
    %564 = vector.broadcast %563 : vector<1x128xf32> to vector<64x128xf32>
    %565 = arith.addf %562, %564 : vector<64x128xf32>
    %c0_178 = arith.constant 0 : index
    %c0_179 = arith.constant 0 : index
    %566 = vector.load %arg9[%c0_178, %c0_179] : memref<64x128xf32, #tpu.memory_space<vmem>>, vector<64x128xf32>
    tpu.vector_store %arg9[%c0_178, %c0_179], %565 {strides = array<i32>} : memref<64x128xf32, #tpu.memory_space<vmem>>, vector<64x128xf32>,
    return
  }
}

</mosaic_0001>

<bundles_post_ra>
// kernel: lstm_forward.1
= control target key start
LH: loop header
LB: loop body
LE: loop exit
PB: predicated region body
PF: predicated region fallthrough
CT: control target
= control target key end

     0   :  { %14 = vsyncpa [#allocation5], 0  ;;  %s7818_s0 = inlined_call_operand.vmem [shape: f32[64,16], index: 0, kind: input, shape index: {}]   ;;  %s7819_s1 = inlined_call_operand.vmem [shape: f32[16,512], index: 1, kind: input, shape index: {}]   ;;  %s7820_s2 = inlined_call_operand.hbm [shape: f32[128,512], index: 2, kind: input, shape index: {}]   ;;  %s7821_s3 = inlined_call_operand.vmem [shape: f32[1,512], index: 3, kind: input, shape index: {}]   ;;  %s7822_s4 = inlined_call_operand.hbm [shape: f32[128,512], index: 4, kind: input, shape index: {}]   ;;  %s7823_s5 = inlined_call_operand.hbm [shape: f32[128,512], index: 5, kind: input, shape index: {}]   ;;  %s7824_s6 = inlined_call_operand.vmem [shape: f32[1,512], index: 6, kind: input, shape index: {}]   ;;  %s7825_s7 = inlined_call_operand.hbm [shape: f32[128,128], index: 7, kind: input, shape index: {}]   ;;  %s7826_s8 = inlined_call_operand.vmem [shape: f32[1,128], index: 8, kind: input, shape index: {}]   ;;  %s7827_s9 = inlined_call_operand.vmem [shape: f32[64,128], index: 9, kind: output, shape index: {}]  }
   0x1   :  { %15 = vsyncpa [#allocation7], 0 }
   0x2   :  { %16 = vsyncpa [#allocation10], 0  ;;  %s6521_s30 = smov [#allocation6]   ;;  %s6522_s11 = smov [#allocation4]  }
   0x3   :  { %s40_s10 = sshll.u32 %s6521_s30, 4  ;;  %s26_s12 = sshll.u32 %s6522_s11, 4  ;;  %s41_s10 = int_to_ptr.vmem [resolvable:$true] %s40_s10  ;;  %s6580_s12 = int_to_ptr.vmem [resolvable:$true] %s26_s12 }
   0x4   :  { %s6427_s15 = scalar_lea.hbm %s7822_s4, 8192 }
   0x5   :  { %p6428_p0 = scmp.ne.s32.totalorder %s7822_s4, %s6427_s15  ;;  %p6431_p1 = scmp.lt.u32.totalorder %s6427_s15, %s7822_s4 }
   0x7   :  { %p6433_p2 = pnand %p6431_p1, %p6428_p0 }
   0x9   :  { %6436 = shalt.err (!%p6433_p2)
}
   0xa   :  { %s6437_s20 = scalar_lea.vmem %s41_s10, 8192  ;;  %p6442_p4 = scmp.lt.s32.totalorder %s41_s10, %s41_s10 }
   0xb   :  { %p6438_p3 = scmp.ne.s32.totalorder %s41_s10, %s6437_s20  ;;  %p6443_p5 = scmp.lt.s32.totalorder %s6437_s20, %s6437_s20 }
   0xd   :  { %p6444_p6 = por %p6443_p5, %p6442_p4 }
   0xf   :  { %p6445_p7 = pnand %p6444_p6, %p6438_p3 }
  0x11   :  { %6448 = shalt.err (!%p6445_p7)
}
  0x12   :  { %s6523_s21 = smov 512   ;;  %s6524_s22 = smov 32  }
  0x13   :  { %46 = dma.hbm_to_vmem [thread:$0]  %s7822_s4, 8192, %s41_s10, [#allocation7], %s6523_s21, %s6523_s21, %s6524_s22  }
  0x14   :  { %s6449_s27 = scalar_lea.hbm %s7820_s2, 8192 }
  0x15   :  { %p6450_p8 = scmp.ne.s32.totalorder %s7820_s2, %s6449_s27  ;;  %p6453_p9 = scmp.lt.u32.totalorder %s6449_s27, %s7820_s2 }
  0x17   :  { %p6455_p10 = pnand %p6453_p9, %p6450_p8 }
  0x19   :  { %6458 = shalt.err (!%p6455_p10)
}
  0x1a   :  { %s6459_s13 = scalar_lea.vmem %s6580_s12, 8192  ;;  %p6464_p12 = scmp.lt.s32.totalorder %s6580_s12, %s6580_s12 }
  0x1b   :  { %p6460_p11 = scmp.ne.s32.totalorder %s6580_s12, %s6459_s13  ;;  %p6465_p13 = scmp.lt.s32.totalorder %s6459_s13, %s6459_s13 }
  0x1d   :  { %p6466_p0 = por %p6465_p13, %p6464_p12 }
  0x1f   :  { %p6467_p1 = pnand %p6466_p0, %p6460_p11 }
  0x21   :  { %6470 = shalt.err (!%p6467_p1)
}
  0x22   :  { %32 = dma.hbm_to_vmem [thread:$0]  %s7820_s2, 8192, %s6580_s12, [#allocation5], %s6523_s21, %s6523_s21, %s6524_s22  }
  0x23   :  { %s6525_s14 = smov [#allocation8]   ;;  %s6526_s16 = smov [#allocation9]  }
  0x24   :  { %s52_s15 = sshll.u32 %s6525_s14, 4  ;;  %s66_s17 = sshll.u32 %s6526_s16, 4  ;;  %s53_s15 = int_to_ptr.vmem [resolvable:$true] %s52_s15  ;;  %s6617_s17 = int_to_ptr.vmem [resolvable:$true] %s66_s17 }
  0x25   :  { %s6471_s20 = scalar_lea.hbm %s7823_s5, 8192 }
  0x26   :  { %p6472_p2 = scmp.ne.s32.totalorder %s7823_s5, %s6471_s20  ;;  %p6475_p3 = scmp.lt.u32.totalorder %s6471_s20, %s7823_s5 }
  0x28   :  { %p6477_p4 = pnand %p6475_p3, %p6472_p2 }
  0x2a   :  { %6480 = shalt.err (!%p6477_p4)
}
  0x2b   :  { %s6481_s2 = scalar_lea.vmem %s53_s15, 8192  ;;  %p6486_p6 = scmp.lt.s32.totalorder %s53_s15, %s53_s15 }
  0x2c   :  { %p6482_p5 = scmp.ne.s32.totalorder %s53_s15, %s6481_s2  ;;  %p6487_p7 = scmp.lt.s32.totalorder %s6481_s2, %s6481_s2 }
  0x2e   :  { %p6488_p8 = por %p6487_p7, %p6486_p6 }
  0x30   :  { %p6489_p9 = pnand %p6488_p8, %p6482_p5 }
  0x32   :  { %6492 = shalt.err (!%p6489_p9)
}
  0x33   :  { %58 = dma.hbm_to_vmem [thread:$0]  %s7823_s5, 8192, %s53_s15, [#allocation7], %s6523_s21, %s6523_s21, %s6524_s22  }
  0x34   :  { %s6493_s30 = scalar_lea.hbm %s7825_s7, 2048 }
  0x35   :  { %p6494_p10 = scmp.ne.s32.totalorder %s7825_s7, %s6493_s30  ;;  %p6497_p11 = scmp.lt.u32.totalorder %s6493_s30, %s7825_s7 }
  0x37   :  { %p6499_p12 = pnand %p6497_p11, %p6494_p10 }
  0x39   :  { %6502 = shalt.err (!%p6499_p12)
}
  0x3a   :  { %s6503_s14 = scalar_lea.vmem %s6617_s17, 2048  ;;  %p6508_p0 = scmp.lt.s32.totalorder %s6617_s17, %s6617_s17 }
  0x3b   :  { %p6504_p13 = scmp.ne.s32.totalorder %s6617_s17, %s6503_s14  ;;  %p6509_p1 = scmp.lt.s32.totalorder %s6503_s14, %s6503_s14 }
  0x3d   :  { %p6510_p2 = por %p6509_p1, %p6508_p0 }
  0x3f   :  { %p6511_p3 = pnand %p6510_p2, %p6504_p13 }
  0x41   :  { %6514 = shalt.err (!%p6511_p3)
}
  0x42   :  { %s6527_s5 = smov 128   ;;  %s6528_s21 = smov 8  }
  0x43   :  { %72 = dma.hbm_to_vmem [thread:$0]  %s7825_s7, 2048, %s6617_s17, [#allocation10], %s6527_s5, %s6527_s5, %s6528_s21  }
  0x44   :  { %6515 = dma.done.wait [#allocation5], 8192  }
  0x45   :  { %6516 = vsyncadd [#allocation5], 4294959104 }
  0x46   :  { %6517 = dma.done.wait [#allocation7], 16384  }
  0x47   :  { %6518 = vsyncadd [#allocation7], 4294950912 }
  0x48   :  { %6519 = dma.done.wait [#allocation10], 2048  }
  0x49   :  { %6520 = vsyncadd [#allocation10], 4294965248  ;;  %v6529_v0 = vmov 0.0   ;;  %v98_v1 = vld [vmem:[%s7819_s1 + $0x18] sm:$0xff]  ;;  %v97_v3 = vld [vmem:[%s7819_s1 + $0x10] sm:$0xff]  ;;  %vm125_vm0 = vcmask 130048  }
  0x4a   :  { %327 = vmatprep.mubr.f32.mxu1 %v6529_v0  ;;  %214 = vmatprep.mubr.f32.mxu0 %v6529_v0  ;;  %v102_v2 = vld [vmem:[%s7819_s1 + $0x38] sm:$0xff]  ;;  %v101_v5 = vld [vmem:[%s7819_s1 + $0x30] sm:$0xff]  ;;  %v416_v6 = vld [vmem:[#allocation4 + $0x8] sm:$0xff] }
  0x4b   :  { %v4910_v4 = vpack.c.bf16 %v102_v2, %v98_v1  ;;  %v4912_v7 = vpack.c.bf16 %v101_v5, %v97_v3  ;;  %v420_v8 = vld [vmem:[#allocation4 + $0x28] sm:$0xff]  ;;  %v415_v9 = vld [vmem:[#allocation4] sm:$0xff]  ;;  %v6695_v28 = vld [vmem:[%s7818_s0 + $0x10] sm:$0xff] }
  0x4c   :  { %v419_v10 = vld [vmem:[#allocation4 + $0x20] sm:$0xff]  ;;  %v6665_v11 = vpack.c.bf16 %v420_v8, %v416_v6  ;;  %v424_v12 = vld [vmem:[#allocation4 + $0x48] sm:$0xff]  ;;  %v6721_v41 = vld [vmem:[%s7818_s0 + $0x18] sm:$0xff] }
  0x4d   :  { %4911 = vmatprep.subr.bf16.mxu1 %v4910_v4  ;;  %v428_v13 = vld [vmem:[#allocation4 + $0x68] sm:$0xff]  ;;  %v87_v14 = vld [vmem:[%s7818_s0] sm:$0xff]  ;;  %v6670_v15 = vpack.c.bf16 %v419_v10, %v415_v9  ;;  %v93_v62 = vld [vmem:[%s7818_s0 + $0x30] sm:$0xff] }
  0x4e   :  { %4913 = vmatpush1.bf16.msra.mxu1 %v4912_v7  ;;  %v6673_v16 = vpack.c.bf16 %v428_v13, %v424_v12  ;;  %v423_v17 = vld [vmem:[#allocation4 + $0x40] sm:$0xff]  ;;  %v432_v19 = vld [vmem:[#allocation4 + $0x88] sm:$0xff]  ;;  %v418_v4 = vld [vmem:[#allocation4 + $0x18] sm:$0xff] }
  0x4f   :  { %4915 = vmatprep.subr.bf16.mxu1 %v6665_v11  ;;  %v427_v18 = vld [vmem:[#allocation4 + $0x60] sm:$0xff]  ;;  %v436_v20 = vld [vmem:[#allocation4 + $0xa8] sm:$0xff]  ;;  %v422_v5 = vld [vmem:[#allocation4 + $0x38] sm:$0xff] }
  0x50   :  { %v6681_v21 = vld [vmem:[%s7818_s0 + $0x8] sm:$0xff]  ;;  %v6683_v22 = vpack.c.bf16 %v427_v18, %v423_v17  ;;  %v6686_v23 = vpack.c.bf16 %v436_v20, %v432_v19  ;;  %v431_v24 = vld [vmem:[#allocation4 + $0x80] sm:$0xff]  ;;  %v94_v6 = vld [vmem:[%s7818_s0 + $0x38] sm:$0xff]  ;;  %v6792_v8 = vpack.c.bf16 %v422_v5, %v418_v4  ;;  %v105_v5 = vlaneseq }
  0x51   :  { %4781 = vmatmul.mubr.msk.f32.vlgmr.msra.gmra.mrb[0].mxu1 %vm125_vm0, %v87_v14  ;;  %v435_v25 = vld [vmem:[#allocation4 + $0xa0] sm:$0xff]  ;;  %v440_v26 = vld [vmem:[#allocation4 + $0xc8] sm:$0xff]  ;;  %v417_v9 = vld [vmem:[#allocation4 + $0x10] sm:$0xff] }
  0x52   :  { %4917 = vmatpush1.bf16.msra.mxu1 %v6670_v15  ;;  %333 = vmatprep.mubr.f32.mxu1 %v6529_v0  ;;  %v444_v27 = vld [vmem:[#allocation4 + $0xe8] sm:$0xff]  ;;  %v6697_v29 = vpack.c.bf16 %v435_v25, %v431_v24  ;;  %v439_v30 = vld [vmem:[#allocation4 + $0xc0] sm:$0xff]  ;;  %v421_v10 = vld [vmem:[#allocation4 + $0x30] sm:$0xff] }
  0x53   :  { %4919 = vmatprep.subr.bf16.mxu1 %v6673_v16  ;;  %v443_v31 = vld [vmem:[#allocation4 + $0xe0] sm:$0xff]  ;;  %v6700_v32 = vpack.c.bf16 %v444_v27, %v440_v26  ;;  %v96_v33 = vld [vmem:[%s7819_s1 + $0x8] sm:$0xff]  ;;  %v426_v12 = vld [vmem:[#allocation4 + $0x58] sm:$0xff] }
  0x54   :  { %v100_v34 = vld [vmem:[%s7819_s1 + $0x28] sm:$0xff]  ;;  %v95_v35 = vld [vmem:[%s7819_s1] sm:$0xff]  ;;  %v6723_v42 = vpack.c.bf16 %v443_v31, %v439_v30  ;;  %v430_v13 = vld [vmem:[#allocation4 + $0x78] sm:$0xff] }
  0x55   :  { %4782 = vmatmul.mubr.msk.f32.gmra.mrb[2].mxu1 %vm125_vm0, %v6681_v21  ;;  %v448_v36 = vld [vmem:[#allocation4 + $0x108] sm:$0xff]  ;;  %v4906_v38 = vpack.c.bf16 %v100_v34, %v96_v33  ;;  %v99_v39 = vld [vmem:[%s7819_s1 + $0x20] sm:$0xff]  ;;  %v6805_v17 = vpack.c.bf16 %v430_v13, %v426_v12  ;;  %v425_v18 = vld [vmem:[#allocation4 + $0x50] sm:$0xff] }
  0x56   :  { %4921 = vmatpush1.bf16.msra.mxu1 %v6683_v22  ;;  %339 = vmatprep.mubr.f32.mxu1 %v6529_v0  ;;  %v452_v37 = vld [vmem:[#allocation4 + $0x128] sm:$0xff]  ;;  %v4908_v40 = vpack.c.bf16 %v99_v39, %v95_v35  ;;  %v447_v44 = vld [vmem:[#allocation4 + $0x100] sm:$0xff]  ;;  %v429_v19 = vld [vmem:[#allocation4 + $0x70] sm:$0xff] }
  0x57   :  { %4923 = vmatprep.subr.bf16.mxu1 %v6686_v23  ;;  %v6726_v43 = vpack.c.bf16 %v452_v37, %v448_v36  ;;  %v451_v45 = vld [vmem:[#allocation4 + $0x120] sm:$0xff]  ;;  %4907 = vmatprep.subr.bf16.mxu0 %v4906_v38  ;;  %v456_v46 = vld [vmem:[#allocation4 + $0x148] sm:$0xff]  ;;  %v434_v20 = vld [vmem:[#allocation4 + $0x98] sm:$0xff]  ;;  %v6814_v24 = vpack.c.bf16 %v429_v19, %v425_v18 }
  0x58   :  { %v460_v47 = vld [vmem:[#allocation4 + $0x168] sm:$0xff]  ;;  %4909 = vmatpush1.bf16.msra.mxu0 %v4908_v40  ;;  %v6736_v48 = vld [vmem:[%s7818_s0 + $0x20] sm:$0xff]  ;;  %v6738_v49 = vpack.c.bf16 %v451_v45, %v447_v44  ;;  %v433_v26 = vld [vmem:[#allocation4 + $0x90] sm:$0xff] }
  0x59   :  { %4783 = vmatmul.mubr.msk.f32.gmra.mrb[4].mxu1 %vm125_vm0, %v6695_v28  ;;  %4979 = vmatprep.subr.bf16.mxu0 %v6665_v11  ;;  %v6741_v50 = vpack.c.bf16 %v460_v47, %v456_v46  ;;  %v455_v51 = vld [vmem:[#allocation4 + $0x140] sm:$0xff]  ;;  %v464_v53 = vld [vmem:[#allocation4 + $0x188] sm:$0xff]  ;;  %v437_v27 = vld [vmem:[#allocation4 + $0xb0] sm:$0xff] }
  0x5a   :  { %4925 = vmatpush1.bf16.msra.mxu1 %v6697_v29  ;;  %345 = vmatprep.mubr.f32.mxu1 %v6529_v0  ;;  %v459_v52 = vld [vmem:[#allocation4 + $0x160] sm:$0xff]  ;;  %v468_v54 = vld [vmem:[#allocation4 + $0x1a8] sm:$0xff]  ;;  %v446_v30 = vld [vmem:[#allocation4 + $0xf8] sm:$0xff]  ;;  %v6826_v31 = vpack.c.bf16 %v437_v27, %v433_v26 }
  0x5b   :  { %4927 = vmatprep.subr.bf16.mxu1 %v6700_v32  ;;  %4773 = vmatmul.mubr.msk.f32.vlgmr.msra.gmra.mrb[0].mxu0 %vm125_vm0, %v87_v14  ;;  %v6754_v55 = vld [vmem:[%s7818_s0 + $0x28] sm:$0xff]  ;;  %v6756_v56 = vpack.c.bf16 %v459_v52, %v455_v51  ;;  %v6759_v57 = vpack.c.bf16 %v468_v54, %v464_v53  ;;  %v463_v58 = vld [vmem:[#allocation4 + $0x180] sm:$0xff]  ;;  %v6802_v14 = vpack.c.bf16 %v421_v10, %v417_v9  ;;  %v441_v34 = vld [vmem:[#allocation4 + $0xd0] sm:$0xff]  ;;  %v6887_v10 = vshrl.u32 %v105_v5, 7 }
  0x5c   :  { %4981 = vmatpush1.bf16.msra.mxu0 %v6670_v15  ;;  %220 = vmatprep.mubr.f32.mxu0 %v6529_v0  ;;  %v467_v59 = vld [vmem:[#allocation4 + $0x1a0] sm:$0xff]  ;;  %v472_v60 = vld [vmem:[#allocation4 + $0x1c8] sm:$0xff]  ;;  %v445_v35 = vld [vmem:[#allocation4 + $0xf0] sm:$0xff] }
  0x5d   :  { %4784 = vmatmul.mubr.msk.f32.gmra.mrb[6].mxu1 %vm125_vm0, %v6721_v41  ;;  %4983 = vmatprep.subr.bf16.mxu0 %v6673_v16  ;;  %v476_v61 = vld [vmem:[#allocation4 + $0x1e8] sm:$0xff]  ;;  %v6773_v63 = vpack.c.bf16 %v467_v59, %v463_v58  ;;  %v471_v2 = vld [vmem:[#allocation4 + $0x1c0] sm:$0xff]  ;;  %v450_v36 = vld [vmem:[#allocation4 + $0x118] sm:$0xff]  ;;  %v6836_v38 = vpack.c.bf16 %v445_v35, %v441_v34  ;;  %v107_v12 = vsub.s32 0, %v6887_v10  ;;  %v111_v18 = vsub.s32 1, %v6887_v10 }
  0x5e   :  { %4929 = vmatpush1.bf16.msra.mxu1 %v6723_v42  ;;  %351 = vmatprep.mubr.f32.mxu1 %v6529_v0  ;;  %v6776_v1 = vpack.c.bf16 %v476_v61, %v472_v60  ;;  %v475_v3 = vld [vmem:[#allocation4 + $0x1e0] sm:$0xff]  ;;  %v454_v37 = vld [vmem:[#allocation4 + $0x138] sm:$0xff]  ;;  %v449_v40 = vld [vmem:[#allocation4 + $0x110] sm:$0xff] }
  0x5f   :  { %4931 = vmatprep.subr.bf16.mxu1 %v6726_v43  ;;  %4774 = vmatmul.mubr.msk.f32.gmra.mrb[2].mxu0 %vm125_vm0, %v6681_v21  ;;  %v6789_v7 = vpack.c.bf16 %v475_v3, %v471_v2  ;;  %v438_v21 = vld [vmem:[#allocation4 + $0xb8] sm:$0xff]  ;;  %v6839_v39 = vpack.c.bf16 %v454_v37, %v450_v36  ;;  %v461_v51 = vld [vmem:[#allocation4 + $0x170] sm:$0xff]  ;;  %v103_v13 = vld [vmem:[%s7821_s3] sm:$0xf]  ;;  %v115_v37 = vsub.s32 2, %v6887_v10 }
  0x60   :  { %4985 = vmatpush1.bf16.msra.mxu0 %v6683_v22  ;;  %226 = vmatprep.mubr.f32.mxu0 %v6529_v0  ;;  %v6818_v25 = vpack.c.bf16 %v438_v21, %v434_v20  ;;  %v458_v44 = vld [vmem:[#allocation4 + $0x158] sm:$0xff]  ;;  %v469_v58 = vld [vmem:[#allocation4 + $0x1b0] sm:$0xff]  ;;  %v6896_v19 = vrot.slane %v103_v13, %v107_v12  ;;  %v6900_v20 = vrot.slane %v103_v13, %v111_v18 }
  0x61   :  { %4785 = vmatmul.mubr.msk.f32.gmra.mrb[8].mxu1 %vm125_vm0, %v6736_v48  ;;  %4987 = vmatprep.subr.bf16.mxu0 %v6686_v23  ;;  %v462_v45 = vld [vmem:[#allocation4 + $0x178] sm:$0xff]  ;;  %v473_v2 = vld [vmem:[#allocation4 + $0x1d0] sm:$0xff] }
  0x62   :  { %4933 = vmatpush1.bf16.msra.mxu1 %v6738_v49  ;;  %357 = vmatprep.mubr.f32.mxu1 %v6529_v0  ;;  %v6849_v47 = vpack.c.bf16 %v462_v45, %v458_v44  ;;  %v466_v52 = vld [vmem:[#allocation4 + $0x198] sm:$0xff]  ;;  %v477_v3 = vld [vmem:[#allocation4 + $0x1f0] sm:$0xff] }
  0x63   :  { %4935 = vmatprep.subr.bf16.mxu1 %v6741_v50  ;;  %4775 = vmatmul.mubr.msk.f32.gmra.mrb[4].mxu0 %vm125_vm0, %v6695_v28  ;;  %v442_v28 = vld [vmem:[#allocation4 + $0xd8] sm:$0xff]  ;;  %v6864_v4 = vpack.c.bf16 %v477_v3, %v473_v2 }
  0x64   :  { %4989 = vmatpush1.bf16.msra.mxu0 %v6697_v29  ;;  %232 = vmatprep.mubr.f32.mxu0 %v6529_v0  ;;  %v6829_v33 = vpack.c.bf16 %v446_v30, %v442_v28  ;;  %v470_v53 = vld [vmem:[#allocation4 + $0x1b8] sm:$0xff] }
  0x65   :  { %4786 = vmatmul.mubr.msk.f32.gmra.mrb[10].mxu1 %vm125_vm0, %v6754_v55  ;;  %4991 = vmatprep.subr.bf16.mxu0 %v6700_v32  ;;  %v474_v59 = vld [vmem:[#allocation4 + $0x1d8] sm:$0xff] }
  0x66   :  { %4937 = vmatpush1.bf16.msra.mxu1 %v6756_v56  ;;  %363 = vmatprep.mubr.f32.mxu1 %v6529_v0  ;;  %v478_v60 = vld [vmem:[#allocation4 + $0x1f8] sm:$0xff] }
  0x67   :  { %4939 = vmatprep.subr.bf16.mxu1 %v6759_v57  ;;  %4776 = vmatmul.mubr.msk.f32.gmra.mrb[6].mxu0 %vm125_vm0, %v6721_v41  ;;  %v453_v41 = vld [vmem:[#allocation4 + $0x130] sm:$0xff] }
  0x68   :  { %4993 = vmatpush1.bf16.msra.mxu0 %v6723_v42  ;;  %238 = vmatprep.mubr.f32.mxu0 %v6529_v0  ;;  %v6846_v46 = vpack.c.bf16 %v453_v41, %v449_v40  ;;  %v119_v41 = vsub.s32 3, %v6887_v10 }
  0x69   :  { %4787 = vmatmul.mubr.msk.f32.gmra.mrb[12].mxu1 %vm125_vm0, %v93_v62  ;;  %4995 = vmatprep.subr.bf16.mxu0 %v6726_v43 }
  0x6a   :  { %4941 = vmatpush1.bf16.msra.mxu1 %v6773_v63  ;;  %369 = vmatprep.mubr.f32.mxu1 %v6529_v0 }
  0x6b   :  { %4943 = vmatprep.subr.bf16.mxu1 %v6776_v1  ;;  %4777 = vmatmul.mubr.msk.f32.gmra.mrb[8].mxu0 %vm125_vm0, %v6736_v48  ;;  %v457_v48 = vld [vmem:[#allocation4 + $0x150] sm:$0xff] }
  0x6c   :  { %4997 = vmatpush1.bf16.msra.mxu0 %v6738_v49  ;;  %244 = vmatprep.mubr.f32.mxu0 %v6529_v0  ;;  %v6852_v54 = vpack.c.bf16 %v461_v51, %v457_v48  ;;  %v6908_v48 = vrot.slane %v103_v13, %v115_v37 }
  0x6d   :  { %4788 = vmatmul.mubr.msk.f32.gmra.mrb[14].mxu1 %vm125_vm0, %v94_v6  ;;  %4999 = vmatprep.subr.bf16.mxu0 %v6741_v50 }
  0x6e   :  { %4945 = vmatpush1.bf16.msra.mxu1 %v6789_v7  ;;  %543 = vmatprep.mubr.f32.mxu1 %v6529_v0 }
  0x6f   :  { %4947 = vmatprep.subr.bf16.mxu1 %v6792_v8  ;;  %4778 = vmatmul.mubr.msk.f32.gmra.mrb[10].mxu0 %vm125_vm0, %v6754_v55  ;;  %v6855_v55 = vpack.c.bf16 %v470_v53, %v466_v52  ;;  %v6912_v52 = vrot.slane %v103_v13, %v119_v41 }
  0x70   :  { %5001 = vmatpush1.bf16.msra.mxu0 %v6756_v56  ;;  %250 = vmatprep.mubr.f32.mxu0 %v6529_v0 }
  0x71   :  { %544 = vmatmul.mubr.f32.vlgmr.msra.gmra.mrb[16].mxu1 %v6529_v0  ;;  %5003 = vmatprep.subr.bf16.mxu0 %v6759_v57 }
  0x72   :  { %4949 = vmatpush1.bf16.msra.mxu1 %v6802_v14  ;;  %614 = vmatprep.mubr.f32.mxu1 %v6529_v0 }
  0x73   :  { %4951 = vmatprep.subr.bf16.mxu1 %v6805_v17  ;;  %4779 = vmatmul.mubr.msk.f32.gmra.mrb[12].mxu0 %vm125_vm0, %v93_v62  ;;  %v6861_v62 = vpack.c.bf16 %v478_v60, %v474_v59 }
  0x74   :  { %5005 = vmatpush1.bf16.msra.mxu0 %v6773_v63  ;;  %256 = vmatprep.mubr.f32.mxu0 %v6529_v0 }
  0x75   :  { %5007 = vmatprep.subr.bf16.mxu0 %v6776_v1 }
  0x76   :  { %4953 = vmatpush1.bf16.msra.mxu1 %v6814_v24 }
  0x77   :  { %4955 = vmatprep.subr.bf16.mxu1 %v6818_v25  ;;  %4780 = vmatmul.mubr.msk.f32.gmra.mrb[14].mxu0 %vm125_vm0, %v94_v6 }
  0x78   :  { %5009 = vmatpush1.bf16.msra.mxu0 %v6789_v7  ;;  %785 = vmatprep.mubr.f32.mxu0 %v6529_v0 }
  0x79   :  { %5043 = vmatprep.subr.bf16.mxu0 %v6665_v11  ;;  %v465_v11 = vld [vmem:[#allocation4 + $0x190] sm:$0xff] }
  0x7a   :  { %4957 = vmatpush1.bf16.msra.mxu1 %v6826_v31  ;;  %v6858_v61 = vpack.c.bf16 %v469_v58, %v465_v11 }
  0x7b   :  { %4959 = vmatprep.subr.bf16.mxu1 %v6829_v33 }
  0x7e   :  { %4961 = vmatpush1.bf16.msra.mxu1 %v6836_v38 }
  0x7f   :  { %4963 = vmatprep.subr.bf16.mxu1 %v6839_v39 }
  0x82   :  { %4965 = vmatpush1.bf16.msra.mxu1 %v6846_v46 }
  0x83   :  { %4967 = vmatprep.subr.bf16.mxu1 %v6849_v47 }
  0x86   :  { %4969 = vmatpush1.bf16.msra.mxu1 %v6852_v54 }
  0x87   :  { %4971 = vmatprep.subr.bf16.mxu1 %v6855_v55 }
  0x8a   :  { %4973 = vmatpush1.bf16.msra.mxu1 %v6858_v61 }
  0x8b   :  { %4975 = vmatprep.subr.bf16.mxu1 %v6861_v62 }
  0x8e   :  { %4977 = vmatpush1.bf16.msra.mxu1 %v6864_v4 }
  0x8f   :  { %5011 = vmatprep.subr.bf16.mxu1 %v6792_v8 }
  0x91   :  { %615 = vmatmul.mubr.f32.vlgmr.msra.gmra.mrb[0].mxu1 %v6529_v0 }
  0x92   :  { %5013 = vmatpush1.bf16.msra.mxu1 %v6802_v14  ;;  %856 = vmatprep.mubr.f32.mxu1 %v6529_v0 }
  0x93   :  { %5015 = vmatprep.subr.bf16.mxu1 %v6805_v17 }
  0x96   :  { %5017 = vmatpush1.bf16.msra.mxu1 %v6814_v24 }
  0x97   :  { %5019 = vmatprep.subr.bf16.mxu1 %v6818_v25 }
  0x9a   :  { %5021 = vmatpush1.bf16.msra.mxu1 %v6826_v31 }
  0x9b   :  { %5023 = vmatprep.subr.bf16.mxu1 %v6829_v33 }
  0x9e   :  { %5025 = vmatpush1.bf16.msra.mxu1 %v6836_v38 }
  0x9f   :  { %5027 = vmatprep.subr.bf16.mxu1 %v6839_v39 }
  0xa2   :  { %5029 = vmatpush1.bf16.msra.mxu1 %v6846_v46 }
  0xa3   :  { %5031 = vmatprep.subr.bf16.mxu1 %v6849_v47 }
  0xa6   :  { %5033 = vmatpush1.bf16.msra.mxu1 %v6852_v54 }
  0xa7   :  { %5035 = vmatprep.subr.bf16.mxu1 %v6855_v55 }
  0xaa   :  { %5037 = vmatpush1.bf16.msra.mxu1 %v6858_v61 }
  0xab   :  { %5039 = vmatprep.subr.bf16.mxu1 %v6861_v62 }
  0xae   :  { %5041 = vmatpush1.bf16.msra.mxu1 %v6864_v4 }
  0xaf   :  { %5075 = vmatprep.subr.bf16.mxu1 %v6792_v8 }
 0x12e   :  { %v216_v6 = vpop.f32.mrb[0].mxu0 }
 0x12f   :  { %v218_v9 = vpop.f32.mrb[1].mxu0  ;;  %v217_v21 = vadd.f32 %v216_v6, %v6896_v19 }
 0x130   :  { %v219_v26 = vadd.f32 %v218_v9, %v6900_v20 }
 0x144   :  { %v545_v27 = vpop.f32.mrb[16].mxu1 }
 0x145   :  { %v621_v28 = vadd.f32 %v545_v27, %v217_v21  ;;  %v547_v30 = vpop.f32.mrb[17].mxu1 }
 0x146   :  { %v622_v34 = vadd.f32 %v547_v30, %v219_v26 }
 0x147   :  { %v4789_v36 = vmul.f32 -1.442695, %v621_v28 }
 0x148   :  { %v4790_v35 = vmul.f32 -1.442695, %v622_v34 }
 0x14a   :  { %6171 = vpow2.f32 %v4790_v35 }
 0x14b   :  { %6173 = vpow2.f32 %v4789_v36 }
 0x154   :  { %v6172_v40 = vpop.eup %6171 }
 0x155   :  { %v6174_v44 = vpop.eup %6173  ;;  %v634_v45 = vadd.f32 1.0, %v6172_v40 }
 0x156   :  { %v628_v51 = vadd.f32 1.0, %v6174_v44 }
 0x157   :  { %6175 = vrcp.f32 %v634_v45 }
 0x158   :  { %6177 = vrcp.f32 %v628_v51 }
 0x161   :  { %v6176_v2 = vpop.eup %6175 }
 0x162   :  { %v6178_v3 = vpop.eup %6177  ;;  %v644_v6 = vmul.f32 0.0, %v6176_v2 }
 0x164   :  { %v616_v53 = vpop.f32.mrb[0].mxu1 }
 0x165   :  { %v6052_v11 = vadd.f32 %v616_v53, %v6908_v48  ;;  %v618_v58 = vpop.f32.mrb[1].mxu1 }
 0x166   :  { %v6053_v59 = vadd.f32 %v618_v58, %v6912_v52 }
 0x167   :  { %6179 = vtanh.f32 %v6052_v11 }
 0x168   :  { %v4791_v60 = vmul.f32 -1.442695, %v6053_v59  ;;  %v1159_v59 = vld [vmem:[#allocation4 + $0x80] sm:$0xff] }
 0x16a   :  { %6181 = vpow2.f32 %v4791_v60  ;;  %v1163_v60 = vld [vmem:[#allocation4 + $0xa0] sm:$0xff] }
 0x16b   :  { %v6999_v2 = vpack.c.bf16 %v1163_v60, %v1159_v59 }
 0x171   :  { %v6180_v5 = vpop.eup %6179 }
 0x172   :  { %v645_v9 = vmul.f32 %v6180_v5, %v6178_v3  ;;  %v1168_v3 = vld [vmem:[#allocation4 + $0xc8] sm:$0xff] }
 0x173   :  { %v1172_v5 = vld [vmem:[#allocation4 + $0xe8] sm:$0xff] }
 0x174   :  { %v6182_v21 = vpop.eup %6181  ;;  %v6916_v26 = vadd.f32 %v645_v9, %v644_v6  ;;  %v7003_v6 = vpack.c.bf16 %v1172_v5, %v1168_v3  ;;  %v1167_v9 = vld [vmem:[#allocation4 + $0xc0] sm:$0xff] }
 0x175   :  { %v641_v13 = vadd.f32 1.0, %v6182_v21  ;;  %v1171_v21 = vld [vmem:[#allocation4 + $0xe0] sm:$0xff] }
 0x176   :  { %6183 = vtanh.f32 %v6916_v26 }
 0x177   :  { %6185 = vrcp.f32 %v641_v13  ;;  %v1176_v13 = vld [vmem:[#allocation4 + $0x108] sm:$0xff] }
 0x180   :  { %v6184_v27 = vpop.eup %6183 }
 0x181   :  { %v6186_v28 = vpop.eup %6185 }
 0x182   :  { %v6919_v30 = vmul.f32 %v6186_v28, %v6184_v27  ;;  %v1180_v27 = vld [vmem:[#allocation4 + $0x128] sm:$0xff] }
 0x183   :  { %v7009_v28 = vpack.c.bf16 %v1180_v27, %v1176_v13 }
 0x184   :  { %786 = vmatmul.mubr.f32.vlgmr.msra.gmra.mrb[2].mxu0 %v6919_v30  ;;  %857 = vmatmul.mubr.f32.vlgmr.msra.gmra.mrb[2].mxu1 %v6919_v30 }
 0x185   :  { %5045 = vmatpush1.bf16.msra.mxu0 %v6670_v15  ;;  %5077 = vmatpush1.bf16.msra.mxu1 %v6802_v14 }
 0x186   :  { %5047 = vmatprep.subr.bf16.mxu0 %v6673_v16  ;;  %5079 = vmatprep.subr.bf16.mxu1 %v6805_v17 }
 0x187   :  { %1028 = vmatprep.mubr.f32.mxu0 %v6529_v0  ;;  %1099 = vmatprep.mubr.f32.mxu1 %v6529_v0 }
 0x189   :  { %5049 = vmatpush1.bf16.msra.mxu0 %v6683_v22  ;;  %5081 = vmatpush1.bf16.msra.mxu1 %v6814_v24 }
 0x18a   :  { %5051 = vmatprep.subr.bf16.mxu0 %v6686_v23  ;;  %5083 = vmatprep.subr.bf16.mxu1 %v6818_v25 }
 0x18d   :  { %5053 = vmatpush1.bf16.msra.mxu0 %v6697_v29  ;;  %5085 = vmatpush1.bf16.msra.mxu1 %v6826_v31 }
 0x18e   :  { %5055 = vmatprep.subr.bf16.mxu0 %v6700_v32  ;;  %5087 = vmatprep.subr.bf16.mxu1 %v6829_v33 }
 0x191   :  { %5057 = vmatpush1.bf16.msra.mxu0 %v6723_v42  ;;  %5089 = vmatpush1.bf16.msra.mxu1 %v6836_v38 }
 0x192   :  { %5059 = vmatprep.subr.bf16.mxu0 %v6726_v43  ;;  %5091 = vmatprep.subr.bf16.mxu1 %v6839_v39 }
 0x195   :  { %5061 = vmatpush1.bf16.msra.mxu0 %v6738_v49  ;;  %5093 = vmatpush1.bf16.msra.mxu1 %v6846_v46 }
 0x196   :  { %5063 = vmatprep.subr.bf16.mxu0 %v6741_v50  ;;  %5095 = vmatprep.subr.bf16.mxu1 %v6849_v47 }
 0x199   :  { %5065 = vmatpush1.bf16.msra.mxu0 %v6756_v56  ;;  %5097 = vmatpush1.bf16.msra.mxu1 %v6852_v54 }
 0x19a   :  { %5067 = vmatprep.subr.bf16.mxu0 %v6759_v57  ;;  %5099 = vmatprep.subr.bf16.mxu1 %v6855_v55 }
 0x19d   :  { %5069 = vmatpush1.bf16.msra.mxu0 %v6773_v63  ;;  %5101 = vmatpush1.bf16.msra.mxu1 %v6858_v61 }
 0x19e   :  { %5071 = vmatprep.subr.bf16.mxu0 %v6776_v1  ;;  %5103 = vmatprep.subr.bf16.mxu1 %v6861_v62 }
 0x1a1   :  { %5073 = vmatpush1.bf16.msra.mxu0 %v6789_v7  ;;  %5105 = vmatpush1.bf16.msra.mxu1 %v6864_v4 }
 0x1a2   :  { %5139 = vmatprep.subr.bf16.mxu1 %v6792_v8 }
 0x257   :  { %v787_v15 = vpop.f32.mrb[2].mxu0  ;;  %v858_v16 = vpop.f32.mrb[2].mxu1 }
 0x258   :  { %v6038_v22 = vadd.f32 %v787_v15, %v6896_v19  ;;  %v789_v23 = vpop.f32.mrb[3].mxu0  ;;  %v860_v29 = vpop.f32.mrb[3].mxu1  ;;  %v6054_v56 = vadd.f32 %v858_v16, %v6908_v48  ;;  %v1175_v15 = vld [vmem:[#allocation4 + $0x100] sm:$0xff] }
 0x259   :  { %v6039_v32 = vadd.f32 %v789_v23, %v6900_v20  ;;  %v6055_v49 = vadd.f32 %v860_v29, %v6912_v52  ;;  %v1179_v16 = vld [vmem:[#allocation4 + $0x120] sm:$0xff]  ;;  %v1184_v23 = vld [vmem:[#allocation4 + $0x148] sm:$0xff] }
 0x25a   :  { %v4792_v42 = vmul.f32 -1.442695, %v6038_v22  ;;  %v7011_v22 = vpack.c.bf16 %v1179_v16, %v1175_v15  ;;  %v1188_v29 = vld [vmem:[#allocation4 + $0x168] sm:$0xff] }
 0x25b   :  { %v4793_v43 = vmul.f32 -1.442695, %v6039_v32  ;;  %v4794_v50 = vmul.f32 -1.442695, %v6055_v49  ;;  %v1183_v32 = vld [vmem:[#allocation4 + $0x140] sm:$0xff]  ;;  %v1192_v49 = vld [vmem:[#allocation4 + $0x188] sm:$0xff] }
 0x25c   :  { %6187 = vpow2.f32 %v4792_v42  ;;  %v7015_v42 = vpack.c.bf16 %v1188_v29, %v1184_v23 }
 0x25d   :  { %6189 = vpow2.f32 %v4793_v43  ;;  %v1187_v43 = vld [vmem:[#allocation4 + $0x160] sm:$0xff] }
 0x25e   :  { %6191 = vpow2.f32 %v4794_v50  ;;  %v1196_v50 = vld [vmem:[#allocation4 + $0x1a8] sm:$0xff] }
 0x25f   :  { %6193 = vtanh.f32 %v6054_v56  ;;  %v7017_v56 = vpack.c.bf16 %v1187_v43, %v1183_v32  ;;  %v1393_v43 = vld [vmem:[#allocation4 + $0x38] sm:$0xff] }
 0x266   :  { %v6188_v57 = vpop.eup %6187 }
 0x267   :  { %v6190_v63 = vpop.eup %6189  ;;  %v870_v1 = vadd.f32 1.0, %v6188_v57  ;;  %v7019_v57 = vpack.c.bf16 %v1196_v50, %v1192_v49  ;;  %v1388_v50 = vld [vmem:[#allocation4 + $0x10] sm:$0xff] }
 0x268   :  { %v876_v7 = vadd.f32 1.0, %v6190_v63  ;;  %v6192_v8 = vpop.eup %6191  ;;  %v1191_v63 = vld [vmem:[#allocation4 + $0x180] sm:$0xff] }
 0x269   :  { %6195 = vrcp.f32 %v870_v1  ;;  %v6194_v34 = vpop.eup %6193  ;;  %v883_v44 = vadd.f32 1.0, %v6192_v8  ;;  %v1195_v1 = vld [vmem:[#allocation4 + $0x1a0] sm:$0xff]  ;;  %v1204_v8 = vld [vmem:[#allocation4 + $0x1e8] sm:$0xff] }
 0x26a   :  { %6197 = vrcp.f32 %v876_v7  ;;  %v1200_v7 = vld [vmem:[#allocation4 + $0x1c8] sm:$0xff] }
 0x26b   :  { %6199 = vrcp.f32 %v883_v44 }
 0x273   :  { %v6196_v35 = vpop.eup %6195 }
 0x274   :  { %v6198_v36 = vpop.eup %6197  ;;  %v887_v40 = vmul.f32 %v6196_v35, %v6194_v34  ;;  %v7023_v34 = vpack.c.bf16 %v1195_v1, %v1191_v63  ;;  %v7026_v35 = vpack.c.bf16 %v1204_v8, %v1200_v7  ;;  %v1392_v63 = vld [vmem:[#allocation4 + $0x30] sm:$0xff]  ;;  %v1397_v7 = vld [vmem:[#allocation4 + $0x58] sm:$0xff] }
 0x275   :  { %v886_v45 = vmul.f32 %v6198_v36, %v6916_v26  ;;  %v6200_v53 = vpop.eup %6199  ;;  %v7005_v26 = vpack.c.bf16 %v1171_v21, %v1167_v9  ;;  %v1199_v36 = vld [vmem:[#allocation4 + $0x1c0] sm:$0xff]  ;;  %v7066_v1 = vpack.c.bf16 %v1392_v63, %v1388_v50  ;;  %v1401_v8 = vld [vmem:[#allocation4 + $0x78] sm:$0xff] }
 0x276   :  { %v1441_v50 = vld [vmem:[#allocation4 + $0x1b8] sm:$0xff] }
 0x277   :  { %v6961_v51 = vadd.f32 %v887_v40, %v886_v45  ;;  %v1203_v40 = vld [vmem:[#allocation4 + $0x1e0] sm:$0xff] }
 0x278   :  { %v7029_v44 = vpack.c.bf16 %v1203_v40, %v1199_v36  ;;  %v7070_v36 = vpack.c.bf16 %v1401_v8, %v1397_v7  ;;  %v1396_v40 = vld [vmem:[#allocation4 + $0x50] sm:$0xff] }
 0x279   :  { %6201 = vtanh.f32 %v6961_v51  ;;  %v1436_v8 = vld [vmem:[#allocation4 + $0x190] sm:$0xff] }
 0x283   :  { %v6202_v11 = vpop.eup %6201 }
 0x284   :  { %v6964_v58 = vmul.f32 %v6202_v11, %v6200_v53 }
 0x286   :  { %1029 = vmatmul.mubr.f32.vlgmr.msra.gmra.mrb[4].mxu0 %v6964_v58  ;;  %1100 = vmatmul.mubr.f32.vlgmr.msra.gmra.mrb[4].mxu1 %v6964_v58 }
 0x287   :  { %5141 = vmatpush1.bf16.msra.mxu1 %v6802_v14  ;;  %1271 = vmatprep.mubr.f32.mxu0 %v6529_v0  ;;  %v1144_v14 = vld [vmem:[#allocation4 + $0x8] sm:$0xff] }
 0x288   :  { %5143 = vmatprep.subr.bf16.mxu1 %v6805_v17  ;;  %1342 = vmatprep.mubr.f32.mxu1 %v6529_v0  ;;  %v1148_v17 = vld [vmem:[#allocation4 + $0x28] sm:$0xff] }
 0x28b   :  { %5145 = vmatpush1.bf16.msra.mxu1 %v6814_v24  ;;  %v6985_v24 = vpack.c.bf16 %v1148_v17, %v1144_v14 }
 0x28c   :  { %5147 = vmatprep.subr.bf16.mxu1 %v6818_v25  ;;  %v1143_v25 = vld [vmem:[#allocation4] sm:$0xff] }
 0x28d   :  { %5107 = vmatprep.subr.bf16.mxu0 %v6985_v24 }
 0x28f   :  { %5149 = vmatpush1.bf16.msra.mxu1 %v6826_v31  ;;  %v1147_v31 = vld [vmem:[#allocation4 + $0x20] sm:$0xff] }
 0x290   :  { %5151 = vmatprep.subr.bf16.mxu1 %v6829_v33  ;;  %v6987_v33 = vpack.c.bf16 %v1147_v31, %v1143_v25 }
 0x292   :  { %5109 = vmatpush1.bf16.msra.mxu0 %v6987_v33 }
 0x293   :  { %5153 = vmatpush1.bf16.msra.mxu1 %v6836_v38  ;;  %v1152_v38 = vld [vmem:[#allocation4 + $0x48] sm:$0xff] }
 0x294   :  { %5155 = vmatprep.subr.bf16.mxu1 %v6839_v39  ;;  %v1156_v39 = vld [vmem:[#allocation4 + $0x68] sm:$0xff] }
 0x297   :  { %5157 = vmatpush1.bf16.msra.mxu1 %v6846_v46  ;;  %v6991_v46 = vpack.c.bf16 %v1156_v39, %v1152_v38 }
 0x298   :  { %5159 = vmatprep.subr.bf16.mxu1 %v6849_v47  ;;  %v1151_v47 = vld [vmem:[#allocation4 + $0x40] sm:$0xff] }
 0x299   :  { %5111 = vmatprep.subr.bf16.mxu0 %v6991_v46 }
 0x29b   :  { %5161 = vmatpush1.bf16.msra.mxu1 %v6852_v54  ;;  %v1155_v54 = vld [vmem:[#allocation4 + $0x60] sm:$0xff] }
 0x29c   :  { %5163 = vmatprep.subr.bf16.mxu1 %v6855_v55  ;;  %v6993_v55 = vpack.c.bf16 %v1155_v54, %v1151_v47 }
 0x29e   :  { %5113 = vmatpush1.bf16.msra.mxu0 %v6993_v55 }
 0x29f   :  { %5165 = vmatpush1.bf16.msra.mxu1 %v6858_v61  ;;  %v1160_v61 = vld [vmem:[#allocation4 + $0x88] sm:$0xff] }
 0x2a0   :  { %5167 = vmatprep.subr.bf16.mxu1 %v6861_v62  ;;  %v1164_v62 = vld [vmem:[#allocation4 + $0xa8] sm:$0xff] }
 0x2a3   :  { %5169 = vmatpush1.bf16.msra.mxu1 %v6864_v4  ;;  %v6997_v4 = vpack.c.bf16 %v1164_v62, %v1160_v61 }
 0x2a5   :  { %5115 = vmatprep.subr.bf16.mxu0 %v6997_v4 }
 0x2a6   :  { %5117 = vmatpush1.bf16.msra.mxu0 %v6999_v2 }
 0x2a7   :  { %5119 = vmatprep.subr.bf16.mxu0 %v7003_v6 }
 0x2aa   :  { %5121 = vmatpush1.bf16.msra.mxu0 %v7005_v26 }
 0x2ab   :  { %5123 = vmatprep.subr.bf16.mxu0 %v7009_v28 }
 0x2ae   :  { %5125 = vmatpush1.bf16.msra.mxu0 %v7011_v22 }
 0x2af   :  { %5127 = vmatprep.subr.bf16.mxu0 %v7015_v42 }
 0x2b2   :  { %5129 = vmatpush1.bf16.msra.mxu0 %v7017_v56 }
 0x2b3   :  { %5131 = vmatprep.subr.bf16.mxu0 %v7019_v57 }
 0x2b6   :  { %5133 = vmatpush1.bf16.msra.mxu0 %v7023_v34 }
 0x2b7   :  { %5135 = vmatprep.subr.bf16.mxu0 %v7026_v35 }
 0x2ba   :  { %5137 = vmatpush1.bf16.msra.mxu0 %v7029_v44 }
 0x2bb   :  { %5171 = vmatprep.subr.bf16.mxu0 %v6985_v24 }
 0x359   :  { %v1030_v45 = vpop.f32.mrb[4].mxu0  ;;  %v1101_v53 = vpop.f32.mrb[4].mxu1 }
 0x35a   :  { %v6040_v11 = vadd.f32 %v1030_v45, %v6896_v19  ;;  %v1032_v14 = vpop.f32.mrb[5].mxu0  ;;  %v1103_v17 = vpop.f32.mrb[5].mxu1  ;;  %v6056_v54 = vadd.f32 %v1101_v53, %v6908_v48  ;;  %v1400_v45 = vld [vmem:[#allocation4 + $0x70] sm:$0xff] }
 0x35b   :  { %v6041_v25 = vadd.f32 %v1032_v14, %v6900_v20  ;;  %v6057_v39 = vadd.f32 %v1103_v17, %v6912_v52  ;;  %v7072_v53 = vpack.c.bf16 %v1400_v45, %v1396_v40  ;;  %v1409_v14 = vld [vmem:[#allocation4 + $0xb8] sm:$0xff]  ;;  %v1440_v40 = vld [vmem:[#allocation4 + $0x1b0] sm:$0xff] }
 0x35c   :  { %v4795_v31 = vmul.f32 -1.442695, %v6040_v11  ;;  %v1405_v11 = vld [vmem:[#allocation4 + $0x98] sm:$0xff] }
 0x35d   :  { %v4796_v38 = vmul.f32 -1.442695, %v6041_v25  ;;  %v4797_v47 = vmul.f32 -1.442695, %v6057_v39  ;;  %v7076_v17 = vpack.c.bf16 %v1409_v14, %v1405_v11  ;;  %v1404_v25 = vld [vmem:[#allocation4 + $0x90] sm:$0xff]  ;;  %v1413_v39 = vld [vmem:[#allocation4 + $0xd8] sm:$0xff]  ;;  %v7102_v14 = vpack.c.bf16 %v1440_v40, %v1436_v8 }
 0x35e   :  { %6203 = vpow2.f32 %v4795_v31  ;;  %v1408_v31 = vld [vmem:[#allocation4 + $0xb0] sm:$0xff]  ;;  %v1445_v45 = vld [vmem:[#allocation4 + $0x1d8] sm:$0xff] }
 0x35f   :  { %6205 = vpow2.f32 %v4796_v38  ;;  %v7078_v38 = vpack.c.bf16 %v1408_v31, %v1404_v25  ;;  %v1449_v11 = vld [vmem:[#allocation4 + $0x1f8] sm:$0xff]  ;;  %v1444_v31 = vld [vmem:[#allocation4 + $0x1d0] sm:$0xff] }
 0x360   :  { %6207 = vpow2.f32 %v4797_v47  ;;  %v1417_v47 = vld [vmem:[#allocation4 + $0xf8] sm:$0xff]  ;;  %v7105_v25 = vpack.c.bf16 %v1449_v11, %v1445_v45 }
 0x361   :  { %6209 = vtanh.f32 %v6056_v54  ;;  %v7082_v54 = vpack.c.bf16 %v1417_v47, %v1413_v39  ;;  %v1448_v39 = vld [vmem:[#allocation4 + $0x1f0] sm:$0xff] }
 0x362   :  { %v7108_v47 = vpack.c.bf16 %v1448_v39, %v1444_v31 }
 0x368   :  { %v6204_v61 = vpop.eup %6203 }
 0x369   :  { %v6206_v62 = vpop.eup %6205  ;;  %v1113_v59 = vadd.f32 1.0, %v6204_v61  ;;  %v1412_v61 = vld [vmem:[#allocation4 + $0xd0] sm:$0xff] }
 0x36a   :  { %v1119_v60 = vadd.f32 1.0, %v6206_v62  ;;  %v6208_v3 = vpop.eup %6207  ;;  %v1416_v62 = vld [vmem:[#allocation4 + $0xf0] sm:$0xff] }
 0x36b   :  { %6211 = vrcp.f32 %v1113_v59  ;;  %v6210_v5 = vpop.eup %6209  ;;  %v1126_v27 = vadd.f32 1.0, %v6208_v3  ;;  %v7084_v59 = vpack.c.bf16 %v1416_v62, %v1412_v61  ;;  %v1425_v3 = vld [vmem:[#allocation4 + $0x138] sm:$0xff] }
 0x36c   :  { %6213 = vrcp.f32 %v1119_v60  ;;  %v1421_v60 = vld [vmem:[#allocation4 + $0x118] sm:$0xff] }
 0x36d   :  { %6215 = vrcp.f32 %v1126_v27  ;;  %v1429_v27 = vld [vmem:[#allocation4 + $0x158] sm:$0xff] }
 0x375   :  { %v6212_v9 = vpop.eup %6211 }
 0x376   :  { %v6214_v21 = vpop.eup %6213  ;;  %v1130_v13 = vmul.f32 %v6212_v9, %v6210_v5  ;;  %v7088_v5 = vpack.c.bf16 %v1425_v3, %v1421_v60  ;;  %v1420_v9 = vld [vmem:[#allocation4 + $0x110] sm:$0xff] }
 0x377   :  { %v1129_v15 = vmul.f32 %v6214_v21, %v6961_v51  ;;  %v6216_v23 = vpop.eup %6215  ;;  %v1389_v51 = vld [vmem:[#allocation4 + $0x18] sm:$0xff]  ;;  %v1424_v21 = vld [vmem:[#allocation4 + $0x130] sm:$0xff] }
 0x378   :  { %v7064_v49 = vpack.c.bf16 %v1393_v43, %v1389_v51  ;;  %v1432_v51 = vld [vmem:[#allocation4 + $0x170] sm:$0xff]  ;;  %v1437_v43 = vld [vmem:[#allocation4 + $0x198] sm:$0xff] }
 0x379   :  { %v7039_v16 = vadd.f32 %v1130_v13, %v1129_v15  ;;  %v7090_v13 = vpack.c.bf16 %v1424_v21, %v1420_v9  ;;  %v1433_v15 = vld [vmem:[#allocation4 + $0x178] sm:$0xff]  ;;  %v7098_v7 = vpack.c.bf16 %v1441_v50, %v1437_v43 }
 0x37a   :  { %5203 = vmatprep.subr.bf16.mxu1 %v7064_v49 }
 0x37b   :  { %6217 = vtanh.f32 %v7039_v16 }
 0x385   :  { %v6218_v29 = vpop.eup %6217 }
 0x386   :  { %v7042_v32 = vmul.f32 %v6218_v29, %v6216_v23  ;;  %v1428_v23 = vld [vmem:[#allocation4 + $0x150] sm:$0xff]  ;;  %v7094_v29 = vpack.c.bf16 %v1433_v15, %v1429_v27 }
 0x387   :  { %v7096_v63 = vpack.c.bf16 %v1432_v51, %v1428_v23 }
 0x388   :  { %1272 = vmatmul.mubr.f32.vlgmr.msra.gmra.mrb[6].mxu0 %v7042_v32  ;;  %1343 = vmatmul.mubr.f32.vlgmr.msra.gmra.mrb[6].mxu1 %v7042_v32 }
 0x389   :  { %5173 = vmatpush1.bf16.msra.mxu0 %v6987_v33  ;;  %1514 = vmatprep.mubr.f32.mxu0 %v6529_v0 }
 0x38a   :  { %5175 = vmatprep.subr.bf16.mxu0 %v6991_v46  ;;  %1585 = vmatprep.mubr.f32.mxu1 %v6529_v0 }
 0x38b   :  { %5205 = vmatpush1.bf16.msra.mxu1 %v7066_v1 }
 0x38c   :  { %5207 = vmatprep.subr.bf16.mxu1 %v7070_v36 }
 0x38d   :  { %5177 = vmatpush1.bf16.msra.mxu0 %v6993_v55 }
 0x38e   :  { %5179 = vmatprep.subr.bf16.mxu0 %v6997_v4 }
 0x38f   :  { %5209 = vmatpush1.bf16.msra.mxu1 %v7072_v53 }
 0x390   :  { %5211 = vmatprep.subr.bf16.mxu1 %v7076_v17 }
 0x391   :  { %5181 = vmatpush1.bf16.msra.mxu0 %v6999_v2 }
 0x392   :  { %5183 = vmatprep.subr.bf16.mxu0 %v7003_v6 }
 0x393   :  { %5213 = vmatpush1.bf16.msra.mxu1 %v7078_v38 }
 0x394   :  { %5215 = vmatprep.subr.bf16.mxu1 %v7082_v54 }
 0x395   :  { %5185 = vmatpush1.bf16.msra.mxu0 %v7005_v26 }
 0x396   :  { %5187 = vmatprep.subr.bf16.mxu0 %v7009_v28 }
 0x397   :  { %5217 = vmatpush1.bf16.msra.mxu1 %v7084_v59 }
 0x398   :  { %5219 = vmatprep.subr.bf16.mxu1 %v7088_v5 }
 0x399   :  { %5189 = vmatpush1.bf16.msra.mxu0 %v7011_v22 }
 0x39a   :  { %5191 = vmatprep.subr.bf16.mxu0 %v7015_v42 }
 0x39b   :  { %5221 = vmatpush1.bf16.msra.mxu1 %v7090_v13 }
 0x39c   :  { %5223 = vmatprep.subr.bf16.mxu1 %v7094_v29 }
 0x39d   :  { %5193 = vmatpush1.bf16.msra.mxu0 %v7017_v56 }
 0x39e   :  { %5195 = vmatprep.subr.bf16.mxu0 %v7019_v57 }
 0x39f   :  { %5225 = vmatpush1.bf16.msra.mxu1 %v7096_v63 }
 0x3a0   :  { %5227 = vmatprep.subr.bf16.mxu1 %v7098_v7 }
 0x3a1   :  { %5197 = vmatpush1.bf16.msra.mxu0 %v7023_v34 }
 0x3a2   :  { %5199 = vmatprep.subr.bf16.mxu0 %v7026_v35 }
 0x3a3   :  { %5229 = vmatpush1.bf16.msra.mxu1 %v7102_v14 }
 0x3a4   :  { %5231 = vmatprep.subr.bf16.mxu1 %v7105_v25 }
 0x3a5   :  { %5201 = vmatpush1.bf16.msra.mxu0 %v7029_v44 }
 0x3a6   :  { %5235 = vmatprep.subr.bf16.mxu0 %v6985_v24 }
 0x3a7   :  { %5233 = vmatpush1.bf16.msra.mxu1 %v7108_v47 }
 0x3a8   :  { %5267 = vmatprep.subr.bf16.mxu1 %v7064_v49 }
 0x45b   :  { %v1273_v61 = vpop.f32.mrb[6].mxu0  ;;  %v1344_v62 = vpop.f32.mrb[6].mxu1 }
 0x45c   :  { %v6042_v60 = vadd.f32 %v1273_v61, %v6896_v19  ;;  %v1275_v3 = vpop.f32.mrb[7].mxu0  ;;  %v1346_v9 = vpop.f32.mrb[7].mxu1  ;;  %v6058_v43 = vadd.f32 %v1344_v62, %v6908_v48 }
 0x45d   :  { %v6043_v21 = vadd.f32 %v1275_v3, %v6900_v20  ;;  %v6059_v23 = vadd.f32 %v1346_v9, %v6912_v52 }
 0x45e   :  { %v4798_v27 = vmul.f32 -1.442695, %v6042_v60 }
 0x45f   :  { %v4799_v15 = vmul.f32 -1.442695, %v6043_v21  ;;  %v4800_v51 = vmul.f32 -1.442695, %v6059_v23 }
 0x460   :  { %6219 = vpow2.f32 %v4798_v27 }
 0x461   :  { %6221 = vpow2.f32 %v4799_v15 }
 0x462   :  { %6223 = vpow2.f32 %v4800_v51 }
 0x463   :  { %6225 = vtanh.f32 %v6058_v43 }
 0x46a   :  { %v6220_v50 = vpop.eup %6219 }
 0x46b   :  { %v6222_v8 = vpop.eup %6221  ;;  %v1356_v40 = vadd.f32 1.0, %v6220_v50 }
 0x46c   :  { %v1362_v45 = vadd.f32 1.0, %v6222_v8  ;;  %v6224_v11 = vpop.eup %6223 }
 0x46d   :  { %6227 = vrcp.f32 %v1356_v40  ;;  %v6226_v31 = vpop.eup %6225  ;;  %v1369_v3 = vadd.f32 1.0, %v6224_v11 }
 0x46e   :  { %6229 = vrcp.f32 %v1362_v45 }
 0x46f   :  { %6231 = vrcp.f32 %v1369_v3 }
 0x477   :  { %v6228_v39 = vpop.eup %6227 }
 0x478   :  { %v6230_v61 = vpop.eup %6229  ;;  %v1373_v60 = vmul.f32 %v6228_v39, %v6226_v31 }
 0x479   :  { %v1372_v21 = vmul.f32 %v6230_v61, %v7039_v16  ;;  %v6232_v62 = vpop.eup %6231 }
 0x47b   :  { %v7118_v9 = vadd.f32 %v1373_v60, %v1372_v21 }
 0x47d   :  { %6233 = vtanh.f32 %v7118_v9 }
 0x487   :  { %v6234_v27 = vpop.eup %6233 }
 0x488   :  { %v7121_v15 = vmul.f32 %v6234_v27, %v6232_v62 }
 0x48a   :  { %1515 = vmatmul.mubr.f32.vlgmr.msra.gmra.mrb[8].mxu0 %v7121_v15  ;;  %1586 = vmatmul.mubr.f32.vlgmr.msra.gmra.mrb[8].mxu1 %v7121_v15 }
 0x48b   :  { %5237 = vmatpush1.bf16.msra.mxu0 %v6987_v33  ;;  %5269 = vmatpush1.bf16.msra.mxu1 %v7066_v1 }
 0x48c   :  { %5239 = vmatprep.subr.bf16.mxu0 %v6991_v46  ;;  %5271 = vmatprep.subr.bf16.mxu1 %v7070_v36 }
 0x48d   :  { %1757 = vmatprep.mubr.f32.mxu0 %v6529_v0  ;;  %1828 = vmatprep.mubr.f32.mxu1 %v6529_v0 }
 0x48f   :  { %5241 = vmatpush1.bf16.msra.mxu0 %v6993_v55  ;;  %5273 = vmatpush1.bf16.msra.mxu1 %v7072_v53 }
 0x490   :  { %5243 = vmatprep.subr.bf16.mxu0 %v6997_v4  ;;  %5275 = vmatprep.subr.bf16.mxu1 %v7076_v17 }
 0x493   :  { %5245 = vmatpush1.bf16.msra.mxu0 %v6999_v2  ;;  %5277 = vmatpush1.bf16.msra.mxu1 %v7078_v38 }
 0x494   :  { %5247 = vmatprep.subr.bf16.mxu0 %v7003_v6  ;;  %5279 = vmatprep.subr.bf16.mxu1 %v7082_v54 }
 0x497   :  { %5249 = vmatpush1.bf16.msra.mxu0 %v7005_v26  ;;  %5281 = vmatpush1.bf16.msra.mxu1 %v7084_v59 }
 0x498   :  { %5251 = vmatprep.subr.bf16.mxu0 %v7009_v28  ;;  %5283 = vmatprep.subr.bf16.mxu1 %v7088_v5 }
 0x49b   :  { %5253 = vmatpush1.bf16.msra.mxu0 %v7011_v22  ;;  %5285 = vmatpush1.bf16.msra.mxu1 %v7090_v13 }
 0x49c   :  { %5255 = vmatprep.subr.bf16.mxu0 %v7015_v42  ;;  %5287 = vmatprep.subr.bf16.mxu1 %v7094_v29 }
 0x49f   :  { %5257 = vmatpush1.bf16.msra.mxu0 %v7017_v56  ;;  %5289 = vmatpush1.bf16.msra.mxu1 %v7096_v63 }
 0x4a0   :  { %5259 = vmatprep.subr.bf16.mxu0 %v7019_v57  ;;  %5291 = vmatprep.subr.bf16.mxu1 %v7098_v7 }
 0x4a3   :  { %5261 = vmatpush1.bf16.msra.mxu0 %v7023_v34  ;;  %5293 = vmatpush1.bf16.msra.mxu1 %v7102_v14 }
 0x4a4   :  { %5263 = vmatprep.subr.bf16.mxu0 %v7026_v35  ;;  %5295 = vmatprep.subr.bf16.mxu1 %v7105_v25 }
 0x4a7   :  { %5265 = vmatpush1.bf16.msra.mxu0 %v7029_v44  ;;  %5297 = vmatpush1.bf16.msra.mxu1 %v7108_v47 }
 0x4a8   :  { %5299 = vmatprep.subr.bf16.mxu0 %v6985_v24  ;;  %5331 = vmatprep.subr.bf16.mxu1 %v7064_v49 }
 0x55d   :  { %v1516_v16 = vpop.f32.mrb[8].mxu0  ;;  %v1587_v23 = vpop.f32.mrb[8].mxu1 }
 0x55e   :  { %v6044_v51 = vadd.f32 %v1516_v16, %v6896_v19  ;;  %v1518_v43 = vpop.f32.mrb[9].mxu0  ;;  %v1589_v50 = vpop.f32.mrb[9].mxu1  ;;  %v6060_v39 = vadd.f32 %v1587_v23, %v6908_v48 }
 0x55f   :  { %v6045_v8 = vadd.f32 %v1518_v43, %v6900_v20  ;;  %v6061_v11 = vadd.f32 %v1589_v50, %v6912_v52 }
 0x560   :  { %v4801_v40 = vmul.f32 -1.442695, %v6044_v51 }
 0x561   :  { %v4802_v45 = vmul.f32 -1.442695, %v6045_v8  ;;  %v4803_v31 = vmul.f32 -1.442695, %v6061_v11 }
 0x562   :  { %6235 = vpow2.f32 %v4801_v40 }
 0x563   :  { %6237 = vpow2.f32 %v4802_v45 }
 0x564   :  { %6239 = vpow2.f32 %v4803_v31 }
 0x565   :  { %6241 = vtanh.f32 %v6060_v39 }
 0x56c   :  { %v6236_v24 = vpop.eup %6235 }
 0x56d   :  { %v6238_v61 = vpop.eup %6237  ;;  %v1599_v60 = vadd.f32 1.0, %v6236_v24 }
 0x56e   :  { %v1605_v3 = vadd.f32 1.0, %v6238_v61  ;;  %v6240_v21 = vpop.eup %6239 }
 0x56f   :  { %6243 = vrcp.f32 %v1599_v60  ;;  %v6242_v62 = vpop.eup %6241  ;;  %v1612_v43 = vadd.f32 1.0, %v6240_v21 }
 0x570   :  { %6245 = vrcp.f32 %v1605_v3 }
 0x571   :  { %6247 = vrcp.f32 %v1612_v43  ;;  %v2140_v43 = vld [vmem:[#allocation4 + $0xc8] sm:$0xff] }
 0x579   :  { %v6244_v27 = vpop.eup %6243 }
 0x57a   :  { %v6246_v16 = vpop.eup %6245  ;;  %v1616_v51 = vmul.f32 %v6244_v27, %v6242_v62 }
 0x57b   :  { %v1615_v8 = vmul.f32 %v6246_v16, %v7118_v9  ;;  %v6248_v23 = vpop.eup %6247  ;;  %v2135_v16 = vld [vmem:[#allocation4 + $0xa0] sm:$0xff] }
 0x57d   :  { %v7164_v50 = vadd.f32 %v1616_v51, %v1615_v8  ;;  %v2144_v8 = vld [vmem:[#allocation4 + $0xe8] sm:$0xff] }
 0x57f   :  { %6249 = vtanh.f32 %v7164_v50 }
 0x589   :  { %v6250_v40 = vpop.eup %6249 }
 0x58a   :  { %v7167_v45 = vmul.f32 %v6250_v40, %v6248_v23  ;;  %v2139_v23 = vld [vmem:[#allocation4 + $0xc0] sm:$0xff] }
 0x58b   :  { %v2143_v40 = vld [vmem:[#allocation4 + $0xe0] sm:$0xff] }
 0x58c   :  { %1758 = vmatmul.mubr.f32.vlgmr.msra.gmra.mrb[10].mxu0 %v7167_v45  ;;  %1829 = vmatmul.mubr.f32.vlgmr.msra.gmra.mrb[10].mxu1 %v7167_v45 }
 0x58d   :  { %5301 = vmatpush1.bf16.msra.mxu0 %v6987_v33  ;;  %5333 = vmatpush1.bf16.msra.mxu1 %v7066_v1 }
 0x58e   :  { %5303 = vmatprep.subr.bf16.mxu0 %v6991_v46  ;;  %5335 = vmatprep.subr.bf16.mxu1 %v7070_v36 }
 0x58f   :  { %2000 = vmatprep.mubr.f32.mxu0 %v6529_v0  ;;  %2071 = vmatprep.mubr.f32.mxu1 %v6529_v0 }
 0x591   :  { %5305 = vmatpush1.bf16.msra.mxu0 %v6993_v55  ;;  %5337 = vmatpush1.bf16.msra.mxu1 %v7072_v53 }
 0x592   :  { %5307 = vmatprep.subr.bf16.mxu0 %v6997_v4  ;;  %5339 = vmatprep.subr.bf16.mxu1 %v7076_v17 }
 0x595   :  { %5309 = vmatpush1.bf16.msra.mxu0 %v6999_v2  ;;  %5341 = vmatpush1.bf16.msra.mxu1 %v7078_v38 }
 0x596   :  { %5311 = vmatprep.subr.bf16.mxu0 %v7003_v6  ;;  %5343 = vmatprep.subr.bf16.mxu1 %v7082_v54 }
 0x599   :  { %5313 = vmatpush1.bf16.msra.mxu0 %v7005_v26  ;;  %5345 = vmatpush1.bf16.msra.mxu1 %v7084_v59 }
 0x59a   :  { %5315 = vmatprep.subr.bf16.mxu0 %v7009_v28  ;;  %5347 = vmatprep.subr.bf16.mxu1 %v7088_v5 }
 0x59d   :  { %5317 = vmatpush1.bf16.msra.mxu0 %v7011_v22  ;;  %5349 = vmatpush1.bf16.msra.mxu1 %v7090_v13 }
 0x59e   :  { %5319 = vmatprep.subr.bf16.mxu0 %v7015_v42  ;;  %5351 = vmatprep.subr.bf16.mxu1 %v7094_v29 }
 0x5a1   :  { %5321 = vmatpush1.bf16.msra.mxu0 %v7017_v56  ;;  %5353 = vmatpush1.bf16.msra.mxu1 %v7096_v63 }
 0x5a2   :  { %5323 = vmatprep.subr.bf16.mxu0 %v7019_v57  ;;  %5355 = vmatprep.subr.bf16.mxu1 %v7098_v7 }
 0x5a5   :  { %5325 = vmatpush1.bf16.msra.mxu0 %v7023_v34  ;;  %5357 = vmatpush1.bf16.msra.mxu1 %v7102_v14 }
 0x5a6   :  { %5327 = vmatprep.subr.bf16.mxu0 %v7026_v35  ;;  %5359 = vmatprep.subr.bf16.mxu1 %v7105_v25 }
 0x5a9   :  { %5329 = vmatpush1.bf16.msra.mxu0 %v7029_v44  ;;  %5361 = vmatpush1.bf16.msra.mxu1 %v7108_v47 }
 0x5aa   :  { %5395 = vmatprep.subr.bf16.mxu1 %v7064_v49 }
 0x65f   :  { %v1759_v33 = vpop.f32.mrb[10].mxu0  ;;  %v1830_v46 = vpop.f32.mrb[10].mxu1 }
 0x660   :  { %v6046_v55 = vadd.f32 %v1759_v33, %v6896_v19  ;;  %v1761_v4 = vpop.f32.mrb[11].mxu0  ;;  %v1832_v2 = vpop.f32.mrb[11].mxu1  ;;  %v6062_v56 = vadd.f32 %v1830_v46, %v6908_v48  ;;  %v5376_v33 = vpack.c.bf16 %v2143_v40, %v2139_v23  ;;  %v2148_v46 = vld [vmem:[#allocation4 + $0x108] sm:$0xff] }
 0x661   :  { %v6047_v6 = vadd.f32 %v1761_v4, %v6900_v20  ;;  %v6063_v22 = vadd.f32 %v1832_v2, %v6912_v52  ;;  %v2147_v2 = vld [vmem:[#allocation4 + $0x100] sm:$0xff] }
 0x662   :  { %v4804_v26 = vmul.f32 -1.442695, %v6046_v55  ;;  %v2152_v55 = vld [vmem:[#allocation4 + $0x128] sm:$0xff] }
 0x663   :  { %v4805_v28 = vmul.f32 -1.442695, %v6047_v6  ;;  %v4806_v42 = vmul.f32 -1.442695, %v6063_v22  ;;  %v5378_v4 = vpack.c.bf16 %v2152_v55, %v2148_v46  ;;  %v2151_v6 = vld [vmem:[#allocation4 + $0x120] sm:$0xff]  ;;  %v2160_v22 = vld [vmem:[#allocation4 + $0x168] sm:$0xff] }
 0x664   :  { %6251 = vpow2.f32 %v4804_v26  ;;  %v5380_v26 = vpack.c.bf16 %v2151_v6, %v2147_v2 }
 0x665   :  { %6253 = vpow2.f32 %v4805_v28  ;;  %v2156_v28 = vld [vmem:[#allocation4 + $0x148] sm:$0xff] }
 0x666   :  { %6255 = vpow2.f32 %v4806_v42  ;;  %v2155_v42 = vld [vmem:[#allocation4 + $0x140] sm:$0xff] }
 0x667   :  { %6257 = vtanh.f32 %v6062_v56  ;;  %v5382_v56 = vpack.c.bf16 %v2160_v22, %v2156_v28  ;;  %v2359_v28 = vld [vmem:[#allocation6] sm:$0xff] }
 0x668   :  { %v2363_v22 = vld [vmem:[#allocation6 + $0x20] sm:$0xff] }
 0x66e   :  { %v6252_v57 = vpop.eup %6251 }
 0x66f   :  { %v6254_v34 = vpop.eup %6253  ;;  %v1842_v35 = vadd.f32 1.0, %v6252_v57  ;;  %v2159_v57 = vld [vmem:[#allocation4 + $0x160] sm:$0xff] }
 0x670   :  { %v1848_v44 = vadd.f32 1.0, %v6254_v34  ;;  %v6256_v49 = vpop.eup %6255  ;;  %v2164_v34 = vld [vmem:[#allocation4 + $0x188] sm:$0xff] }
 0x671   :  { %6259 = vrcp.f32 %v1842_v35  ;;  %v6258_v9 = vpop.eup %6257  ;;  %v1855_v24 = vadd.f32 1.0, %v6256_v49  ;;  %v2168_v35 = vld [vmem:[#allocation4 + $0x1a8] sm:$0xff] }
 0x672   :  { %6261 = vrcp.f32 %v1848_v44  ;;  %v5384_v44 = vpack.c.bf16 %v2159_v57, %v2155_v42  ;;  %v5386_v49 = vpack.c.bf16 %v2168_v35, %v2164_v34  ;;  %v2361_v42 = vld [vmem:[#allocation6 + $0x10] sm:$0xff]  ;;  %v2368_v57 = vld [vmem:[#allocation6 + $0x48] sm:$0xff]  ;;  %v2370_v35 = vld [vmem:[#allocation6 + $0x58] sm:$0xff] }
 0x673   :  { %6263 = vrcp.f32 %v1855_v24  ;;  %v2372_v34 = vld [vmem:[#allocation6 + $0x68] sm:$0xff] }
 0x67b   :  { %v6260_v11 = vpop.eup %6259 }
 0x67c   :  { %v6262_v31 = vpop.eup %6261  ;;  %v1859_v39 = vmul.f32 %v6260_v11, %v6258_v9  ;;  %v2163_v9 = vld [vmem:[#allocation4 + $0x180] sm:$0xff] }
 0x67d   :  { %v1858_v61 = vmul.f32 %v6262_v31, %v7164_v50  ;;  %v6264_v3 = vpop.eup %6263  ;;  %v5374_v50 = vpack.c.bf16 %v2144_v8, %v2140_v43  ;;  %v2167_v11 = vld [vmem:[#allocation4 + $0x1a0] sm:$0xff]  ;;  %v2172_v31 = vld [vmem:[#allocation4 + $0x1c8] sm:$0xff] }
 0x67e   :  { %v5388_v24 = vpack.c.bf16 %v2167_v11, %v2163_v9  ;;  %v5428_v11 = vpack.c.bf16 %v2363_v22, %v2359_v28 }
 0x67f   :  { %v7209_v60 = vadd.f32 %v1859_v39, %v1858_v61  ;;  %v2176_v39 = vld [vmem:[#allocation4 + $0x1e8] sm:$0xff]  ;;  %v2362_v61 = vld [vmem:[#allocation6 + $0x18] sm:$0xff] }
 0x681   :  { %6265 = vtanh.f32 %v7209_v60 }
 0x68b   :  { %v6266_v21 = vpop.eup %6265 }
 0x68c   :  { %v7212_v62 = vmul.f32 %v6266_v21, %v6264_v3  ;;  %v5390_v3 = vpack.c.bf16 %v2176_v39, %v2172_v31  ;;  %v2171_v21 = vld [vmem:[#allocation4 + $0x1c0] sm:$0xff] }
 0x68d   :  { %v2367_v39 = vld [vmem:[#allocation6 + $0x40] sm:$0xff] }
 0x68e   :  { %2001 = vmatmul.mubr.f32.vlgmr.msra.gmra.mrb[12].mxu0 %v7212_v62  ;;  %2072 = vmatmul.mubr.f32.vlgmr.msra.gmra.mrb[12].mxu1 %v7212_v62 }
 0x68f   :  { %5397 = vmatpush1.bf16.msra.mxu1 %v7066_v1  ;;  %2243 = vmatprep.mubr.f32.mxu0 %v6529_v0  ;;  %v2116_v1 = vld [vmem:[#allocation4 + $0x8] sm:$0xff] }
 0x690   :  { %5399 = vmatprep.subr.bf16.mxu1 %v7070_v36  ;;  %2314 = vmatprep.mubr.f32.mxu1 %v6529_v0  ;;  %v2120_v36 = vld [vmem:[#allocation4 + $0x28] sm:$0xff] }
 0x693   :  { %5401 = vmatpush1.bf16.msra.mxu1 %v7072_v53  ;;  %v5362_v53 = vpack.c.bf16 %v2120_v36, %v2116_v1  ;;  %v2175_v1 = vld [vmem:[#allocation4 + $0x1e0] sm:$0xff]  ;;  %v2366_v36 = vld [vmem:[#allocation6 + $0x38] sm:$0xff] }
 0x694   :  { %5403 = vmatprep.subr.bf16.mxu1 %v7076_v17  ;;  %v2115_v17 = vld [vmem:[#allocation4] sm:$0xff] }
 0x695   :  { %5363 = vmatprep.subr.bf16.mxu0 %v5362_v53  ;;  %v2360_v53 = vld [vmem:[#allocation6 + $0x8] sm:$0xff] }
 0x697   :  { %5405 = vmatpush1.bf16.msra.mxu1 %v7078_v38  ;;  %v2119_v38 = vld [vmem:[#allocation4 + $0x20] sm:$0xff] }
 0x698   :  { %5407 = vmatprep.subr.bf16.mxu1 %v7082_v54  ;;  %v5364_v54 = vpack.c.bf16 %v2119_v38, %v2115_v17  ;;  %v2364_v17 = vld [vmem:[#allocation6 + $0x28] sm:$0xff]  ;;  %v5458_v38 = vpack.c.bf16 %v2366_v36, %v2362_v61  ;;  %v5430_v61 = vpack.c.bf16 %v2372_v34, %v2368_v57 }
 0x699   :  { %v2376_v36 = vld [vmem:[#allocation6 + $0x88] sm:$0xff] }
 0x69a   :  { %5365 = vmatpush1.bf16.msra.mxu0 %v5364_v54  ;;  %v5392_v54 = vpack.c.bf16 %v2175_v1, %v2171_v21  ;;  %v2369_v21 = vld [vmem:[#allocation6 + $0x50] sm:$0xff] }
 0x69b   :  { %5409 = vmatpush1.bf16.msra.mxu1 %v7084_v59  ;;  %v2124_v59 = vld [vmem:[#allocation4 + $0x48] sm:$0xff]  ;;  %v2373_v1 = vld [vmem:[#allocation6 + $0x70] sm:$0xff] }
 0x69c   :  { %5411 = vmatprep.subr.bf16.mxu1 %v7088_v5  ;;  %v2128_v5 = vld [vmem:[#allocation4 + $0x68] sm:$0xff] }
 0x69f   :  { %5413 = vmatpush1.bf16.msra.mxu1 %v7090_v13  ;;  %v5366_v13 = vpack.c.bf16 %v2128_v5, %v2124_v59  ;;  %v5426_v59 = vpack.c.bf16 %v2364_v17, %v2360_v53  ;;  %v2380_v53 = vld [vmem:[#allocation6 + $0xa8] sm:$0xff]  ;;  %v2378_v17 = vld [vmem:[#allocation6 + $0x98] sm:$0xff] }
 0x6a0   :  { %5415 = vmatprep.subr.bf16.mxu1 %v7094_v29  ;;  %v2123_v29 = vld [vmem:[#allocation4 + $0x40] sm:$0xff] }
 0x6a1   :  { %5367 = vmatprep.subr.bf16.mxu0 %v5366_v13 }
 0x6a3   :  { %5417 = vmatpush1.bf16.msra.mxu1 %v7096_v63  ;;  %v2127_v63 = vld [vmem:[#allocation4 + $0x60] sm:$0xff] }
 0x6a4   :  { %5419 = vmatprep.subr.bf16.mxu1 %v7098_v7  ;;  %v5368_v7 = vpack.c.bf16 %v2127_v63, %v2123_v29 }
 0x6a6   :  { %5369 = vmatpush1.bf16.msra.mxu0 %v5368_v7 }
 0x6a7   :  { %5421 = vmatpush1.bf16.msra.mxu1 %v7102_v14  ;;  %v2132_v14 = vld [vmem:[#allocation4 + $0x88] sm:$0xff] }
 0x6a8   :  { %5423 = vmatprep.subr.bf16.mxu1 %v7105_v25  ;;  %v2136_v25 = vld [vmem:[#allocation4 + $0xa8] sm:$0xff] }
 0x6a9   :  { %v5370_v27 = vpack.c.bf16 %v2136_v25, %v2132_v14 }
 0x6ab   :  { %5425 = vmatpush1.bf16.msra.mxu1 %v7108_v47  ;;  %v2131_v47 = vld [vmem:[#allocation4 + $0x80] sm:$0xff]  ;;  %5371 = vmatprep.subr.bf16.mxu0 %v5370_v27 }
 0x6ac   :  { %v5372_v51 = vpack.c.bf16 %v2135_v16, %v2131_v47  ;;  %5459 = vmatprep.subr.bf16.mxu1 %v5458_v38  ;;  %v2382_v38 = vld [vmem:[#allocation6 + $0xb8] sm:$0xff] }
 0x6ae   :  { %5373 = vmatpush1.bf16.msra.mxu0 %v5372_v51 }
 0x6af   :  { %5375 = vmatprep.subr.bf16.mxu0 %v5374_v50 }
 0x6b2   :  { %5377 = vmatpush1.bf16.msra.mxu0 %v5376_v33 }
 0x6b3   :  { %5379 = vmatprep.subr.bf16.mxu0 %v5378_v4 }
 0x6b6   :  { %5381 = vmatpush1.bf16.msra.mxu0 %v5380_v26 }
 0x6b7   :  { %5383 = vmatprep.subr.bf16.mxu0 %v5382_v56  ;;  %v2365_v56 = vld [vmem:[#allocation6 + $0x30] sm:$0xff] }
 0x6b8   :  { %v5460_v31 = vpack.c.bf16 %v2365_v56, %v2361_v42  ;;  %v2391_v42 = vld [vmem:[#allocation6 + $0x100] sm:$0xff] }
 0x6b9   :  { %v2395_v56 = vld [vmem:[#allocation6 + $0x120] sm:$0xff] }
 0x6ba   :  { %5385 = vmatpush1.bf16.msra.mxu0 %v5384_v44  ;;  %v2374_v44 = vld [vmem:[#allocation6 + $0x78] sm:$0xff] }
 0x6bb   :  { %5387 = vmatprep.subr.bf16.mxu0 %v5386_v49 }
 0x6be   :  { %5389 = vmatpush1.bf16.msra.mxu0 %v5388_v24  ;;  %v2371_v24 = vld [vmem:[#allocation6 + $0x60] sm:$0xff] }
 0x6bf   :  { %5391 = vmatprep.subr.bf16.mxu0 %v5390_v3  ;;  %v5462_v3 = vpack.c.bf16 %v2374_v44, %v2370_v35  ;;  %v2393_v35 = vld [vmem:[#allocation6 + $0x110] sm:$0xff] }
 0x6c0   :  { %v2397_v44 = vld [vmem:[#allocation6 + $0x130] sm:$0xff] }
 0x6c2   :  { %5393 = vmatpush1.bf16.msra.mxu0 %v5392_v54  ;;  %v5432_v54 = vpack.c.bf16 %v2371_v24, %v2367_v39  ;;  %v5444_v39 = vpack.c.bf16 %v2395_v56, %v2391_v42  ;;  %v5476_v24 = vpack.c.bf16 %v2397_v44, %v2393_v35  ;;  %v2709_v56 = vld [vmem:[#allocation8 + $0x10] sm:$0xff]  ;;  %v2720_v35 = vld [vmem:[#allocation8 + $0x68] sm:$0xff]  ;;  %v2718_v44 = vld [vmem:[#allocation8 + $0x58] sm:$0xff] }
 0x6c3   :  { %5427 = vmatprep.subr.bf16.mxu0 %v5426_v59  ;;  %v5464_v59 = vpack.c.bf16 %v2373_v1, %v2369_v21 }
 0x761   :  { %v2002_v5 = vpop.f32.mrb[12].mxu0  ;;  %v2073_v13 = vpop.f32.mrb[12].mxu1 }
 0x762   :  { %v6048_v29 = vadd.f32 %v2002_v5, %v6896_v19  ;;  %v2004_v63 = vpop.f32.mrb[13].mxu0  ;;  %v2075_v7 = vpop.f32.mrb[13].mxu1  ;;  %v6064_v51 = vadd.f32 %v2073_v13, %v6908_v48  ;;  %v2375_v5 = vld [vmem:[#allocation6 + $0x80] sm:$0xff] }
 0x763   :  { %v6049_v14 = vadd.f32 %v2004_v63, %v6900_v20  ;;  %v6065_v47 = vadd.f32 %v2075_v7, %v6912_v52  ;;  %v2379_v13 = vld [vmem:[#allocation6 + $0xa0] sm:$0xff]  ;;  %v5466_v63 = vpack.c.bf16 %v2382_v38, %v2378_v17  ;;  %v2377_v7 = vld [vmem:[#allocation6 + $0x90] sm:$0xff]  ;;  %v2408_v17 = vld [vmem:[#allocation6 + $0x188] sm:$0xff] }
 0x764   :  { %v4807_v25 = vmul.f32 -1.442695, %v6048_v29  ;;  %v5434_v29 = vpack.c.bf16 %v2380_v53, %v2376_v36  ;;  %v2401_v36 = vld [vmem:[#allocation6 + $0x150] sm:$0xff]  ;;  %v2412_v38 = vld [vmem:[#allocation6 + $0x1a8] sm:$0xff] }
 0x765   :  { %v4808_v27 = vmul.f32 -1.442695, %v6049_v14  ;;  %v4809_v16 = vmul.f32 -1.442695, %v6065_v47  ;;  %v2381_v14 = vld [vmem:[#allocation6 + $0xb0] sm:$0xff]  ;;  %v2386_v47 = vld [vmem:[#allocation6 + $0xd8] sm:$0xff] }
 0x766   :  { %6267 = vpow2.f32 %v4807_v25  ;;  %v2384_v25 = vld [vmem:[#allocation6 + $0xc8] sm:$0xff]  ;;  %v2405_v53 = vld [vmem:[#allocation6 + $0x170] sm:$0xff] }
 0x767   :  { %6269 = vpow2.f32 %v4808_v27  ;;  %v2388_v27 = vld [vmem:[#allocation6 + $0xe8] sm:$0xff] }
 0x768   :  { %6271 = vpow2.f32 %v4809_v16  ;;  %v2390_v16 = vld [vmem:[#allocation6 + $0xf8] sm:$0xff] }
 0x769   :  { %6273 = vtanh.f32 %v6064_v51  ;;  %v5436_v51 = vpack.c.bf16 %v2379_v13, %v2375_v5  ;;  %v5480_v13 = vpack.c.bf16 %v2405_v53, %v2401_v36  ;;  %v2728_v36 = vld [vmem:[#allocation8 + $0xa8] sm:$0xff]  ;;  %v2726_v53 = vld [vmem:[#allocation8 + $0x98] sm:$0xff] }
 0x770   :  { %v6268_v43 = vpop.eup %6267 }
 0x771   :  { %v6270_v8 = vpop.eup %6269  ;;  %v2085_v50 = vadd.f32 1.0, %v6268_v43  ;;  %v5468_v43 = vpack.c.bf16 %v2381_v14, %v2377_v7  ;;  %v5450_v7 = vpack.c.bf16 %v2412_v38, %v2408_v17  ;;  %v2723_v38 = vld [vmem:[#allocation8 + $0x80] sm:$0xff] }
 0x772   :  { %v2091_v23 = vadd.f32 1.0, %v6270_v8  ;;  %v6272_v40 = vpop.eup %6271  ;;  %v2383_v8 = vld [vmem:[#allocation6 + $0xc0] sm:$0xff] }
 0x773   :  { %6275 = vrcp.f32 %v2085_v50  ;;  %v6274_v33 = vpop.eup %6273  ;;  %v2098_v2 = vadd.f32 1.0, %v6272_v40  ;;  %v2387_v50 = vld [vmem:[#allocation6 + $0xe0] sm:$0xff]  ;;  %v5470_v40 = vpack.c.bf16 %v2390_v16, %v2386_v47  ;;  %v2416_v47 = vld [vmem:[#allocation6 + $0x1c8] sm:$0xff] }
 0x774   :  { %6277 = vrcp.f32 %v2091_v23  ;;  %v5438_v23 = vpack.c.bf16 %v2388_v27, %v2384_v25  ;;  %v5440_v28 = vpack.c.bf16 %v2387_v50, %v2383_v8  ;;  %v2409_v25 = vld [vmem:[#allocation6 + $0x190] sm:$0xff]  ;;  %v2420_v16 = vld [vmem:[#allocation6 + $0x1e8] sm:$0xff] }
 0x775   :  { %6279 = vrcp.f32 %v2098_v2  ;;  %v2394_v2 = vld [vmem:[#allocation6 + $0x118] sm:$0xff]  ;;  %v2413_v27 = vld [vmem:[#allocation6 + $0x1b0] sm:$0xff] }
 0x776   :  { %v5484_v50 = vpack.c.bf16 %v2413_v27, %v2409_v25  ;;  %v2736_v25 = vld [vmem:[#allocation8 + $0xe8] sm:$0xff]  ;;  %v2734_v27 = vld [vmem:[#allocation8 + $0xd8] sm:$0xff] }
 0x77d   :  { %v6276_v46 = vpop.eup %6275 }
 0x77e   :  { %v6278_v55 = vpop.eup %6277  ;;  %v2102_v4 = vmul.f32 %v6276_v46, %v6274_v33  ;;  %v2385_v33 = vld [vmem:[#allocation6 + $0xd0] sm:$0xff] }
 0x77f   :  { %v2101_v6 = vmul.f32 %v6278_v55, %v7209_v60  ;;  %v6280_v49 = vpop.eup %6279  ;;  %v2389_v46 = vld [vmem:[#allocation6 + $0xf0] sm:$0xff]  ;;  %v2392_v55 = vld [vmem:[#allocation6 + $0x108] sm:$0xff] }
 0x780   :  { %v5472_v22 = vpack.c.bf16 %v2389_v46, %v2385_v33  ;;  %v2419_v46 = vld [vmem:[#allocation6 + $0x1e0] sm:$0xff] }
 0x781   :  { %v7238_v26 = vadd.f32 %v2102_v4, %v2101_v6  ;;  %v2396_v4 = vld [vmem:[#allocation6 + $0x128] sm:$0xff]  ;;  %v2398_v6 = vld [vmem:[#allocation6 + $0x138] sm:$0xff] }
 0x782   :  { %v5442_v57 = vpack.c.bf16 %v2396_v4, %v2392_v55  ;;  %v5474_v34 = vpack.c.bf16 %v2398_v6, %v2394_v2  ;;  %v2417_v55 = vld [vmem:[#allocation6 + $0x1d0] sm:$0xff] }
 0x783   :  { %6281 = vtanh.f32 %v7238_v26  ;;  %v2421_v4 = vld [vmem:[#allocation6 + $0x1f0] sm:$0xff] }
 0x784   :  { %v5488_v6 = vpack.c.bf16 %v2421_v4, %v2417_v55  ;;  %v2744_v55 = vld [vmem:[#allocation8 + $0x128] sm:$0xff]  ;;  %v2739_v4 = vld [vmem:[#allocation8 + $0x100] sm:$0xff] }
 0x78d   :  { %v6282_v9 = vpop.eup %6281 }
 0x78e   :  { %v7241_v60 = vmul.f32 %v6282_v9, %v6280_v49  ;;  %v2400_v49 = vld [vmem:[#allocation6 + $0x148] sm:$0xff] }
 0x78f   :  { %v2404_v9 = vld [vmem:[#allocation6 + $0x168] sm:$0xff] }
 0x790   :  { %2244 = vmatmul.mubr.f32.vlgmr.msra.gmra.mrb[14].mxu0 %v7241_v60  ;;  %2315 = vmatmul.mubr.f32.vlgmr.msra.gmra.mrb[14].mxu1 %v7241_v60  ;;  %v5446_v21 = vpack.c.bf16 %v2404_v9, %v2400_v49  ;;  %v2715_v9 = vld [vmem:[#allocation8 + $0x40] sm:$0xff] }
 0x791   :  { %5429 = vmatpush1.bf16.msra.mxu0 %v5428_v11  ;;  %5461 = vmatpush1.bf16.msra.mxu1 %v5460_v31  ;;  %v2402_v11 = vld [vmem:[#allocation6 + $0x158] sm:$0xff] }
 0x792   :  { %5431 = vmatprep.subr.bf16.mxu0 %v5430_v61  ;;  %5463 = vmatprep.subr.bf16.mxu1 %v5462_v3  ;;  %v2406_v31 = vld [vmem:[#allocation6 + $0x178] sm:$0xff]  ;;  %v2399_v61 = vld [vmem:[#allocation6 + $0x140] sm:$0xff] }
 0x793   :  { %2509 = vmatprep.mubr.f32.mxu0 %v6529_v0  ;;  %2622 = vmatprep.mubr.f32.mxu1 %v6529_v0  ;;  %v2403_v3 = vld [vmem:[#allocation6 + $0x160] sm:$0xff]  ;;  %v5478_v1 = vpack.c.bf16 %v2406_v31, %v2402_v11  ;;  %v2722_v31 = vld [vmem:[#allocation8 + $0x78] sm:$0xff] }
 0x794   :  { %v5448_v5 = vpack.c.bf16 %v2403_v3, %v2399_v61  ;;  %v2719_v11 = vld [vmem:[#allocation8 + $0x60] sm:$0xff]  ;;  %v2717_v61 = vld [vmem:[#allocation8 + $0x50] sm:$0xff] }
 0x795   :  { %5433 = vmatpush1.bf16.msra.mxu0 %v5432_v54  ;;  %5465 = vmatpush1.bf16.msra.mxu1 %v5464_v59  ;;  %v2410_v54 = vld [vmem:[#allocation6 + $0x198] sm:$0xff]  ;;  %v2721_v3 = vld [vmem:[#allocation8 + $0x70] sm:$0xff] }
 0x796   :  { %5435 = vmatprep.subr.bf16.mxu0 %v5434_v29  ;;  %5467 = vmatprep.subr.bf16.mxu1 %v5466_v63  ;;  %v2414_v59 = vld [vmem:[#allocation6 + $0x1b8] sm:$0xff]  ;;  %v2407_v29 = vld [vmem:[#allocation6 + $0x180] sm:$0xff] }
 0x797   :  { %v2411_v63 = vld [vmem:[#allocation6 + $0x1a0] sm:$0xff]  ;;  %v5482_v14 = vpack.c.bf16 %v2414_v59, %v2410_v54  ;;  %v2730_v59 = vld [vmem:[#allocation8 + $0xb8] sm:$0xff] }
 0x798   :  { %v5452_v8 = vpack.c.bf16 %v2411_v63, %v2407_v29  ;;  %v2727_v54 = vld [vmem:[#allocation8 + $0xa0] sm:$0xff]  ;;  %v2725_v29 = vld [vmem:[#allocation8 + $0x90] sm:$0xff] }
 0x799   :  { %5437 = vmatpush1.bf16.msra.mxu0 %v5436_v51  ;;  %5469 = vmatpush1.bf16.msra.mxu1 %v5468_v43  ;;  %v2418_v51 = vld [vmem:[#allocation6 + $0x1d8] sm:$0xff]  ;;  %v2729_v63 = vld [vmem:[#allocation8 + $0xb0] sm:$0xff] }
 0x79a   :  { %5439 = vmatprep.subr.bf16.mxu0 %v5438_v23  ;;  %5471 = vmatprep.subr.bf16.mxu1 %v5470_v40  ;;  %v2422_v43 = vld [vmem:[#allocation6 + $0x1f8] sm:$0xff]  ;;  %v2415_v23 = vld [vmem:[#allocation6 + $0x1c0] sm:$0xff]  ;;  %v5454_v40 = vpack.c.bf16 %v2420_v16, %v2416_v47 }
 0x79b   :  { %v5486_v33 = vpack.c.bf16 %v2422_v43, %v2418_v51  ;;  %v5456_v2 = vpack.c.bf16 %v2419_v46, %v2415_v23  ;;  %v2731_v16 = vld [vmem:[#allocation8 + $0xc0] sm:$0xff]  ;;  %v2738_v43 = vld [vmem:[#allocation8 + $0xf8] sm:$0xff]  ;;  %v2733_v23 = vld [vmem:[#allocation8 + $0xd0] sm:$0xff] }
 0x79c   :  { %v2735_v51 = vld [vmem:[#allocation8 + $0xe0] sm:$0xff] }
 0x79d   :  { %5441 = vmatpush1.bf16.msra.mxu0 %v5440_v28  ;;  %5473 = vmatpush1.bf16.msra.mxu1 %v5472_v22  ;;  %v2711_v28 = vld [vmem:[#allocation8 + $0x20] sm:$0xff] }
 0x79e   :  { %5443 = vmatprep.subr.bf16.mxu0 %v5442_v57  ;;  %5475 = vmatprep.subr.bf16.mxu1 %v5474_v34  ;;  %v2713_v57 = vld [vmem:[#allocation8 + $0x30] sm:$0xff]  ;;  %v2716_v34 = vld [vmem:[#allocation8 + $0x48] sm:$0xff] }
 0x79f   :  { %v7287_v49 = vpack.c.bf16 %v2720_v35, %v2716_v34 }
 0x7a1   :  { %5445 = vmatpush1.bf16.msra.mxu0 %v5444_v39  ;;  %5477 = vmatpush1.bf16.msra.mxu1 %v5476_v24  ;;  %v7289_v39 = vpack.c.bf16 %v2719_v11, %v2715_v9  ;;  %v7291_v24 = vpack.c.bf16 %v2722_v31, %v2718_v44  ;;  %v2747_v44 = vld [vmem:[#allocation8 + $0x140] sm:$0xff]  ;;  %v2750_v11 = vld [vmem:[#allocation8 + $0x158] sm:$0xff] }
 0x7a2   :  { %5447 = vmatprep.subr.bf16.mxu0 %v5446_v21  ;;  %5479 = vmatprep.subr.bf16.mxu1 %v5478_v1  ;;  %v7294_v21 = vpack.c.bf16 %v2721_v3, %v2717_v61  ;;  %v2724_v1 = vld [vmem:[#allocation8 + $0x88] sm:$0xff]  ;;  %v2751_v9 = vld [vmem:[#allocation8 + $0x160] sm:$0xff]  ;;  %v2754_v31 = vld [vmem:[#allocation8 + $0x178] sm:$0xff] }
 0x7a3   :  { %v7299_v17 = vpack.c.bf16 %v2728_v36, %v2724_v1  ;;  %v2749_v61 = vld [vmem:[#allocation8 + $0x150] sm:$0xff]  ;;  %v7336_v1 = vpack.c.bf16 %v2751_v9, %v2747_v44  ;;  %v7338_v36 = vpack.c.bf16 %v2754_v31, %v2750_v11 }
 0x7a4   :  { %v2753_v3 = vld [vmem:[#allocation8 + $0x170] sm:$0xff] }
 0x7a5   :  { %5449 = vmatpush1.bf16.msra.mxu0 %v5448_v5  ;;  %5481 = vmatpush1.bf16.msra.mxu1 %v5480_v13  ;;  %v7301_v5 = vpack.c.bf16 %v2727_v54, %v2723_v38  ;;  %v7303_v13 = vpack.c.bf16 %v2730_v59, %v2726_v53  ;;  %v2756_v53 = vld [vmem:[#allocation8 + $0x188] sm:$0xff]  ;;  %v2755_v54 = vld [vmem:[#allocation8 + $0x180] sm:$0xff]  ;;  %v7342_v59 = vpack.c.bf16 %v2753_v3, %v2749_v61 }
 0x7a6   :  { %5451 = vmatprep.subr.bf16.mxu0 %v5450_v7  ;;  %5483 = vmatprep.subr.bf16.mxu1 %v5482_v14  ;;  %v7306_v7 = vpack.c.bf16 %v2729_v63, %v2725_v29  ;;  %v2732_v14 = vld [vmem:[#allocation8 + $0xc8] sm:$0xff]  ;;  %v2759_v63 = vld [vmem:[#allocation8 + $0x1a0] sm:$0xff] }
 0x7a7   :  { %v7311_v47 = vpack.c.bf16 %v2736_v25, %v2732_v14  ;;  %v2760_v38 = vld [vmem:[#allocation8 + $0x1a8] sm:$0xff]  ;;  %v2758_v14 = vld [vmem:[#allocation8 + $0x198] sm:$0xff] }
 0x7a8   :  { %v7344_v29 = vpack.c.bf16 %v2760_v38, %v2756_v53  ;;  %v2762_v25 = vld [vmem:[#allocation8 + $0x1b8] sm:$0xff] }
 0x7a9   :  { %5453 = vmatpush1.bf16.msra.mxu0 %v5452_v8  ;;  %5485 = vmatpush1.bf16.msra.mxu1 %v5484_v50  ;;  %v7313_v8 = vpack.c.bf16 %v2735_v51, %v2731_v16  ;;  %v7315_v50 = vpack.c.bf16 %v2738_v43, %v2734_v27  ;;  %v7347_v27 = vpack.c.bf16 %v2762_v25, %v2758_v14  ;;  %v2757_v16 = vld [vmem:[#allocation8 + $0x190] sm:$0xff]  ;;  %v2764_v43 = vld [vmem:[#allocation8 + $0x1c8] sm:$0xff] }
 0x7aa   :  { %5455 = vmatprep.subr.bf16.mxu0 %v5454_v40  ;;  %5487 = vmatprep.subr.bf16.mxu1 %v5486_v33  ;;  %v2737_v40 = vld [vmem:[#allocation8 + $0xf0] sm:$0xff]  ;;  %v2740_v33 = vld [vmem:[#allocation8 + $0x108] sm:$0xff] }
 0x7ab   :  { %v7318_v46 = vpack.c.bf16 %v2737_v40, %v2733_v23  ;;  %v2761_v51 = vld [vmem:[#allocation8 + $0x1b0] sm:$0xff]  ;;  %v2768_v23 = vld [vmem:[#allocation8 + $0x1e8] sm:$0xff]  ;;  %v7350_v40 = vpack.c.bf16 %v2759_v63, %v2755_v54 }
 0x7ad   :  { %5457 = vmatpush1.bf16.msra.mxu0 %v5456_v2  ;;  %5489 = vmatpush1.bf16.msra.mxu1 %v5488_v6  ;;  %v2743_v2 = vld [vmem:[#allocation8 + $0x120] sm:$0xff]  ;;  %v7322_v6 = vpack.c.bf16 %v2744_v55, %v2740_v33  ;;  %v7354_v33 = vpack.c.bf16 %v2761_v51, %v2757_v16  ;;  %v7356_v55 = vpack.c.bf16 %v2768_v23, %v2764_v43 }
 0x7b0   :  { %2510 = vmatmul.mubr.f32.vlgmr.msra.gmra.mrb[16].mxu0 %v6919_v30  ;;  %2623 = vmatmul.mubr.f32.vlgmr.msra.gmra.mrb[18].mxu1 %v6919_v30  ;;  %v2708_v30 = vld [vmem:[#allocation8 + $0x8] sm:$0xff] }
 0x7b1   :  { %2515 = vmatprep.mubr.f32.mxu0 %v6529_v0  ;;  %2628 = vmatprep.mubr.f32.mxu1 %v6529_v0 }
 0x7b4   :  { %2516 = vmatmul.mubr.f32.gmra.mrb[18].mxu0 %v6964_v58  ;;  %2629 = vmatmul.mubr.f32.gmra.mrb[20].mxu1 %v6964_v58  ;;  %v2712_v58 = vld [vmem:[#allocation8 + $0x28] sm:$0xff] }
 0x7b5   :  { %2521 = vmatprep.mubr.f32.mxu0 %v6529_v0  ;;  %2634 = vmatprep.mubr.f32.mxu1 %v6529_v0 }
 0x7b8   :  { %2522 = vmatmul.mubr.f32.gmra.mrb[20].mxu0 %v7042_v32  ;;  %2635 = vmatmul.mubr.f32.gmra.mrb[22].mxu1 %v7042_v32  ;;  %v2710_v32 = vld [vmem:[#allocation8 + $0x18] sm:$0xff] }
 0x7b9   :  { %2527 = vmatprep.mubr.f32.mxu0 %v6529_v0  ;;  %2640 = vmatprep.mubr.f32.mxu1 %v6529_v0 }
 0x7bc   :  { %2528 = vmatmul.mubr.f32.gmra.mrb[22].mxu0 %v7121_v15  ;;  %2641 = vmatmul.mubr.f32.gmra.mrb[24].mxu1 %v7121_v15  ;;  %v7275_v15 = vpack.c.bf16 %v2712_v58, %v2708_v30  ;;  %v7324_v30 = vpack.c.bf16 %v2743_v2, %v2739_v4  ;;  %v2742_v58 = vld [vmem:[#allocation8 + $0x118] sm:$0xff] }
 0x7bd   :  { %2533 = vmatprep.mubr.f32.mxu0 %v6529_v0  ;;  %2646 = vmatprep.mubr.f32.mxu1 %v6529_v0  ;;  %v2766_v4 = vld [vmem:[#allocation8 + $0x1d8] sm:$0xff] }
 0x7be   :  { %5491 = vmatprep.subr.bf16.mxu0 %v7275_v15  ;;  %v2770_v2 = vld [vmem:[#allocation8 + $0x1f8] sm:$0xff] }
 0x7c0   :  { %2534 = vmatmul.mubr.f32.gmra.mrb[24].mxu0 %v7167_v45  ;;  %2647 = vmatmul.mubr.f32.gmra.mrb[26].mxu1 %v7167_v45  ;;  %v2707_v45 = vld [vmem:[#allocation8] sm:$0xff] }
 0x7c1   :  { %2539 = vmatprep.mubr.f32.mxu0 %v6529_v0  ;;  %2652 = vmatprep.mubr.f32.mxu1 %v6529_v0  ;;  %v7277_v22 = vpack.c.bf16 %v2711_v28, %v2707_v45  ;;  %v2741_v45 = vld [vmem:[#allocation8 + $0x110] sm:$0xff] }
 0x7c3   :  { %5493 = vmatpush1.bf16.msra.mxu0 %v7277_v22 }
 0x7c4   :  { %2540 = vmatmul.mubr.f32.gmra.mrb[26].mxu0 %v7212_v62  ;;  %2653 = vmatmul.mubr.f32.gmra.mrb[28].mxu1 %v7212_v62  ;;  %v2714_v62 = vld [vmem:[#allocation8 + $0x38] sm:$0xff] }
 0x7c5   :  { %2545 = vmatprep.mubr.f32.mxu0 %v6529_v0  ;;  %2658 = vmatprep.mubr.f32.mxu1 %v6529_v0  ;;  %v7279_v42 = vpack.c.bf16 %v2714_v62, %v2710_v32  ;;  %v2746_v32 = vld [vmem:[#allocation8 + $0x138] sm:$0xff]  ;;  %v2745_v62 = vld [vmem:[#allocation8 + $0x130] sm:$0xff] }
 0x7c6   :  { %5495 = vmatprep.subr.bf16.mxu0 %v7287_v49  ;;  %v7327_v28 = vpack.c.bf16 %v2746_v32, %v2742_v58  ;;  %v7330_v34 = vpack.c.bf16 %v2745_v62, %v2741_v45  ;;  %v2763_v58 = vld [vmem:[#allocation8 + $0x1c0] sm:$0xff]  ;;  %v7362_v45 = vpack.c.bf16 %v2770_v2, %v2766_v4  ;;  %v2765_v62 = vld [vmem:[#allocation8 + $0x1d0] sm:$0xff] }
 0x7c7   :  { %5523 = vmatprep.subr.bf16.mxu1 %v7279_v42  ;;  %5497 = vmatpush1.bf16.msra.mxu0 %v7289_v39  ;;  %v2767_v32 = vld [vmem:[#allocation8 + $0x1e0] sm:$0xff] }
 0x7c8   :  { %2546 = vmatmul.mubr.f32.gmra.mrb[28].mxu0 %v7241_v60  ;;  %2659 = vmatmul.mubr.f32.gmra.mrb[30].mxu1 %v7241_v60  ;;  %v7282_v60 = vpack.c.bf16 %v2713_v57, %v2709_v56  ;;  %v2748_v56 = vld [vmem:[#allocation8 + $0x148] sm:$0xff] }
 0x7c9   :  { %2551 = vmatprep.mubr.f32.mxu0 %v6529_v0  ;;  %2664 = vmatprep.mubr.f32.mxu1 %v6529_v0  ;;  %v2752_v57 = vld [vmem:[#allocation8 + $0x168] sm:$0xff] }
 0x7ca   :  { %5525 = vmatpush1.bf16.msra.mxu1 %v7282_v60  ;;  %5499 = vmatprep.subr.bf16.mxu0 %v7299_v17  ;;  %v7332_v35 = vpack.c.bf16 %v2752_v57, %v2748_v56  ;;  %v7364_v56 = vpack.c.bf16 %v2767_v32, %v2763_v58  ;;  %v2769_v57 = vld [vmem:[#allocation8 + $0x1f0] sm:$0xff] }
 0x7cb   :  { %5527 = vmatprep.subr.bf16.mxu1 %v7291_v24  ;;  %5501 = vmatpush1.bf16.msra.mxu0 %v7301_v5  ;;  %v7367_v44 = vpack.c.bf16 %v2769_v57, %v2765_v62 }
 0x7cc   :  { %5503 = vmatprep.subr.bf16.mxu0 %v7311_v47 }
 0x7ce   :  { %5529 = vmatpush1.bf16.msra.mxu1 %v7294_v21 }
 0x7cf   :  { %5531 = vmatprep.subr.bf16.mxu1 %v7303_v13  ;;  %5505 = vmatpush1.bf16.msra.mxu0 %v7313_v8 }
 0x7d0   :  { %5507 = vmatprep.subr.bf16.mxu0 %v7322_v6 }
 0x7d2   :  { %5533 = vmatpush1.bf16.msra.mxu1 %v7306_v7 }
 0x7d3   :  { %5535 = vmatprep.subr.bf16.mxu1 %v7315_v50  ;;  %5509 = vmatpush1.bf16.msra.mxu0 %v7324_v30 }
 0x7d4   :  { %5511 = vmatprep.subr.bf16.mxu0 %v7332_v35 }
 0x7d6   :  { %5537 = vmatpush1.bf16.msra.mxu1 %v7318_v46 }
 0x7d7   :  { %5539 = vmatprep.subr.bf16.mxu1 %v7327_v28  ;;  %5513 = vmatpush1.bf16.msra.mxu0 %v7336_v1 }
 0x7d8   :  { %5515 = vmatprep.subr.bf16.mxu0 %v7344_v29 }
 0x7da   :  { %5541 = vmatpush1.bf16.msra.mxu1 %v7330_v34 }
 0x7db   :  { %5543 = vmatprep.subr.bf16.mxu1 %v7338_v36  ;;  %5517 = vmatpush1.bf16.msra.mxu0 %v7350_v40 }
 0x7dc   :  { %5519 = vmatprep.subr.bf16.mxu0 %v7356_v55 }
 0x7de   :  { %5545 = vmatpush1.bf16.msra.mxu1 %v7342_v59 }
 0x7df   :  { %5547 = vmatprep.subr.bf16.mxu1 %v7347_v27  ;;  %5521 = vmatpush1.bf16.msra.mxu0 %v7364_v56 }
 0x7e0   :  { %5555 = vmatprep.subr.bf16.mxu0 %v7275_v15 }
 0x7e2   :  { %5549 = vmatpush1.bf16.msra.mxu1 %v7354_v33 }
 0x7e3   :  { %5551 = vmatprep.subr.bf16.mxu1 %v7362_v45 }
 0x7e6   :  { %5553 = vmatpush1.bf16.msra.mxu1 %v7367_v44 }
 0x7e7   :  { %5587 = vmatprep.subr.bf16.mxu1 %v7279_v42 }
 0x863   :  { %v2245_v9 = vpop.f32.mrb[14].mxu0  ;;  %v2316_v11 = vpop.f32.mrb[14].mxu1 }
 0x864   :  { %v6050_v31 = vadd.f32 %v2245_v9, %v6896_v19  ;;  %v2247_v61 = vpop.f32.mrb[15].mxu0  ;;  %v2318_v3 = vpop.f32.mrb[15].mxu1  ;;  %v6066_v25 = vadd.f32 %v2316_v11, %v6908_v48 }
 0x865   :  { %v6051_v53 = vadd.f32 %v2247_v61, %v6900_v20  ;;  %v6067_v63 = vadd.f32 %v2318_v3, %v6912_v52 }
 0x866   :  { %v4810_v38 = vmul.f32 -1.442695, %v6050_v31 }
 0x867   :  { %v4811_v54 = vmul.f32 -1.442695, %v6051_v53  ;;  %v4812_v14 = vmul.f32 -1.442695, %v6067_v63 }
 0x868   :  { %6283 = vpow2.f32 %v4810_v38 }
 0x869   :  { %6285 = vpow2.f32 %v4811_v54 }
 0x86a   :  { %6287 = vpow2.f32 %v4812_v14 }
 0x86b   :  { %6289 = vtanh.f32 %v6066_v25 }
 0x872   :  { %v6284_v16 = vpop.eup %6283 }
 0x873   :  { %v6286_v51 = vpop.eup %6285  ;;  %v2328_v43 = vadd.f32 1.0, %v6284_v16 }
 0x874   :  { %v2334_v23 = vadd.f32 1.0, %v6286_v51  ;;  %v6288_v19 = vpop.eup %6287 }
 0x875   :  { %6291 = vrcp.f32 %v2328_v43  ;;  %v6290_v4 = vpop.eup %6289  ;;  %v2341_v32 = vadd.f32 1.0, %v6288_v19 }
 0x876   :  { %6293 = vrcp.f32 %v2334_v23 }
 0x877   :  { %6295 = vrcp.f32 %v2341_v32 }
 0x87f   :  { %v6292_v20 = vpop.eup %6291 }
 0x880   :  { %v6294_v2 = vpop.eup %6293  ;;  %v2345_v58 = vmul.f32 %v6292_v20, %v6290_v4 }
 0x881   :  { %v2344_v62 = vmul.f32 %v6294_v2, %v7238_v26  ;;  %v6296_v48 = vpop.eup %6295  ;;  %v2423_v26 = vld [vmem:[%s7824_s6] sm:$0xf] }
 0x882   :  { %v7421_v11 = vrot.slane %v2423_v26, %v107_v12  ;;  %v7425_v31 = vrot.slane %v2423_v26, %v111_v18  ;;  %v7431_v16 = vrot.slane %v2423_v26, %v119_v41  ;;  %v7436_v18 = vrot.slane %v2423_v26, %v115_v37 }
 0x883   :  { %v2346_v52 = vadd.f32 %v2345_v58, %v2344_v62 }
 0x885   :  { %6297 = vtanh.f32 %v2346_v52 }
 0x88f   :  { %v6298_v57 = vpop.eup %6297 }
 0x890   :  { %v2348_v9 = vmul.f32 %v6298_v57, %v6296_v48 }
 0x892   :  { %2552 = vmatmul.mubr.f32.gmra.mrb[30].mxu0 %v2348_v9  ;;  %2665 = vmatmul.mubr.f32.gmra.mrb[32].mxu1 %v2348_v9 }
 0x893   :  { %2835 = vmatprep.mubr.f32.mxu0 %v6529_v0  ;;  %2906 = vmatprep.mubr.f32.mxu1 %v6529_v0 }
 0x896   :  { %2836 = vmatmul.mubr.f32.vlgmr.msra.gmra.mrb[16].mxu0 %v6529_v0  ;;  %2907 = vmatmul.mubr.f32.vlgmr.msra.gmra.mrb[18].mxu1 %v6529_v0 }
 0x897   :  { %5557 = vmatpush1.bf16.msra.mxu0 %v7277_v22  ;;  %5589 = vmatpush1.bf16.msra.mxu1 %v7282_v60 }
 0x898   :  { %5559 = vmatprep.subr.bf16.mxu0 %v7287_v49  ;;  %5591 = vmatprep.subr.bf16.mxu1 %v7291_v24 }
 0x899   :  { %3074 = vmatprep.mubr.f32.mxu0 %v6529_v0  ;;  %3145 = vmatprep.mubr.f32.mxu1 %v6529_v0 }
 0x89b   :  { %5561 = vmatpush1.bf16.msra.mxu0 %v7289_v39  ;;  %5593 = vmatpush1.bf16.msra.mxu1 %v7294_v21 }
 0x89c   :  { %5563 = vmatprep.subr.bf16.mxu0 %v7299_v17  ;;  %5595 = vmatprep.subr.bf16.mxu1 %v7303_v13 }
 0x89f   :  { %5565 = vmatpush1.bf16.msra.mxu0 %v7301_v5  ;;  %5597 = vmatpush1.bf16.msra.mxu1 %v7306_v7 }
 0x8a0   :  { %5567 = vmatprep.subr.bf16.mxu0 %v7311_v47  ;;  %5599 = vmatprep.subr.bf16.mxu1 %v7315_v50 }
 0x8a3   :  { %5569 = vmatpush1.bf16.msra.mxu0 %v7313_v8  ;;  %5601 = vmatpush1.bf16.msra.mxu1 %v7318_v46 }
 0x8a4   :  { %5571 = vmatprep.subr.bf16.mxu0 %v7322_v6  ;;  %5603 = vmatprep.subr.bf16.mxu1 %v7327_v28 }
 0x8a7   :  { %5573 = vmatpush1.bf16.msra.mxu0 %v7324_v30  ;;  %5605 = vmatpush1.bf16.msra.mxu1 %v7330_v34 }
 0x8a8   :  { %5575 = vmatprep.subr.bf16.mxu0 %v7332_v35  ;;  %5607 = vmatprep.subr.bf16.mxu1 %v7338_v36 }
 0x8ab   :  { %5577 = vmatpush1.bf16.msra.mxu0 %v7336_v1  ;;  %5609 = vmatpush1.bf16.msra.mxu1 %v7342_v59 }
 0x8ac   :  { %5579 = vmatprep.subr.bf16.mxu0 %v7344_v29  ;;  %5611 = vmatprep.subr.bf16.mxu1 %v7347_v27 }
 0x8af   :  { %5581 = vmatpush1.bf16.msra.mxu0 %v7350_v40  ;;  %5613 = vmatpush1.bf16.msra.mxu1 %v7354_v33 }
 0x8b0   :  { %5583 = vmatprep.subr.bf16.mxu0 %v7356_v55  ;;  %5615 = vmatprep.subr.bf16.mxu1 %v7362_v45 }
 0x8b3   :  { %5585 = vmatpush1.bf16.msra.mxu0 %v7364_v56  ;;  %5617 = vmatpush1.bf16.msra.mxu1 %v7367_v44 }
 0x8b4   :  { %5619 = vmatprep.subr.bf16.mxu0 %v7275_v15  ;;  %5651 = vmatprep.subr.bf16.mxu1 %v7279_v42 }
 0x969   :  { %v2837_v61 = vpop.f32.mrb[16].mxu0  ;;  %v2908_v3 = vpop.f32.mrb[18].mxu1 }
 0x96a   :  { %v6068_v53 = vadd.f32 %v2837_v61, %v7421_v11  ;;  %v2839_v38 = vpop.f32.mrb[17].mxu0  ;;  %v2910_v54 = vpop.f32.mrb[19].mxu1  ;;  %v6084_v43 = vadd.f32 %v2908_v3, %v7436_v18 }
 0x96b   :  { %v6069_v63 = vadd.f32 %v2839_v38, %v7425_v31  ;;  %v6085_v12 = vadd.f32 %v2910_v54, %v7431_v16 }
 0x96c   :  { %v4813_v14 = vmul.f32 -1.442695, %v6068_v53 }
 0x96d   :  { %v4814_v25 = vmul.f32 -1.442695, %v6069_v63  ;;  %v4815_v51 = vmul.f32 -1.442695, %v6085_v12 }
 0x96e   :  { %6299 = vpow2.f32 %v4813_v14 }
 0x96f   :  { %6301 = vpow2.f32 %v4814_v25 }
 0x970   :  { %6303 = vpow2.f32 %v4815_v51 }
 0x971   :  { %6305 = vtanh.f32 %v6084_v43 }
 0x978   :  { %v6300_v23 = vpop.eup %6299 }
 0x979   :  { %v6302_v19 = vpop.eup %6301  ;;  %v2920_v4 = vadd.f32 1.0, %v6300_v23 }
 0x97a   :  { %v2926_v20 = vadd.f32 1.0, %v6302_v19  ;;  %v6304_v41 = vpop.eup %6303 }
 0x97b   :  { %6307 = vrcp.f32 %v2920_v4  ;;  %v6306_v2 = vpop.eup %6305  ;;  %v2933_v52 = vadd.f32 1.0, %v6304_v41 }
 0x97c   :  { %6309 = vrcp.f32 %v2926_v20 }
 0x97d   :  { %6311 = vrcp.f32 %v2933_v52 }
 0x985   :  { %v6308_v58 = vpop.eup %6307 }
 0x986   :  { %v6310_v32 = vpop.eup %6309  ;;  %v2937_v62 = vmul.f32 %v6308_v58, %v6306_v2 }
 0x987   :  { %v2936_v10 = vmul.f32 0.0, %v6310_v32  ;;  %v6312_v48 = vpop.eup %6311 }
 0x989   :  { %v7439_v37 = vadd.f32 %v2937_v62, %v2936_v10 }
 0x98b   :  { %6313 = vtanh.f32 %v7439_v37 }
 0x995   :  { %v6314_v57 = vpop.eup %6313 }
 0x996   :  { %v7442_v9 = vmul.f32 %v6314_v57, %v6312_v48  ;;  %v3663_v57 = vld [vmem:[#allocation8] sm:$0xff] }
 0x998   :  { %3075 = vmatmul.mubr.f32.vlgmr.msra.gmra.mrb[18].mxu0 %v7442_v9  ;;  %3146 = vmatmul.mubr.f32.vlgmr.msra.gmra.mrb[20].mxu1 %v7442_v9 }
 0x999   :  { %5621 = vmatpush1.bf16.msra.mxu0 %v7277_v22  ;;  %5653 = vmatpush1.bf16.msra.mxu1 %v7282_v60 }
 0x99a   :  { %5623 = vmatprep.subr.bf16.mxu0 %v7287_v49  ;;  %5655 = vmatprep.subr.bf16.mxu1 %v7291_v24 }
 0x99b   :  { %3313 = vmatprep.mubr.f32.mxu0 %v6529_v0  ;;  %3384 = vmatprep.mubr.f32.mxu1 %v6529_v0 }
 0x99d   :  { %5625 = vmatpush1.bf16.msra.mxu0 %v7289_v39  ;;  %5657 = vmatpush1.bf16.msra.mxu1 %v7294_v21 }
 0x99e   :  { %5627 = vmatprep.subr.bf16.mxu0 %v7299_v17  ;;  %5659 = vmatprep.subr.bf16.mxu1 %v7303_v13 }
 0x9a1   :  { %5629 = vmatpush1.bf16.msra.mxu0 %v7301_v5  ;;  %5661 = vmatpush1.bf16.msra.mxu1 %v7306_v7 }
 0x9a2   :  { %5631 = vmatprep.subr.bf16.mxu0 %v7311_v47  ;;  %5663 = vmatprep.subr.bf16.mxu1 %v7315_v50 }
 0x9a5   :  { %5633 = vmatpush1.bf16.msra.mxu0 %v7313_v8  ;;  %5665 = vmatpush1.bf16.msra.mxu1 %v7318_v46 }
 0x9a6   :  { %5635 = vmatprep.subr.bf16.mxu0 %v7322_v6  ;;  %5667 = vmatprep.subr.bf16.mxu1 %v7327_v28 }
 0x9a9   :  { %5637 = vmatpush1.bf16.msra.mxu0 %v7324_v30  ;;  %5669 = vmatpush1.bf16.msra.mxu1 %v7330_v34 }
 0x9aa   :  { %5639 = vmatprep.subr.bf16.mxu0 %v7332_v35  ;;  %5671 = vmatprep.subr.bf16.mxu1 %v7338_v36 }
 0x9ad   :  { %5641 = vmatpush1.bf16.msra.mxu0 %v7336_v1  ;;  %5673 = vmatpush1.bf16.msra.mxu1 %v7342_v59 }
 0x9ae   :  { %5643 = vmatprep.subr.bf16.mxu0 %v7344_v29  ;;  %5675 = vmatprep.subr.bf16.mxu1 %v7347_v27 }
 0x9b1   :  { %5645 = vmatpush1.bf16.msra.mxu0 %v7350_v40  ;;  %5677 = vmatpush1.bf16.msra.mxu1 %v7354_v33 }
 0x9b2   :  { %5647 = vmatprep.subr.bf16.mxu0 %v7356_v55  ;;  %5679 = vmatprep.subr.bf16.mxu1 %v7362_v45 }
 0x9b5   :  { %5649 = vmatpush1.bf16.msra.mxu0 %v7364_v56  ;;  %5681 = vmatpush1.bf16.msra.mxu1 %v7367_v44 }
 0x9b6   :  { %5683 = vmatprep.subr.bf16.mxu0 %v7275_v15  ;;  %5715 = vmatprep.subr.bf16.mxu1 %v7279_v42 }
 0xa6b   :  { %v3076_v26 = vpop.f32.mrb[18].mxu0  ;;  %v3147_v61 = vpop.f32.mrb[20].mxu1 }
 0xa6c   :  { %v6070_v3 = vadd.f32 %v3076_v26, %v7421_v11  ;;  %v3078_v53 = vpop.f32.mrb[19].mxu0  ;;  %v3149_v38 = vpop.f32.mrb[21].mxu1  ;;  %v6086_v51 = vadd.f32 %v3147_v61, %v7436_v18  ;;  %v3667_v26 = vld [vmem:[#allocation8 + $0x20] sm:$0xff] }
 0xa6d   :  { %v6071_v54 = vadd.f32 %v3078_v53, %v7425_v31  ;;  %v6087_v25 = vadd.f32 %v3149_v38, %v7431_v16  ;;  %v3665_v53 = vld [vmem:[#allocation8 + $0x10] sm:$0xff] }
 0xa6e   :  { %v4816_v63 = vmul.f32 -1.442695, %v6070_v3  ;;  %v7542_v3 = vpack.c.bf16 %v3667_v26, %v3663_v57  ;;  %v3669_v38 = vld [vmem:[#allocation8 + $0x30] sm:$0xff]  ;;  %v3704_v26 = vld [vmem:[#allocation8 + $0x148] sm:$0xff] }
 0xa6f   :  { %v4817_v14 = vmul.f32 -1.442695, %v6071_v54  ;;  %v4818_v12 = vmul.f32 -1.442695, %v6087_v25  ;;  %v7545_v54 = vpack.c.bf16 %v3669_v38, %v3665_v53  ;;  %v3674_v25 = vld [vmem:[#allocation8 + $0x58] sm:$0xff]  ;;  %v3708_v53 = vld [vmem:[#allocation8 + $0x168] sm:$0xff] }
 0xa70   :  { %6315 = vpow2.f32 %v4816_v63  ;;  %v3672_v63 = vld [vmem:[#allocation8 + $0x48] sm:$0xff]  ;;  %v3706_v38 = vld [vmem:[#allocation8 + $0x158] sm:$0xff] }
 0xa71   :  { %6317 = vpow2.f32 %v4817_v14  ;;  %v3676_v14 = vld [vmem:[#allocation8 + $0x68] sm:$0xff] }
 0xa72   :  { %6319 = vpow2.f32 %v4818_v12  ;;  %v7550_v12 = vpack.c.bf16 %v3676_v14, %v3672_v63  ;;  %v7597_v63 = vpack.c.bf16 %v3708_v53, %v3704_v26  ;;  %v3710_v14 = vld [vmem:[#allocation8 + $0x178] sm:$0xff] }
 0xa73   :  { %6321 = vtanh.f32 %v6086_v51  ;;  %v3678_v51 = vld [vmem:[#allocation8 + $0x78] sm:$0xff] }
 0xa7a   :  { %v6316_v15 = vpop.eup %6315 }
 0xa7b   :  { %v6318_v43 = vpop.eup %6317  ;;  %v3159_v42 = vadd.f32 1.0, %v6316_v15  ;;  %v3671_v15 = vld [vmem:[#allocation8 + $0x40] sm:$0xff] }
 0xa7c   :  { %v3165_v23 = vadd.f32 1.0, %v6318_v43  ;;  %v6320_v19 = vpop.eup %6319  ;;  %v3675_v43 = vld [vmem:[#allocation8 + $0x60] sm:$0xff] }
 0xa7d   :  { %6323 = vrcp.f32 %v3159_v42  ;;  %v6322_v4 = vpop.eup %6321  ;;  %v3172_v58 = vadd.f32 1.0, %v6320_v19  ;;  %v7552_v42 = vpack.c.bf16 %v3678_v51, %v3674_v25  ;;  %v3673_v19 = vld [vmem:[#allocation8 + $0x50] sm:$0xff]  ;;  %v3703_v25 = vld [vmem:[#allocation8 + $0x140] sm:$0xff] }
 0xa7e   :  { %6325 = vrcp.f32 %v3165_v23  ;;  %v7554_v23 = vpack.c.bf16 %v3675_v43, %v3671_v15  ;;  %v3707_v51 = vld [vmem:[#allocation8 + $0x160] sm:$0xff]  ;;  %v7600_v15 = vpack.c.bf16 %v3710_v14, %v3706_v38 }
 0xa7f   :  { %6327 = vrcp.f32 %v3172_v58  ;;  %v3682_v58 = vld [vmem:[#allocation8 + $0x98] sm:$0xff]  ;;  %v7602_v43 = vpack.c.bf16 %v3707_v51, %v3703_v25 }
 0xa87   :  { %v6324_v20 = vpop.eup %6323 }
 0xa88   :  { %v6326_v41 = vpop.eup %6325  ;;  %v3176_v2 = vmul.f32 %v6324_v20, %v6322_v4  ;;  %v3677_v4 = vld [vmem:[#allocation8 + $0x70] sm:$0xff] }
 0xa89   :  { %v3175_v32 = vmul.f32 %v6326_v41, %v7439_v37  ;;  %v6328_v52 = vpop.eup %6327  ;;  %v3670_v37 = vld [vmem:[#allocation8 + $0x38] sm:$0xff]  ;;  %v7557_v20 = vpack.c.bf16 %v3677_v4, %v3673_v19  ;;  %v3680_v41 = vld [vmem:[#allocation8 + $0x88] sm:$0xff]  ;;  %v3705_v19 = vld [vmem:[#allocation8 + $0x150] sm:$0xff] }
 0xa8a   :  { %v3709_v4 = vld [vmem:[#allocation8 + $0x170] sm:$0xff] }
 0xa8b   :  { %v7485_v62 = vadd.f32 %v3176_v2, %v3175_v32  ;;  %v3684_v2 = vld [vmem:[#allocation8 + $0xa8] sm:$0xff] }
 0xa8c   :  { %v7562_v32 = vpack.c.bf16 %v3684_v2, %v3680_v41  ;;  %v3712_v41 = vld [vmem:[#allocation8 + $0x188] sm:$0xff]  ;;  %v7605_v2 = vpack.c.bf16 %v3709_v4, %v3705_v19 }
 0xa8d   :  { %6329 = vtanh.f32 %v7485_v62 }
 0xa97   :  { %v6330_v10 = vpop.eup %6329 }
 0xa98   :  { %v7488_v48 = vmul.f32 %v6330_v10, %v6328_v52  ;;  %v3679_v52 = vld [vmem:[#allocation8 + $0x80] sm:$0xff] }
 0xa99   :  { %v3683_v10 = vld [vmem:[#allocation8 + $0xa0] sm:$0xff] }
 0xa9a   :  { %3314 = vmatmul.mubr.f32.vlgmr.msra.gmra.mrb[20].mxu0 %v7488_v48  ;;  %3385 = vmatmul.mubr.f32.vlgmr.msra.gmra.mrb[22].mxu1 %v7488_v48 }
 0xa9b   :  { %5685 = vmatpush1.bf16.msra.mxu0 %v7277_v22  ;;  %5717 = vmatpush1.bf16.msra.mxu1 %v7282_v60 }
 0xa9c   :  { %5687 = vmatprep.subr.bf16.mxu0 %v7287_v49  ;;  %5719 = vmatprep.subr.bf16.mxu1 %v7291_v24 }
 0xa9d   :  { %3552 = vmatprep.mubr.f32.mxu0 %v6529_v0  ;;  %3623 = vmatprep.mubr.f32.mxu1 %v6529_v0 }
 0xa9f   :  { %5689 = vmatpush1.bf16.msra.mxu0 %v7289_v39  ;;  %5721 = vmatpush1.bf16.msra.mxu1 %v7294_v21 }
 0xaa0   :  { %5691 = vmatprep.subr.bf16.mxu0 %v7299_v17  ;;  %5723 = vmatprep.subr.bf16.mxu1 %v7303_v13 }
 0xaa3   :  { %5693 = vmatpush1.bf16.msra.mxu0 %v7301_v5  ;;  %5725 = vmatpush1.bf16.msra.mxu1 %v7306_v7 }
 0xaa4   :  { %5695 = vmatprep.subr.bf16.mxu0 %v7311_v47  ;;  %5727 = vmatprep.subr.bf16.mxu1 %v7315_v50 }
 0xaa7   :  { %5697 = vmatpush1.bf16.msra.mxu0 %v7313_v8  ;;  %5729 = vmatpush1.bf16.msra.mxu1 %v7318_v46 }
 0xaa8   :  { %5699 = vmatprep.subr.bf16.mxu0 %v7322_v6  ;;  %5731 = vmatprep.subr.bf16.mxu1 %v7327_v28 }
 0xaab   :  { %5701 = vmatpush1.bf16.msra.mxu0 %v7324_v30  ;;  %5733 = vmatpush1.bf16.msra.mxu1 %v7330_v34 }
 0xaac   :  { %5703 = vmatprep.subr.bf16.mxu0 %v7332_v35  ;;  %5735 = vmatprep.subr.bf16.mxu1 %v7338_v36 }
 0xaaf   :  { %5705 = vmatpush1.bf16.msra.mxu0 %v7336_v1  ;;  %5737 = vmatpush1.bf16.msra.mxu1 %v7342_v59 }
 0xab0   :  { %5707 = vmatprep.subr.bf16.mxu0 %v7344_v29  ;;  %5739 = vmatprep.subr.bf16.mxu1 %v7347_v27 }
 0xab3   :  { %5709 = vmatpush1.bf16.msra.mxu0 %v7350_v40  ;;  %5741 = vmatpush1.bf16.msra.mxu1 %v7354_v33 }
 0xab4   :  { %5711 = vmatprep.subr.bf16.mxu0 %v7356_v55  ;;  %5743 = vmatprep.subr.bf16.mxu1 %v7362_v45  ;;  %v3664_v55 = vld [vmem:[#allocation8 + $0x8] sm:$0xff] }
 0xab5   :  { %v3668_v45 = vld [vmem:[#allocation8 + $0x28] sm:$0xff] }
 0xab7   :  { %5713 = vmatpush1.bf16.msra.mxu0 %v7364_v56  ;;  %5745 = vmatpush1.bf16.msra.mxu1 %v7367_v44  ;;  %v3666_v56 = vld [vmem:[#allocation8 + $0x18] sm:$0xff]  ;;  %v7538_v44 = vpack.c.bf16 %v3668_v45, %v3664_v55 }
 0xab8   :  { %v7540_v61 = vpack.c.bf16 %v3670_v37, %v3666_v56  ;;  %v3697_v56 = vld [vmem:[#allocation8 + $0x110] sm:$0xff] }
 0xab9   :  { %5747 = vmatprep.subr.bf16.mxu0 %v7538_v44  ;;  %v3701_v37 = vld [vmem:[#allocation8 + $0x130] sm:$0xff] }
 0xaba   :  { %5779 = vmatprep.subr.bf16.mxu1 %v7540_v61  ;;  %v7593_v57 = vpack.c.bf16 %v3701_v37, %v3697_v56  ;;  %v3725_v56 = vld [vmem:[#allocation8 + $0x1f0] sm:$0xff] }
 0xb6d   :  { %v3315_v22 = vpop.f32.mrb[20].mxu0  ;;  %v3386_v60 = vpop.f32.mrb[22].mxu1 }
 0xb6e   :  { %v6072_v49 = vadd.f32 %v3315_v22, %v7421_v11  ;;  %v3317_v39 = vpop.f32.mrb[21].mxu0  ;;  %v3388_v24 = vpop.f32.mrb[23].mxu1  ;;  %v6088_v47 = vadd.f32 %v3386_v60, %v7436_v18  ;;  %v7566_v60 = vpack.c.bf16 %v3683_v10, %v3679_v52  ;;  %v3718_v52 = vld [vmem:[#allocation8 + $0x1b8] sm:$0xff] }
 0xb6f   :  { %v6073_v21 = vadd.f32 %v3317_v39, %v7425_v31  ;;  %v6089_v13 = vadd.f32 %v3388_v24, %v7431_v16  ;;  %v3685_v39 = vld [vmem:[#allocation8 + $0xb0] sm:$0xff] }
 0xb70   :  { %v4819_v17 = vmul.f32 -1.442695, %v6072_v49  ;;  %v3681_v49 = vld [vmem:[#allocation8 + $0x90] sm:$0xff] }
 0xb71   :  { %v4820_v5 = vmul.f32 -1.442695, %v6073_v21  ;;  %v4821_v7 = vmul.f32 -1.442695, %v6089_v13  ;;  %v7569_v24 = vpack.c.bf16 %v3685_v39, %v3681_v49  ;;  %v3688_v21 = vld [vmem:[#allocation8 + $0xc8] sm:$0xff]  ;;  %v3711_v39 = vld [vmem:[#allocation8 + $0x180] sm:$0xff] }
 0xb72   :  { %6331 = vpow2.f32 %v4819_v17  ;;  %v3692_v17 = vld [vmem:[#allocation8 + $0xe8] sm:$0xff] }
 0xb73   :  { %6333 = vpow2.f32 %v4820_v5  ;;  %v3690_v5 = vld [vmem:[#allocation8 + $0xd8] sm:$0xff]  ;;  %v7574_v13 = vpack.c.bf16 %v3692_v17, %v3688_v21  ;;  %v3715_v21 = vld [vmem:[#allocation8 + $0x1a0] sm:$0xff]  ;;  %v3713_v17 = vld [vmem:[#allocation8 + $0x190] sm:$0xff] }
 0xb74   :  { %6335 = vpow2.f32 %v4821_v7  ;;  %v3694_v7 = vld [vmem:[#allocation8 + $0xf8] sm:$0xff] }
 0xb75   :  { %6337 = vtanh.f32 %v6088_v47  ;;  %v3687_v47 = vld [vmem:[#allocation8 + $0xc0] sm:$0xff] }
 0xb7c   :  { %v6332_v8 = vpop.eup %6331 }
 0xb7d   :  { %v6334_v50 = vpop.eup %6333  ;;  %v3398_v46 = vadd.f32 1.0, %v6332_v8  ;;  %v3691_v8 = vld [vmem:[#allocation8 + $0xe0] sm:$0xff] }
 0xb7e   :  { %v3404_v6 = vadd.f32 1.0, %v6334_v50  ;;  %v6336_v30 = vpop.eup %6335  ;;  %v7576_v50 = vpack.c.bf16 %v3694_v7, %v3690_v5  ;;  %v7613_v5 = vpack.c.bf16 %v3715_v21, %v3711_v39  ;;  %v3717_v7 = vld [vmem:[#allocation8 + $0x1b0] sm:$0xff] }
 0xb7f   :  { %6339 = vrcp.f32 %v3398_v46  ;;  %v6338_v28 = vpop.eup %6337  ;;  %v3411_v36 = vadd.f32 1.0, %v6336_v30  ;;  %v7578_v46 = vpack.c.bf16 %v3691_v8, %v3687_v47  ;;  %v3693_v30 = vld [vmem:[#allocation8 + $0xf0] sm:$0xff]  ;;  %v3720_v47 = vld [vmem:[#allocation8 + $0x1c8] sm:$0xff] }
 0xb80   :  { %6341 = vrcp.f32 %v3404_v6  ;;  %v3689_v6 = vld [vmem:[#allocation8 + $0xd0] sm:$0xff]  ;;  %v3724_v8 = vld [vmem:[#allocation8 + $0x1e8] sm:$0xff] }
 0xb81   :  { %6343 = vrcp.f32 %v3411_v36 }
 0xb89   :  { %v6340_v34 = vpop.eup %6339 }
 0xb8a   :  { %v6342_v35 = vpop.eup %6341  ;;  %v3415_v1 = vmul.f32 %v6340_v34, %v6338_v28  ;;  %v7581_v28 = vpack.c.bf16 %v3693_v30, %v3689_v6  ;;  %v3696_v34 = vld [vmem:[#allocation8 + $0x108] sm:$0xff]  ;;  %v7617_v6 = vpack.c.bf16 %v3717_v7, %v3713_v17  ;;  %v7619_v30 = vpack.c.bf16 %v3724_v8, %v3720_v47 }
 0xb8b   :  { %v3414_v59 = vmul.f32 %v6342_v35, %v7485_v62  ;;  %v6344_v27 = vpop.eup %6343  ;;  %v3686_v62 = vld [vmem:[#allocation8 + $0xb8] sm:$0xff]  ;;  %v3700_v35 = vld [vmem:[#allocation8 + $0x128] sm:$0xff] }
 0xb8c   :  { %v7564_v22 = vpack.c.bf16 %v3686_v62, %v3682_v58  ;;  %v7586_v36 = vpack.c.bf16 %v3700_v35, %v3696_v34  ;;  %v3716_v58 = vld [vmem:[#allocation8 + $0x1a8] sm:$0xff]  ;;  %v3714_v62 = vld [vmem:[#allocation8 + $0x198] sm:$0xff] }
 0xb8d   :  { %v7529_v29 = vadd.f32 %v3415_v1, %v3414_v59  ;;  %v3698_v1 = vld [vmem:[#allocation8 + $0x118] sm:$0xff]  ;;  %v7608_v10 = vpack.c.bf16 %v3716_v58, %v3712_v41  ;;  %v7610_v49 = vpack.c.bf16 %v3718_v52, %v3714_v62 }
 0xb8e   :  { %v3702_v59 = vld [vmem:[#allocation8 + $0x138] sm:$0xff] }
 0xb8f   :  { %6345 = vtanh.f32 %v7529_v29  ;;  %v7588_v55 = vpack.c.bf16 %v3702_v59, %v3698_v1  ;;  %v3722_v34 = vld [vmem:[#allocation8 + $0x1d8] sm:$0xff]  ;;  %v3719_v1 = vld [vmem:[#allocation8 + $0x1c0] sm:$0xff] }
 0xb90   :  { %v3726_v35 = vld [vmem:[#allocation8 + $0x1f8] sm:$0xff] }
 0xb91   :  { %v7622_v59 = vpack.c.bf16 %v3726_v35, %v3722_v34 }
 0xb99   :  { %v6346_v40 = vpop.eup %6345 }
 0xb9a   :  { %v7532_v33 = vmul.f32 %v6346_v40, %v6344_v27  ;;  %v3695_v27 = vld [vmem:[#allocation8 + $0x100] sm:$0xff] }
 0xb9b   :  { %v3699_v40 = vld [vmem:[#allocation8 + $0x120] sm:$0xff] }
 0xb9c   :  { %3553 = vmatmul.mubr.f32.vlgmr.msra.gmra.mrb[22].mxu0 %v7532_v33  ;;  %3624 = vmatmul.mubr.f32.vlgmr.msra.gmra.mrb[24].mxu1 %v7532_v33  ;;  %v7590_v45 = vpack.c.bf16 %v3699_v40, %v3695_v27  ;;  %v3723_v27 = vld [vmem:[#allocation8 + $0x1e0] sm:$0xff]  ;;  %v3721_v40 = vld [vmem:[#allocation8 + $0x1d0] sm:$0xff] }
 0xb9d   :  { %3791 = vmatprep.mubr.f32.mxu0 %v6529_v0  ;;  %3862 = vmatprep.mubr.f32.mxu1 %v6529_v0  ;;  %v7625_v37 = vpack.c.bf16 %v3723_v27, %v3719_v1  ;;  %v7629_v26 = vpack.c.bf16 %v3725_v56, %v3721_v40 }
 0xb9e   :  { %5749 = vmatpush1.bf16.msra.mxu0 %v7542_v3  ;;  %5781 = vmatpush1.bf16.msra.mxu1 %v7545_v54 }
 0xb9f   :  { %5751 = vmatprep.subr.bf16.mxu0 %v7550_v12  ;;  %5783 = vmatprep.subr.bf16.mxu1 %v7552_v42 }
 0xba2   :  { %5753 = vmatpush1.bf16.msra.mxu0 %v7554_v23  ;;  %5785 = vmatpush1.bf16.msra.mxu1 %v7557_v20 }
 0xba3   :  { %5755 = vmatprep.subr.bf16.mxu0 %v7562_v32  ;;  %5787 = vmatprep.subr.bf16.mxu1 %v7564_v22 }
 0xba6   :  { %5757 = vmatpush1.bf16.msra.mxu0 %v7566_v60  ;;  %5789 = vmatpush1.bf16.msra.mxu1 %v7569_v24 }
 0xba7   :  { %5759 = vmatprep.subr.bf16.mxu0 %v7574_v13  ;;  %5791 = vmatprep.subr.bf16.mxu1 %v7576_v50 }
 0xbaa   :  { %5761 = vmatpush1.bf16.msra.mxu0 %v7578_v46  ;;  %5793 = vmatpush1.bf16.msra.mxu1 %v7581_v28 }
 0xbab   :  { %5763 = vmatprep.subr.bf16.mxu0 %v7586_v36  ;;  %5795 = vmatprep.subr.bf16.mxu1 %v7588_v55 }
 0xbae   :  { %5765 = vmatpush1.bf16.msra.mxu0 %v7590_v45  ;;  %5797 = vmatpush1.bf16.msra.mxu1 %v7593_v57 }
 0xbaf   :  { %5767 = vmatprep.subr.bf16.mxu0 %v7597_v63  ;;  %5799 = vmatprep.subr.bf16.mxu1 %v7600_v15 }
 0xbb2   :  { %5769 = vmatpush1.bf16.msra.mxu0 %v7602_v43  ;;  %5801 = vmatpush1.bf16.msra.mxu1 %v7605_v2 }
 0xbb3   :  { %5771 = vmatprep.subr.bf16.mxu0 %v7608_v10  ;;  %5803 = vmatprep.subr.bf16.mxu1 %v7610_v49 }
 0xbb6   :  { %5773 = vmatpush1.bf16.msra.mxu0 %v7613_v5  ;;  %5805 = vmatpush1.bf16.msra.mxu1 %v7617_v6 }
 0xbb7   :  { %5775 = vmatprep.subr.bf16.mxu0 %v7619_v30  ;;  %5807 = vmatprep.subr.bf16.mxu1 %v7622_v59 }
 0xbba   :  { %5777 = vmatpush1.bf16.msra.mxu0 %v7625_v37  ;;  %5809 = vmatpush1.bf16.msra.mxu1 %v7629_v26 }
 0xbbb   :  { %5811 = vmatprep.subr.bf16.mxu0 %v7538_v44  ;;  %5843 = vmatprep.subr.bf16.mxu1 %v7540_v61 }
 0xc6f   :  { %v3554_v53 = vpop.f32.mrb[22].mxu0  ;;  %v3625_v38 = vpop.f32.mrb[24].mxu1 }
 0xc70   :  { %v6074_v14 = vadd.f32 %v3554_v53, %v7421_v11  ;;  %v3556_v25 = vpop.f32.mrb[23].mxu0  ;;  %v3627_v51 = vpop.f32.mrb[25].mxu1  ;;  %v6090_v52 = vadd.f32 %v3625_v38, %v7436_v18 }
 0xc71   :  { %v6075_v19 = vadd.f32 %v3556_v25, %v7425_v31  ;;  %v6091_v58 = vadd.f32 %v3627_v51, %v7431_v16 }
 0xc72   :  { %v4822_v4 = vmul.f32 -1.442695, %v6074_v14 }
 0xc73   :  { %v4823_v41 = vmul.f32 -1.442695, %v6075_v19  ;;  %v4824_v62 = vmul.f32 -1.442695, %v6091_v58 }
 0xc74   :  { %6347 = vpow2.f32 %v4822_v4 }
 0xc75   :  { %6349 = vpow2.f32 %v4823_v41 }
 0xc76   :  { %6351 = vpow2.f32 %v4824_v62 }
 0xc77   :  { %6353 = vtanh.f32 %v6090_v52 }
 0xc7e   :  { %v6348_v39 = vpop.eup %6347 }
 0xc7f   :  { %v6350_v21 = vpop.eup %6349  ;;  %v3637_v17 = vadd.f32 1.0, %v6348_v39 }
 0xc80   :  { %v3643_v7 = vadd.f32 1.0, %v6350_v21  ;;  %v6352_v47 = vpop.eup %6351 }
 0xc81   :  { %6355 = vrcp.f32 %v3637_v17  ;;  %v6354_v8 = vpop.eup %6353  ;;  %v3650_v27 = vadd.f32 1.0, %v6352_v47 }
 0xc82   :  { %6357 = vrcp.f32 %v3643_v7 }
 0xc83   :  { %6359 = vrcp.f32 %v3650_v27 }
 0xc8b   :  { %v6356_v34 = vpop.eup %6355 }
 0xc8c   :  { %v6358_v35 = vpop.eup %6357  ;;  %v3654_v1 = vmul.f32 %v6356_v34, %v6354_v8 }
 0xc8d   :  { %v3653_v40 = vmul.f32 %v6358_v35, %v7529_v29  ;;  %v6360_v53 = vpop.eup %6359 }
 0xc8f   :  { %v7641_v56 = vadd.f32 %v3654_v1, %v3653_v40 }
 0xc91   :  { %6361 = vtanh.f32 %v7641_v56 }
 0xc9b   :  { %v6362_v38 = vpop.eup %6361 }
 0xc9c   :  { %v7644_v14 = vmul.f32 %v6362_v38, %v6360_v53 }
 0xc9e   :  { %3792 = vmatmul.mubr.f32.vlgmr.msra.gmra.mrb[24].mxu0 %v7644_v14  ;;  %3863 = vmatmul.mubr.f32.vlgmr.msra.gmra.mrb[26].mxu1 %v7644_v14 }
 0xc9f   :  { %5813 = vmatpush1.bf16.msra.mxu0 %v7542_v3  ;;  %5845 = vmatpush1.bf16.msra.mxu1 %v7545_v54 }
 0xca0   :  { %5815 = vmatprep.subr.bf16.mxu0 %v7550_v12  ;;  %5847 = vmatprep.subr.bf16.mxu1 %v7552_v42 }
 0xca1   :  { %4030 = vmatprep.mubr.f32.mxu0 %v6529_v0  ;;  %4101 = vmatprep.mubr.f32.mxu1 %v6529_v0 }
 0xca3   :  { %5817 = vmatpush1.bf16.msra.mxu0 %v7554_v23  ;;  %5849 = vmatpush1.bf16.msra.mxu1 %v7557_v20 }
 0xca4   :  { %5819 = vmatprep.subr.bf16.mxu0 %v7562_v32  ;;  %5851 = vmatprep.subr.bf16.mxu1 %v7564_v22 }
 0xca7   :  { %5821 = vmatpush1.bf16.msra.mxu0 %v7566_v60  ;;  %5853 = vmatpush1.bf16.msra.mxu1 %v7569_v24 }
 0xca8   :  { %5823 = vmatprep.subr.bf16.mxu0 %v7574_v13  ;;  %5855 = vmatprep.subr.bf16.mxu1 %v7576_v50 }
 0xcab   :  { %5825 = vmatpush1.bf16.msra.mxu0 %v7578_v46  ;;  %5857 = vmatpush1.bf16.msra.mxu1 %v7581_v28 }
 0xcac   :  { %5827 = vmatprep.subr.bf16.mxu0 %v7586_v36  ;;  %5859 = vmatprep.subr.bf16.mxu1 %v7588_v55 }
 0xcaf   :  { %5829 = vmatpush1.bf16.msra.mxu0 %v7590_v45  ;;  %5861 = vmatpush1.bf16.msra.mxu1 %v7593_v57 }
 0xcb0   :  { %5831 = vmatprep.subr.bf16.mxu0 %v7597_v63  ;;  %5863 = vmatprep.subr.bf16.mxu1 %v7600_v15 }
 0xcb3   :  { %5833 = vmatpush1.bf16.msra.mxu0 %v7602_v43  ;;  %5865 = vmatpush1.bf16.msra.mxu1 %v7605_v2 }
 0xcb4   :  { %5835 = vmatprep.subr.bf16.mxu0 %v7608_v10  ;;  %5867 = vmatprep.subr.bf16.mxu1 %v7610_v49 }
 0xcb7   :  { %5837 = vmatpush1.bf16.msra.mxu0 %v7613_v5  ;;  %5869 = vmatpush1.bf16.msra.mxu1 %v7617_v6 }
 0xcb8   :  { %5839 = vmatprep.subr.bf16.mxu0 %v7619_v30  ;;  %5871 = vmatprep.subr.bf16.mxu1 %v7622_v59 }
 0xcbb   :  { %5841 = vmatpush1.bf16.msra.mxu0 %v7625_v37  ;;  %5873 = vmatpush1.bf16.msra.mxu1 %v7629_v26 }
 0xcbc   :  { %5875 = vmatprep.subr.bf16.mxu0 %v7538_v44  ;;  %5907 = vmatprep.subr.bf16.mxu1 %v7540_v61 }
 0xd71   :  { %v3793_v29 = vpop.f32.mrb[24].mxu0  ;;  %v3864_v25 = vpop.f32.mrb[26].mxu1 }
 0xd72   :  { %v6076_v51 = vadd.f32 %v3793_v29, %v7421_v11  ;;  %v3795_v19 = vpop.f32.mrb[25].mxu0  ;;  %v3866_v4 = vpop.f32.mrb[27].mxu1  ;;  %v6092_v21 = vadd.f32 %v3864_v25, %v7436_v18 }
 0xd73   :  { %v6077_v41 = vadd.f32 %v3795_v19, %v7425_v31  ;;  %v6093_v52 = vadd.f32 %v3866_v4, %v7431_v16 }
 0xd74   :  { %v4825_v58 = vmul.f32 -1.442695, %v6076_v51 }
 0xd75   :  { %v4826_v62 = vmul.f32 -1.442695, %v6077_v41  ;;  %v4827_v39 = vmul.f32 -1.442695, %v6093_v52 }
 0xd76   :  { %6363 = vpow2.f32 %v4825_v58 }
 0xd77   :  { %6365 = vpow2.f32 %v4826_v62 }
 0xd78   :  { %6367 = vpow2.f32 %v4827_v39 }
 0xd79   :  { %6369 = vtanh.f32 %v6092_v21 }
 0xd80   :  { %v6364_v17 = vpop.eup %6363 }
 0xd81   :  { %v6366_v7 = vpop.eup %6365  ;;  %v3876_v47 = vadd.f32 1.0, %v6364_v17 }
 0xd82   :  { %v3882_v8 = vadd.f32 1.0, %v6366_v7  ;;  %v6368_v34 = vpop.eup %6367 }
 0xd83   :  { %6371 = vrcp.f32 %v3876_v47  ;;  %v6370_v35 = vpop.eup %6369  ;;  %v3889_v53 = vadd.f32 1.0, %v6368_v34 }
 0xd84   :  { %6373 = vrcp.f32 %v3882_v8 }
 0xd85   :  { %6375 = vrcp.f32 %v3889_v53 }
 0xd8d   :  { %v6372_v1 = vpop.eup %6371 }
 0xd8e   :  { %v6374_v27 = vpop.eup %6373  ;;  %v3893_v40 = vmul.f32 %v6372_v1, %v6370_v35 }
 0xd8f   :  { %v3892_v38 = vmul.f32 %v6374_v27, %v7641_v56  ;;  %v6376_v25 = vpop.eup %6375 }
 0xd91   :  { %v7687_v29 = vadd.f32 %v3893_v40, %v3892_v38 }
 0xd93   :  { %6377 = vtanh.f32 %v7687_v29 }
 0xd9d   :  { %v6378_v51 = vpop.eup %6377 }
 0xd9e   :  { %v7690_v19 = vmul.f32 %v6378_v51, %v6376_v25 }
 0xda0   :  { %4031 = vmatmul.mubr.f32.vlgmr.msra.gmra.mrb[26].mxu0 %v7690_v19  ;;  %4102 = vmatmul.mubr.f32.vlgmr.msra.gmra.mrb[28].mxu1 %v7690_v19 }
 0xda1   :  { %5877 = vmatpush1.bf16.msra.mxu0 %v7542_v3  ;;  %5909 = vmatpush1.bf16.msra.mxu1 %v7545_v54 }
 0xda2   :  { %5879 = vmatprep.subr.bf16.mxu0 %v7550_v12  ;;  %5911 = vmatprep.subr.bf16.mxu1 %v7552_v42 }
 0xda3   :  { %4269 = vmatprep.mubr.f32.mxu0 %v6529_v0  ;;  %4340 = vmatprep.mubr.f32.mxu1 %v6529_v0 }
 0xda5   :  { %5881 = vmatpush1.bf16.msra.mxu0 %v7554_v23  ;;  %5913 = vmatpush1.bf16.msra.mxu1 %v7557_v20 }
 0xda6   :  { %5883 = vmatprep.subr.bf16.mxu0 %v7562_v32  ;;  %5915 = vmatprep.subr.bf16.mxu1 %v7564_v22 }
 0xda9   :  { %5885 = vmatpush1.bf16.msra.mxu0 %v7566_v60  ;;  %5917 = vmatpush1.bf16.msra.mxu1 %v7569_v24 }
 0xdaa   :  { %5887 = vmatprep.subr.bf16.mxu0 %v7574_v13  ;;  %5919 = vmatprep.subr.bf16.mxu1 %v7576_v50 }
 0xdad   :  { %5889 = vmatpush1.bf16.msra.mxu0 %v7578_v46  ;;  %5921 = vmatpush1.bf16.msra.mxu1 %v7581_v28 }
 0xdae   :  { %5891 = vmatprep.subr.bf16.mxu0 %v7586_v36  ;;  %5923 = vmatprep.subr.bf16.mxu1 %v7588_v55 }
 0xdb1   :  { %5893 = vmatpush1.bf16.msra.mxu0 %v7590_v45  ;;  %5925 = vmatpush1.bf16.msra.mxu1 %v7593_v57 }
 0xdb2   :  { %5895 = vmatprep.subr.bf16.mxu0 %v7597_v63  ;;  %5927 = vmatprep.subr.bf16.mxu1 %v7600_v15 }
 0xdb5   :  { %5897 = vmatpush1.bf16.msra.mxu0 %v7602_v43  ;;  %5929 = vmatpush1.bf16.msra.mxu1 %v7605_v2 }
 0xdb6   :  { %5899 = vmatprep.subr.bf16.mxu0 %v7608_v10  ;;  %5931 = vmatprep.subr.bf16.mxu1 %v7610_v49 }
 0xdb9   :  { %5901 = vmatpush1.bf16.msra.mxu0 %v7613_v5  ;;  %5933 = vmatpush1.bf16.msra.mxu1 %v7617_v6 }
 0xdba   :  { %5903 = vmatprep.subr.bf16.mxu0 %v7619_v30  ;;  %5935 = vmatprep.subr.bf16.mxu1 %v7622_v59 }
 0xdbd   :  { %5905 = vmatpush1.bf16.msra.mxu0 %v7625_v37  ;;  %5937 = vmatpush1.bf16.msra.mxu1 %v7629_v26 }
 0xdbe   :  { %5939 = vmatprep.subr.bf16.mxu0 %v7538_v44  ;;  %5971 = vmatprep.subr.bf16.mxu1 %v7540_v61 }
 0xe73   :  { %v4032_v56 = vpop.f32.mrb[26].mxu0  ;;  %v4103_v4 = vpop.f32.mrb[28].mxu1 }
 0xe74   :  { %v6078_v41 = vadd.f32 %v4032_v56, %v7421_v11  ;;  %v4034_v58 = vpop.f32.mrb[27].mxu0  ;;  %v4105_v62 = vpop.f32.mrb[29].mxu1  ;;  %v6094_v47 = vadd.f32 %v4103_v4, %v7436_v18 }
 0xe75   :  { %v6079_v52 = vadd.f32 %v4034_v58, %v7425_v31  ;;  %v6095_v17 = vadd.f32 %v4105_v62, %v7431_v16  ;;  %v4627_v58 = vld [vmem:[#allocation9 + $0x20] sm:$0xff]  ;;  %v4628_v62 = vld [vmem:[#allocation9 + $0x28] sm:$0xff] }
 0xe76   :  { %v4828_v39 = vmul.f32 -1.442695, %v6078_v41 }
 0xe77   :  { %v4829_v21 = vmul.f32 -1.442695, %v6079_v52  ;;  %v4830_v7 = vmul.f32 -1.442695, %v6095_v17  ;;  %v6010_v52 = vpack.c.bf16 %v4628_v62, %v4627_v58 }
 0xe78   :  { %6379 = vpow2.f32 %v4828_v39  ;;  %v4629_v39 = vld [vmem:[#allocation9 + $0x30] sm:$0xff] }
 0xe79   :  { %6381 = vpow2.f32 %v4829_v21  ;;  %v4630_v21 = vld [vmem:[#allocation9 + $0x38] sm:$0xff] }
 0xe7a   :  { %6383 = vpow2.f32 %v4830_v7  ;;  %v6014_v17 = vpack.c.bf16 %v4630_v21, %v4629_v39  ;;  %v4631_v7 = vld [vmem:[#allocation9 + $0x40] sm:$0xff] }
 0xe7b   :  { %6385 = vtanh.f32 %v6094_v47  ;;  %v4632_v47 = vld [vmem:[#allocation9 + $0x48] sm:$0xff] }
 0xe82   :  { %v6380_v44 = vpop.eup %6379 }
 0xe83   :  { %v6382_v8 = vpop.eup %6381  ;;  %v4115_v61 = vadd.f32 1.0, %v6380_v44  ;;  %v6018_v44 = vpack.c.bf16 %v4632_v47, %v4631_v7 }
 0xe84   :  { %v4121_v34 = vadd.f32 1.0, %v6382_v8  ;;  %v6384_v35 = vpop.eup %6383  ;;  %v4633_v8 = vld [vmem:[#allocation9 + $0x50] sm:$0xff] }
 0xe85   :  { %6387 = vrcp.f32 %v4115_v61  ;;  %v6386_v1 = vpop.eup %6385  ;;  %v4128_v38 = vadd.f32 1.0, %v6384_v35  ;;  %v4634_v61 = vld [vmem:[#allocation9 + $0x58] sm:$0xff]  ;;  %v4635_v35 = vld [vmem:[#allocation9 + $0x60] sm:$0xff] }
 0xe86   :  { %6389 = vrcp.f32 %v4121_v34  ;;  %v6022_v34 = vpack.c.bf16 %v4634_v61, %v4633_v8 }
 0xe87   :  { %6391 = vrcp.f32 %v4128_v38 }
 0xe8f   :  { %v6388_v27 = vpop.eup %6387 }
 0xe90   :  { %v6390_v40 = vpop.eup %6389  ;;  %v4132_v53 = vmul.f32 %v6388_v27, %v6386_v1  ;;  %v4636_v1 = vld [vmem:[#allocation9 + $0x68] sm:$0xff]  ;;  %v4637_v27 = vld [vmem:[#allocation9 + $0x70] sm:$0xff] }
 0xe91   :  { %v4131_v25 = vmul.f32 %v6390_v40, %v7687_v29  ;;  %v6392_v56 = vpop.eup %6391  ;;  %v4638_v40 = vld [vmem:[#allocation9 + $0x78] sm:$0xff] }
 0xe93   :  { %v7733_v51 = vadd.f32 %v4132_v53, %v4131_v25  ;;  %v6030_v53 = vpack.c.bf16 %v4638_v40, %v4637_v27 }
 0xe95   :  { %6393 = vtanh.f32 %v7733_v51 }
 0xe9f   :  { %v6394_v4 = vpop.eup %6393 }
 0xea0   :  { %v7736_v41 = vmul.f32 %v6394_v4, %v6392_v56 }
 0xea2   :  { %4270 = vmatmul.mubr.f32.vlgmr.msra.gmra.mrb[28].mxu0 %v7736_v41  ;;  %4341 = vmatmul.mubr.f32.vlgmr.msra.gmra.mrb[30].mxu1 %v7736_v41 }
 0xea3   :  { %5941 = vmatpush1.bf16.msra.mxu0 %v7542_v3  ;;  %5973 = vmatpush1.bf16.msra.mxu1 %v7545_v54  ;;  %v4624_v3 = vld [vmem:[#allocation9 + $0x8] sm:$0xff] }
 0xea4   :  { %5943 = vmatprep.subr.bf16.mxu0 %v7550_v12  ;;  %5975 = vmatprep.subr.bf16.mxu1 %v7552_v42 }
 0xea5   :  { %4508 = vmatprep.mubr.f32.mxu0 %v6529_v0  ;;  %4579 = vmatprep.mubr.f32.mxu1 %v6529_v0  ;;  %v4623_v0 = vld [vmem:[#allocation9] sm:$0xff] }
 0xea6   :  { %v6002_v54 = vpack.c.bf16 %v4624_v3, %v4623_v0 }
 0xea7   :  { %5945 = vmatpush1.bf16.msra.mxu0 %v7554_v23  ;;  %5977 = vmatpush1.bf16.msra.mxu1 %v7557_v20 }
 0xea8   :  { %5947 = vmatprep.subr.bf16.mxu0 %v7562_v32  ;;  %5979 = vmatprep.subr.bf16.mxu1 %v7564_v22 }
 0xeab   :  { %5949 = vmatpush1.bf16.msra.mxu0 %v7566_v60  ;;  %5981 = vmatpush1.bf16.msra.mxu1 %v7569_v24 }
 0xeac   :  { %5951 = vmatprep.subr.bf16.mxu0 %v7574_v13  ;;  %5983 = vmatprep.subr.bf16.mxu1 %v7576_v50 }
 0xeaf   :  { %5953 = vmatpush1.bf16.msra.mxu0 %v7578_v46  ;;  %5985 = vmatpush1.bf16.msra.mxu1 %v7581_v28 }
 0xeb0   :  { %5955 = vmatprep.subr.bf16.mxu0 %v7586_v36  ;;  %5987 = vmatprep.subr.bf16.mxu1 %v7588_v55 }
 0xeb3   :  { %5957 = vmatpush1.bf16.msra.mxu0 %v7590_v45  ;;  %5989 = vmatpush1.bf16.msra.mxu1 %v7593_v57 }
 0xeb4   :  { %5959 = vmatprep.subr.bf16.mxu0 %v7597_v63  ;;  %5991 = vmatprep.subr.bf16.mxu1 %v7600_v15 }
 0xeb7   :  { %5961 = vmatpush1.bf16.msra.mxu0 %v7602_v43  ;;  %5993 = vmatpush1.bf16.msra.mxu1 %v7605_v2 }
 0xeb8   :  { %5963 = vmatprep.subr.bf16.mxu0 %v7608_v10  ;;  %5995 = vmatprep.subr.bf16.mxu1 %v7610_v49 }
 0xebb   :  { %5965 = vmatpush1.bf16.msra.mxu0 %v7613_v5  ;;  %5997 = vmatpush1.bf16.msra.mxu1 %v7617_v6  ;;  %v4625_v6 = vld [vmem:[#allocation9 + $0x10] sm:$0xff] }
 0xebc   :  { %5967 = vmatprep.subr.bf16.mxu0 %v7619_v30  ;;  %5999 = vmatprep.subr.bf16.mxu1 %v7622_v59  ;;  %v4626_v30 = vld [vmem:[#allocation9 + $0x18] sm:$0xff] }
 0xebd   :  { %v6006_v29 = vpack.c.bf16 %v4626_v30, %v4625_v6 }
 0xebf   :  { %5969 = vmatpush1.bf16.msra.mxu0 %v7625_v37  ;;  %6001 = vmatpush1.bf16.msra.mxu1 %v7629_v26 }
 0xec0   :  { %6003 = vmatprep.subr.bf16.mxu0 %v6002_v54 }
 0xf75   :  { %v4271_v12 = vpop.f32.mrb[28].mxu0  ;;  %v4342_v42 = vpop.f32.mrb[30].mxu1 }
 0xf76   :  { %v6080_v23 = vadd.f32 %v4271_v12, %v7421_v11  ;;  %v4273_v20 = vpop.f32.mrb[29].mxu0  ;;  %v4344_v32 = vpop.f32.mrb[31].mxu1  ;;  %v6096_v46 = vadd.f32 %v4342_v42, %v7436_v18 }
 0xf77   :  { %v6081_v22 = vadd.f32 %v4273_v20, %v7425_v31  ;;  %v6097_v13 = vadd.f32 %v4344_v32, %v7431_v16 }
 0xf78   :  { %v4831_v60 = vmul.f32 -1.442695, %v6080_v23 }
 0xf79   :  { %v4832_v24 = vmul.f32 -1.442695, %v6081_v22  ;;  %v4833_v50 = vmul.f32 -1.442695, %v6097_v13 }
 0xf7a   :  { %6395 = vpow2.f32 %v4831_v60 }
 0xf7b   :  { %6397 = vpow2.f32 %v4832_v24 }
 0xf7c   :  { %6399 = vpow2.f32 %v4833_v50 }
 0xf7d   :  { %6401 = vtanh.f32 %v6096_v46 }
 0xf84   :  { %v6396_v28 = vpop.eup %6395 }
 0xf85   :  { %v6398_v36 = vpop.eup %6397  ;;  %v4354_v55 = vadd.f32 1.0, %v6396_v28 }
 0xf86   :  { %v4360_v45 = vadd.f32 1.0, %v6398_v36  ;;  %v6400_v57 = vpop.eup %6399 }
 0xf87   :  { %6403 = vrcp.f32 %v4354_v55  ;;  %v6402_v63 = vpop.eup %6401  ;;  %v4367_v10 = vadd.f32 1.0, %v6400_v57 }
 0xf88   :  { %6405 = vrcp.f32 %v4360_v45 }
 0xf89   :  { %6407 = vrcp.f32 %v4367_v10 }
 0xf91   :  { %v6404_v15 = vpop.eup %6403 }
 0xf92   :  { %v6406_v43 = vpop.eup %6405  ;;  %v4371_v2 = vmul.f32 %v6404_v15, %v6402_v63 }
 0xf93   :  { %v4370_v49 = vmul.f32 %v6406_v43, %v7733_v51  ;;  %v6408_v59 = vpop.eup %6407 }
 0xf95   :  { %v7777_v5 = vadd.f32 %v4371_v2, %v4370_v49 }
 0xf97   :  { %6409 = vtanh.f32 %v7777_v5 }
 0xfa1   :  { %v6410_v37 = vpop.eup %6409 }
 0xfa2   :  { %v4374_v26 = vmul.f32 %v6410_v37, %v6408_v59 }
 0xfa4   :  { %4509 = vmatmul.mubr.f32.vlgmr.msra.gmra.mrb[30].mxu0 %v4374_v26  ;;  %4580 = vmatmul.mubr.f32.vlgmr.msra.gmra.mrb[32].mxu1 %v4374_v26 }
 0xfa5   :  { %6005 = vmatpush3.bf16.msra.mxu0 %v6002_v54  ;;  %4894 = vmatprep.mubr.f32.mxu0 %v7442_v9  ;;  %v6026_v9 = vpack.c.bf16 %v4636_v1, %v4635_v35 }
 0xfa6   :  { %6007 = vmatprep.subr.bf16.mxu0 %v6006_v29 }
 0xfa9   :  { %6009 = vmatpush3.bf16.msra.mxu0 %v6006_v29 }
 0xfaa   :  { %6011 = vmatprep.subr.bf16.mxu0 %v6010_v52 }
 0xfad   :  { %6013 = vmatpush3.bf16.msra.mxu0 %v6010_v52 }
 0xfae   :  { %6015 = vmatprep.subr.bf16.mxu0 %v6014_v17 }
 0xfb1   :  { %6017 = vmatpush3.bf16.msra.mxu0 %v6014_v17 }
 0xfb2   :  { %6019 = vmatprep.subr.bf16.mxu0 %v6018_v44 }
 0xfb5   :  { %6021 = vmatpush3.bf16.msra.mxu0 %v6018_v44 }
 0xfb6   :  { %6023 = vmatprep.subr.bf16.mxu0 %v6022_v34 }
 0xfb9   :  { %6025 = vmatpush3.bf16.msra.mxu0 %v6022_v34 }
 0xfba   :  { %6027 = vmatprep.subr.bf16.mxu0 %v6026_v9 }
 0xfbd   :  { %6029 = vmatpush3.bf16.msra.mxu0 %v6026_v9 }
 0xfbe   :  { %6031 = vmatprep.subr.bf16.mxu0 %v6030_v53 }
 0xfc1   :  { %6033 = vmatpush3.bf16.msra.mxu0 %v6030_v53 }
 0xfc4   :  { %4895 = vmatmul.mubr.f32.vlgmr.msra.gmra.mrb[32].mxu0 %v7488_v48 }
 0xfc5   :  { %4897 = vmatprep.mubr.f32.mxu0 %v7532_v33 }
 0xfc8   :  { %4898 = vmatmul.mubr.f32.gmra.mrb[34].mxu0 %v7644_v14 }
 0xfc9   :  { %4900 = vmatprep.mubr.f32.mxu0 %v7690_v19 }
 0xfcc   :  { %4901 = vmatmul.mubr.f32.gmra.mrb[36].mxu0 %v7736_v41 }
 0xfcd   :  { %4903 = vmatprep.mubr.f32.mxu0 %v4374_v26 }
0x1077   :  { %v4510_v38 = vpop.f32.mrb[30].mxu0  ;;  %v4581_v25 = vpop.f32.mrb[32].mxu1 }
0x1078   :  { %v6082_v51 = vadd.f32 %v4510_v38, %v7421_v11  ;;  %v4512_v56 = vpop.f32.mrb[31].mxu0  ;;  %v4583_v4 = vpop.f32.mrb[33].mxu1  ;;  %v6098_v14 = vadd.f32 %v4581_v25, %v7436_v18 }
0x1079   :  { %v6083_v0 = vadd.f32 %v4512_v56, %v7425_v31  ;;  %v6099_v48 = vadd.f32 %v4583_v4, %v7431_v16  ;;  %v4837_v16 = vld [vmem:[%s7826_s8] ss:$0 sm:$0xff] }
0x107a   :  { %v4834_v3 = vmul.f32 -1.442695, %v6082_v51 }
0x107b   :  { %v4835_v54 = vmul.f32 -1.442695, %v6083_v0  ;;  %v4836_v33 = vmul.f32 -1.442695, %v6099_v48 }
0x107c   :  { %6411 = vpow2.f32 %v4834_v3 }
0x107d   :  { %6413 = vpow2.f32 %v4835_v54 }
0x107e   :  { %6415 = vpow2.f32 %v4836_v33 }
0x107f   :  { %6417 = vtanh.f32 %v6098_v14 }
0x1086   :  { %v6412_v19 = vpop.eup %6411 }
0x1087   :  { %v6414_v41 = vpop.eup %6413  ;;  %v4593_v12 = vadd.f32 1.0, %v6412_v19 }
0x1088   :  { %v4599_v42 = vadd.f32 1.0, %v6414_v41  ;;  %v6416_v11 = vpop.eup %6415 }
0x1089   :  { %6419 = vrcp.f32 %v4593_v12  ;;  %v6418_v23 = vpop.eup %6417  ;;  %v4606_v22 = vadd.f32 1.0, %v6416_v11 }
0x108a   :  { %6421 = vrcp.f32 %v4599_v42 }
0x108b   :  { %6423 = vrcp.f32 %v4606_v22 }
0x1093   :  { %v6420_v31 = vpop.eup %6419 }
0x1094   :  { %v6422_v20 = vpop.eup %6421  ;;  %v4610_v32 = vmul.f32 %v6420_v31, %v6418_v23 }
0x1095   :  { %v4609_v60 = vmul.f32 %v6422_v20, %v7777_v5  ;;  %v6424_v2 = vpop.eup %6423 }
0x1097   :  { %v4896_v18 = vpop.f32.mrb[32].mxu0  ;;  %v4611_v24 = vadd.f32 %v4610_v32, %v4609_v60 }
0x1098   :  { %v4718_v13 = vadd.f32 %v4896_v18, %v4837_v16  ;;  %v4712_v50 = vpop.f32.mrb[33].mxu0 }
0x1099   :  { %v4713_v46 = vadd.f32 %v4837_v16, %v4712_v50  ;;  %6425 = vtanh.f32 %v4611_v24 }
0x109a   :  { %4752 = vst [vmem:[%s7827_s9 + $0x8] sm:$0xff] %v4718_v13 }
0x109b   :  { %4751 = vst [vmem:[%s7827_s9] sm:$0xff] %v4713_v46  ;;  %v4899_v28 = vpop.f32.mrb[34].mxu0 }
0x109c   :  { %v4728_v36 = vadd.f32 %v4899_v28, %v4837_v16  ;;  %v4722_v55 = vpop.f32.mrb[35].mxu0 }
0x109d   :  { %v4723_v45 = vadd.f32 %v4837_v16, %v4722_v55 }
0x109e   :  { %4754 = vst [vmem:[%s7827_s9 + $0x18] sm:$0xff] %v4728_v36 }
0x109f   :  { %4753 = vst [vmem:[%s7827_s9 + $0x10] sm:$0xff] %v4723_v45  ;;  %v4902_v57 = vpop.f32.mrb[36].mxu0 }
0x10a0   :  { %v4738_v63 = vadd.f32 %v4902_v57, %v4837_v16  ;;  %v4732_v15 = vpop.f32.mrb[37].mxu0 }
0x10a1   :  { %v4733_v43 = vadd.f32 %v4837_v16, %v4732_v15 }
0x10a2   :  { %4756 = vst [vmem:[%s7827_s9 + $0x28] sm:$0xff] %v4738_v63 }
0x10a3   :  { %v6426_v10 = vpop.eup %6425  ;;  %4755 = vst [vmem:[%s7827_s9 + $0x20] sm:$0xff] %v4733_v43 }
0x10a4   :  { %v4613_v49 = vmul.f32 %v6426_v10, %v6424_v2 }
0x10a6   :  { %4904 = vmatmul.mubr.f32.gmra.mrb[38].mxu0 %v4613_v49 }
0x1179   :  { %v4905_v5 = vpop.f32.mrb[38].mxu0 }
0x117a   :  { %v4748_v6 = vadd.f32 %v4905_v5, %v4837_v16  ;;  %v4742_v30 = vpop.f32.mrb[39].mxu0 }
0x117b   :  { %v4743_v59 = vadd.f32 %v4837_v16, %v4742_v30 }
0x117c   :  { %4758 = vst [vmem:[%s7827_s9 + $0x38] sm:$0xff] %v4748_v6 }
0x117d   :  { %4757 = vst [vmem:[%s7827_s9 + $0x30] sm:$0xff] %v4743_v59 }
0x117e   :  { %4763 = vsyncpa [#allocation5], 1 }
0x117f   :  { %4764 = vsyncpa [#allocation7], 1 }
0x1180   :  { %4765 = vsyncpa [#allocation10], 1 }

</bundles_post_ra>
